<compile_context>
chip_gen: v7x
topology: tpu7x:2x2x1
jax: 0.10.0
libtpu: 0.0.40
codegen_flags: <defaults>
</compile_context>

<pallas_src>
import jax
import jax.numpy as jnp
from jax.experimental import pallas as pl
from jax.experimental.pallas import tpu as pltpu

# Dense flat row layouts (row index = h*stride + w), with in-bounds checks:
#   conv1 out a1 : valid (14,14), stride 14 -> 196 rows (fully dense)
#   conv2 out a2 : valid (12,12), stride 14 -> rows 0..14*11+11 = 165 -> 166 rows
#                  (max tap read into a1: 30 + 166 = 196 = a1 rows, in bounds)
#   pooled       : valid (6,6),   stride 6  -> 36 rows (fully dense)
#                  (max read into a2: 28*5 + 2*5 + 15 = 165, in bounds)
#   conv3 out a3 : valid (4,4),   stride 6  -> rows 0..6*3+3 = 21 -> 22 rows
#                  (max tap read into pool: 14 + 22 = 36 = pool rows, in bounds)
#   conv4 out    : valid (2,2),   stride 6  -> rows {0,1,6,7} -> 8 rows
#                  (max tap read into a3: 14 + 8 = 22 = a3 rows, in bounds)
_M1, _M2, _MP, _M3, _M4 = 196, 166, 36, 22, 8
_S12, _S34 = 14, 6       # row strides before / after the pool
_K1 = 32                 # conv1 im2col contraction depth (27 zero-padded to 32)


def _tap_offsets(stride):
    # Row offset of 3x3 tap (kh, kw); order matches the (kh*3+kw)*Cin + cin
    # row layout of the 2-D weight slabs.
    return [kh * stride + kw for kh in range(3) for kw in range(3)]


def _mynet_fused_kernel(x_ref, w1_ref, b1_ref, w2_ref, b2_ref,
                        w3_ref, b3_ref, w4_ref, b4_ref,
                        o_ref, a1_ref, a2_ref, pool_ref, a3_ref, patch_ref):
    f32, bf16 = jnp.float32, jnp.bfloat16

    def conv_im2col(src_ref, rows, cin, stride, w_ref, b_ref):
        """3x3 VALID conv: write 9 row-shifted bf16 slabs into the shared
        im2col patch (taps concatenated along the contraction dim), then a
        single (rows, 9*cin) x (9*cin, cout) MXU dot with f32 accumulation."""
        for t, off in enumerate(_tap_offsets(stride)):
            patch_ref[0:rows, t * cin:(t + 1) * cin] = (
                src_ref[off:off + rows, :].astype(bf16))
        acc = jnp.dot(patch_ref[0:rows, 0:9 * cin], w_ref[...],
                      preferred_element_type=f32)
        return acc + b_ref[...]

    # conv1: (16,16,3) -> (14,14,64).  Patches pre-built in the wrapper ->
    # one (196, 32) x (32, 64) dot.
    a1_ref[...] = (jnp.dot(x_ref[0], w1_ref[...], preferred_element_type=f32)
                   + b1_ref[...])

    # conv2: (14,14,64) -> (12,12,64), one K=576 dot over 166 rows.
    a2_ref[...] = conv_im2col(a1_ref, _M2, 64, _S12, w2_ref, b2_ref)

    # maxpool 2x2 stride 2, fused with compaction to the dense stride-6 layout:
    # pooled (h, w) -> row 6h + w = max of conv2 rows 28h + 2w + {0, 1, 14, 15}
    # (all of which are valid conv2 pixels since 2w+1 <= 11 < 14).
    for h in range(6):
        base = 2 * h * _S12
        pool_ref[6 * h:6 * h + 6, :] = jnp.maximum(
            jnp.maximum(a2_ref[pl.ds(base, 6, stride=2), :],
                        a2_ref[pl.ds(base + 1, 6, stride=2), :]),
            jnp.maximum(a2_ref[pl.ds(base + _S12, 6, stride=2), :],
                        a2_ref[pl.ds(base + _S12 + 1, 6, stride=2), :]))

    # conv3: (6,6,64) -> (4,4,128), one K=576 dot over 22 rows.
    a3_ref[...] = conv_im2col(pool_ref, _M3, 64, _S34, w3_ref, b3_ref)

    # conv4 + ReLU: (4,4,128) -> (2,2,128), one K=1152 dot over 8 rows.
    a4 = conv_im2col(a3_ref, _M4, 128, _S34, w4_ref, b4_ref)
    a4 = jnp.maximum(a4, 0.0)
    # Valid output pixels live at rows {0,1,6,7}: order (0,0),(0,1),(1,0),(1,1)
    # -> lane-dense (4, 128) output block.
    o_ref[0] = jnp.concatenate([a4[0:2, :], a4[6:8, :]],
                               axis=0).astype(o_ref.dtype)


@jax.jit
def mynet_forward_nchw(x_nchw, params):
    """PyTorch-convention forward: x (N,3,16,16) NCHW -> (N,128,2,2) NCHW."""
    N = x_nchw.shape[0]
    bf16 = jnp.bfloat16

    # conv1 im2col on the tiny input (wrapper-side): (N, 196, 27), pad K to 32.
    x_nhwc = jnp.transpose(x_nchw, (0, 2, 3, 1))                      # (N,16,16,3)
    taps = [x_nhwc[:, kh:kh + 14, kw:kw + 14, :]
            for kh in range(3) for kw in range(3)]                    # 9 x (N,14,14,3)
    x_patch = jnp.stack(taps, axis=3).reshape(N, _M1, 27)             # col = t*3 + c
    x_patch = jnp.pad(x_patch, ((0, 0), (0, 0), (0, _K1 - 27))).astype(bf16)

    # 2-D bf16 weight slabs (9*Cin, Cout); row index = (kh*3+kw)*Cin + cin.
    w1 = jnp.pad(params["w1"].reshape(27, 64),
                 ((0, _K1 - 27), (0, 0))).astype(bf16)
    w2 = params["w2"].reshape(576, 64).astype(bf16)
    w3 = params["w3"].reshape(576, 128).astype(bf16)
    w4 = params["w4"].reshape(1152, 128).astype(bf16)
    b1 = params["b1"].reshape(1, 64)
    b2 = params["b2"].reshape(1, 64)
    b3 = params["b3"].reshape(1, 128)
    b4 = params["b4"].reshape(1, 128)

    def inv(arr):   # grid-invariant full-block spec (weights / biases)
        return pl.BlockSpec(arr.shape, lambda n: (0, 0))

    out = pl.pallas_call(
        _mynet_fused_kernel,
        out_shape=jax.ShapeDtypeStruct((N, 4, 128), x_nchw.dtype),
        grid=(N,),
        in_specs=[
            pl.BlockSpec((1, _M1, _K1), lambda n: (n, 0, 0)),
            inv(w1), inv(b1), inv(w2), inv(b2),
            inv(w3), inv(b3), inv(w4), inv(b4),
        ],
        out_specs=pl.BlockSpec((1, 4, 128), lambda n: (n, 0, 0)),
        scratch_shapes=[
            pltpu.VMEM((_M1, 64), jnp.float32),      # conv1 activation (a1)
            pltpu.VMEM((_M2, 64), jnp.float32),      # conv2 activation (a2)
            pltpu.VMEM((_MP, 64), jnp.float32),      # dense pooled activation
            pltpu.VMEM((_M3, 128), jnp.float32),     # conv3 activation (a3)
            pltpu.VMEM((_M2, 1152), jnp.bfloat16),   # shared im2col patch
        ],
        compiler_params=pltpu.CompilerParams(
            dimension_semantics=("parallel",)),
    )(x_patch, w1, b1, w2, b2, w3, b3, w4, b4)

    # (N, 4, 128) -> (N, 2, 2, 128) -> NCHW (N, 128, 2, 2)
    return jnp.transpose(out.reshape(N, 2, 2, 128), (0, 3, 1, 2))


# ----------------------------------------------------------------------------
# Plain-JAX f32 reference (for the on-device self-check)
# ----------------------------------------------------------------------------
def _ref_forward_nhwc(x, p):
    def conv(x, w, b, relu=False):
        y = jax.lax.conv_general_dilated(
            x, w, window_strides=(1, 1), padding="VALID",
            dimension_numbers=("NHWC", "HWIO", "NHWC"))
        y = y + b
        return jnp.maximum(y, 0.0) if relu else y

    y = conv(x, p["w1"], p["b1"])
    y = conv(y, p["w2"], p["b2"])
    y = jax.lax.reduce_window(y, -jnp.inf, jax.lax.max,
                              (1, 2, 2, 1), (1, 2, 2, 1), "VALID")
    y = conv(y, p["w3"], p["b3"])
    y = conv(y, p["w4"], p["b4"], relu=True)     # ReLU only after conv4 (MyNet)
    return y


# ----------------------------------------------------------------------------
# Deterministic parameter init (PyTorch Conv2d default: U(-1/sqrt(fan_in), ..))
# Weights stored HWIO: (KH, KW, Cin, Cout).
# ----------------------------------------------------------------------------
def init_params(key):
    shapes = {
        "w1": (3, 3, 3, 64), "b1": (64,),
        "w2": (3, 3, 64, 64), "b2": (64,),
        "w3": (3, 3, 64, 128), "b3": (128,),
        "w4": (3, 3, 128, 128), "b4": (128,),
    }
    params = {}
    keys = jax.random.split(key, len(shapes))
    for (name, shape), k in zip(shapes.items(), keys):
        if name.startswith("w"):
            fan_in = shape[0] * shape[1] * shape[2]
        else:
            w_shape = shapes["w" + name[1:]]
            fan_in = w_shape[0] * w_shape[1] * w_shape[2]
        bound = 1.0 / (fan_in ** 0.5)
        params[name] = jax.random.uniform(
            k, shape, jnp.float32, minval=-bound, maxval=bound)
    return params


if __name__ == "__main__":
    key = jax.random.PRNGKey(0)
    pkey, xkey = jax.random.split(key)
    params = init_params(pkey)

    # Input in PyTorch NCHW convention: (batch=2, channels=3, 16, 16)
    x_nchw = jax.random.normal(xkey, (2, 3, 16, 16), jnp.float32)

    out = mynet_forward_nchw(x_nchw, params)
    out = jax.block_until_ready(out)
    assert out.shape == (2, 128, 2, 2), out.shape

    # Self-check against the f32 reference (bf16 matmul operands -> relaxed tol).
    ref = _ref_forward_nhwc(jnp.transpose(x_nchw, (0, 2, 3, 1)), params)
    ref = jnp.transpose(ref, (0, 3, 1, 2))
    assert jnp.allclose(out, ref, atol=5e-2, rtol=5e-2), \
        float(jnp.max(jnp.abs(out - ref)))

    print("KERNEL_OK")
</pallas_src>

<mosaic_0001>
module attributes {stable_mosaic.version = 11 : i64} {
  func.func @_mynet_fused_kernel(%arg0: i32, %arg1: memref<1x196x32xbf16, #tpu.memory_space<vmem>>, %arg2: memref<32x64xbf16, #tpu.memory_space<vmem>>, %arg3: memref<1x64xf32, #tpu.memory_space<vmem>>, %arg4: memref<576x64xbf16, #tpu.memory_space<vmem>>, %arg5: memref<1x64xf32, #tpu.memory_space<vmem>>, %arg6: memref<576x128xbf16, #tpu.memory_space<vmem>>, %arg7: memref<1x128xf32, #tpu.memory_space<vmem>>, %arg8: memref<1152x128xbf16, #tpu.memory_space<vmem>>, %arg9: memref<1x128xf32, #tpu.memory_space<vmem>>, %arg10: memref<1x4x128xf32, #tpu.memory_space<vmem>>, %arg11: memref<196x64xf32, #tpu.memory_space<vmem>>, %arg12: memref<166x64xf32, #tpu.memory_space<vmem>>, %arg13: memref<36x64xf32, #tpu.memory_space<vmem>>, %arg14: memref<22x128xf32, #tpu.memory_space<vmem>>, %arg15: memref<166x1152xbf16, #tpu.memory_space<vmem>>) attributes {dimension_semantics = [#tpu.dimension_semantics<parallel>], iteration_bounds = array<i64: 2>, scalar_prefetch = 0 : i64, scratch_operands = 5 : i64, tpu.core_type = #tpu.core_type<tc>, window_params = [{transform_indices = @transform_0, window_bounds = array<i64: 1, 196, 32>}, {pipeline_mode = #tpu.pipeline_mode<synchronous>, transform_indices = @transform_1, window_bounds = array<i64: 32, 64>}, {pipeline_mode = #tpu.pipeline_mode<synchronous>, transform_indices = @transform_2, window_bounds = array<i64: 1, 64>}, {pipeline_mode = #tpu.pipeline_mode<synchronous>, transform_indices = @transform_3, window_bounds = array<i64: 576, 64>}, {pipeline_mode = #tpu.pipeline_mode<synchronous>, transform_indices = @transform_4, window_bounds = array<i64: 1, 64>}, {pipeline_mode = #tpu.pipeline_mode<synchronous>, transform_indices = @transform_5, window_bounds = array<i64: 576, 128>}, {pipeline_mode = #tpu.pipeline_mode<synchronous>, transform_indices = @transform_6, window_bounds = array<i64: 1, 128>}, {pipeline_mode = #tpu.pipeline_mode<synchronous>, transform_indices = @transform_7, window_bounds = array<i64: 1152, 128>}, {pipeline_mode = #tpu.pipeline_mode<synchronous>, transform_indices = @transform_8, window_bounds = array<i64: 1, 128>}, {transform_indices = @transform_9, window_bounds = array<i64: 1, 4, 128>}]} {
    %c0 = arith.constant 0 : index
    %c0_0 = arith.constant 0 : index
    %c0_1 = arith.constant 0 : index
    %0 = vector.load %arg1[%c0, %c0_0, %c0_1] : memref<1x196x32xbf16, #tpu.memory_space<vmem>>, vector<1x196x32xbf16>
    %1 = vector.shape_cast %0 : vector<1x196x32xbf16> to vector<196x32xbf16>
    %c0_2 = arith.constant 0 : index
    %c0_3 = arith.constant 0 : index
    %2 = vector.load %arg2[%c0_2, %c0_3] : memref<32x64xbf16, #tpu.memory_space<vmem>>, vector<32x64xbf16>
    %cst = arith.constant dense<0.000000e+00> : vector<196x64xf32>
    %3 = tpu.matmul %1, %2, %cst {dimension_numbers = #tpu.dot_dimension_numbers<[1], [0], [0], [1], [0, 0, 1, 1], [], []>} : vector<196x32xbf16>, vector<32x64xbf16>, vector<196x64xf32> -> vector<196x64xf32>
    %c0_4 = arith.constant 0 : index
    %c0_5 = arith.constant 0 : index
    %4 = vector.load %arg3[%c0_4, %c0_5] : memref<1x64xf32, #tpu.memory_space<vmem>>, vector<1x64xf32>
    %5 = vector.broadcast %4 : vector<1x64xf32> to vector<196x64xf32>
    %6 = arith.addf %3, %5 : vector<196x64xf32>
    %c0_6 = arith.constant 0 : index
    %c0_7 = arith.constant 0 : index
    %7 = vector.load %arg11[%c0_6, %c0_7] : memref<196x64xf32, #tpu.memory_space<vmem>>, vector<196x64xf32>
    tpu.vector_store %arg11[%c0_6, %c0_7], %6 {strides = array<i32>} : memref<196x64xf32, #tpu.memory_space<vmem>>, vector<196x64xf32>,
    %c0_8 = arith.constant 0 : index
    %c0_9 = arith.constant 0 : index
    %8 = vector.load %arg11[%c0_8, %c0_9] : memref<196x64xf32, #tpu.memory_space<vmem>>, vector<166x64xf32>
    %9 = arith.truncf %8 : vector<166x64xf32> to vector<166x64xbf16>
    %c0_10 = arith.constant 0 : index
    %c0_11 = arith.constant 0 : index
    %10 = vector.load %arg15[%c0_10, %c0_11] : memref<166x1152xbf16, #tpu.memory_space<vmem>>, vector<166x64xbf16>
    tpu.vector_store %arg15[%c0_10, %c0_11], %9 {strides = array<i32>} : memref<166x1152xbf16, #tpu.memory_space<vmem>>, vector<166x64xbf16>,
    %c1 = arith.constant 1 : index
    %c0_12 = arith.constant 0 : index
    %11 = vector.load %arg11[%c1, %c0_12] : memref<196x64xf32, #tpu.memory_space<vmem>>, vector<166x64xf32>
    %12 = arith.truncf %11 : vector<166x64xf32> to vector<166x64xbf16>
    %c0_13 = arith.constant 0 : index
    %c64 = arith.constant 64 : index
    %13 = vector.load %arg15[%c0_13, %c64] : memref<166x1152xbf16, #tpu.memory_space<vmem>>, vector<166x64xbf16>
    tpu.vector_store %arg15[%c0_13, %c64], %12 {strides = array<i32>} : memref<166x1152xbf16, #tpu.memory_space<vmem>>, vector<166x64xbf16>,
    %c2 = arith.constant 2 : index
    %c0_14 = arith.constant 0 : index
    %14 = vector.load %arg11[%c2, %c0_14] : memref<196x64xf32, #tpu.memory_space<vmem>>, vector<166x64xf32>
    %15 = arith.truncf %14 : vector<166x64xf32> to vector<166x64xbf16>
    %c0_15 = arith.constant 0 : index
    %c128 = arith.constant 128 : index
    %16 = vector.load %arg15[%c0_15, %c128] : memref<166x1152xbf16, #tpu.memory_space<vmem>>, vector<166x64xbf16>
    tpu.vector_store %arg15[%c0_15, %c128], %15 {strides = array<i32>} : memref<166x1152xbf16, #tpu.memory_space<vmem>>, vector<166x64xbf16>,
    %c14 = arith.constant 14 : index
    %c0_16 = arith.constant 0 : index
    %17 = vector.load %arg11[%c14, %c0_16] : memref<196x64xf32, #tpu.memory_space<vmem>>, vector<166x64xf32>
    %18 = arith.truncf %17 : vector<166x64xf32> to vector<166x64xbf16>
    %c0_17 = arith.constant 0 : index
    %c192 = arith.constant 192 : index
    %19 = vector.load %arg15[%c0_17, %c192] : memref<166x1152xbf16, #tpu.memory_space<vmem>>, vector<166x64xbf16>
    tpu.vector_store %arg15[%c0_17, %c192], %18 {strides = array<i32>} : memref<166x1152xbf16, #tpu.memory_space<vmem>>, vector<166x64xbf16>,
    %c15 = arith.constant 15 : index
    %c0_18 = arith.constant 0 : index
    %20 = vector.load %arg11[%c15, %c0_18] : memref<196x64xf32, #tpu.memory_space<vmem>>, vector<166x64xf32>
    %21 = arith.truncf %20 : vector<166x64xf32> to vector<166x64xbf16>
    %c0_19 = arith.constant 0 : index
    %c256 = arith.constant 256 : index
    %22 = vector.load %arg15[%c0_19, %c256] : memref<166x1152xbf16, #tpu.memory_space<vmem>>, vector<166x64xbf16>
    tpu.vector_store %arg15[%c0_19, %c256], %21 {strides = array<i32>} : memref<166x1152xbf16, #tpu.memory_space<vmem>>, vector<166x64xbf16>,
    %c16 = arith.constant 16 : index
    %c0_20 = arith.constant 0 : index
    %23 = vector.load %arg11[%c16, %c0_20] : memref<196x64xf32, #tpu.memory_space<vmem>>, vector<166x64xf32>
    %24 = arith.truncf %23 : vector<166x64xf32> to vector<166x64xbf16>
    %c0_21 = arith.constant 0 : index
    %c320 = arith.constant 320 : index
    %25 = vector.load %arg15[%c0_21, %c320] : memref<166x1152xbf16, #tpu.memory_space<vmem>>, vector<166x64xbf16>
    tpu.vector_store %arg15[%c0_21, %c320], %24 {strides = array<i32>} : memref<166x1152xbf16, #tpu.memory_space<vmem>>, vector<166x64xbf16>,
    %c28 = arith.constant 28 : index
    %c0_22 = arith.constant 0 : index
    %26 = vector.load %arg11[%c28, %c0_22] : memref<196x64xf32, #tpu.memory_space<vmem>>, vector<166x64xf32>
    %27 = arith.truncf %26 : vector<166x64xf32> to vector<166x64xbf16>
    %c0_23 = arith.constant 0 : index
    %c384 = arith.constant 384 : index
    %28 = vector.load %arg15[%c0_23, %c384] : memref<166x1152xbf16, #tpu.memory_space<vmem>>, vector<166x64xbf16>
    tpu.vector_store %arg15[%c0_23, %c384], %27 {strides = array<i32>} : memref<166x1152xbf16, #tpu.memory_space<vmem>>, vector<166x64xbf16>,
    %c29 = arith.constant 29 : index
    %c0_24 = arith.constant 0 : index
    %29 = vector.load %arg11[%c29, %c0_24] : memref<196x64xf32, #tpu.memory_space<vmem>>, vector<166x64xf32>
    %30 = arith.truncf %29 : vector<166x64xf32> to vector<166x64xbf16>
    %c0_25 = arith.constant 0 : index
    %c448 = arith.constant 448 : index
    %31 = vector.load %arg15[%c0_25, %c448] : memref<166x1152xbf16, #tpu.memory_space<vmem>>, vector<166x64xbf16>
    tpu.vector_store %arg15[%c0_25, %c448], %30 {strides = array<i32>} : memref<166x1152xbf16, #tpu.memory_space<vmem>>, vector<166x64xbf16>,
    %c30 = arith.constant 30 : index
    %c0_26 = arith.constant 0 : index
    %32 = vector.load %arg11[%c30, %c0_26] : memref<196x64xf32, #tpu.memory_space<vmem>>, vector<166x64xf32>
    %33 = arith.truncf %32 : vector<166x64xf32> to vector<166x64xbf16>
    %c0_27 = arith.constant 0 : index
    %c512 = arith.constant 512 : index
    %34 = vector.load %arg15[%c0_27, %c512] : memref<166x1152xbf16, #tpu.memory_space<vmem>>, vector<166x64xbf16>
    tpu.vector_store %arg15[%c0_27, %c512], %33 {strides = array<i32>} : memref<166x1152xbf16, #tpu.memory_space<vmem>>, vector<166x64xbf16>,
    %c0_28 = arith.constant 0 : index
    %c0_29 = arith.constant 0 : index
    %35 = vector.load %arg15[%c0_28, %c0_29] : memref<166x1152xbf16, #tpu.memory_space<vmem>>, vector<166x576xbf16>
    %c0_30 = arith.constant 0 : index
    %c0_31 = arith.constant 0 : index
    %36 = vector.load %arg4[%c0_30, %c0_31] : memref<576x64xbf16, #tpu.memory_space<vmem>>, vector<576x64xbf16>
    %cst_32 = arith.constant dense<0.000000e+00> : vector<166x64xf32>
    %37 = tpu.matmul %35, %36, %cst_32 {dimension_numbers = #tpu.dot_dimension_numbers<[1], [0], [0], [1], [0, 0, 1, 1], [], []>} : vector<166x576xbf16>, vector<576x64xbf16>, vector<166x64xf32> -> vector<166x64xf32>
    %c0_33 = arith.constant 0 : index
    %c0_34 = arith.constant 0 : index
    %38 = vector.load %arg5[%c0_33, %c0_34] : memref<1x64xf32, #tpu.memory_space<vmem>>, vector<1x64xf32>
    %39 = vector.broadcast %38 : vector<1x64xf32> to vector<166x64xf32>
    %40 = arith.addf %37, %39 : vector<166x64xf32>
    %c0_35 = arith.constant 0 : index
    %c0_36 = arith.constant 0 : index
    %41 = vector.load %arg12[%c0_35, %c0_36] : memref<166x64xf32, #tpu.memory_space<vmem>>, vector<166x64xf32>
    tpu.vector_store %arg12[%c0_35, %c0_36], %40 {strides = array<i32>} : memref<166x64xf32, #tpu.memory_space<vmem>>, vector<166x64xf32>,
    %c0_37 = arith.constant 0 : index
    %c0_38 = arith.constant 0 : index
    %42 = tpu.strided_load %arg12[%c0_37, %c0_38] {strides = array<i32: 2, 1>} : memref<166x64xf32, #tpu.memory_space<vmem>>, vector<6x64xf32>
    %c1_39 = arith.constant 1 : index
    %c0_40 = arith.constant 0 : index
    %43 = tpu.strided_load %arg12[%c1_39, %c0_40] {strides = array<i32: 2, 1>} : memref<166x64xf32, #tpu.memory_space<vmem>>, vector<6x64xf32>
    %44 = arith.maximumf %42, %43 : vector<6x64xf32>
    %c14_41 = arith.constant 14 : index
    %c0_42 = arith.constant 0 : index
    %45 = tpu.strided_load %arg12[%c14_41, %c0_42] {strides = array<i32: 2, 1>} : memref<166x64xf32, #tpu.memory_space<vmem>>, vector<6x64xf32>
    %c15_43 = arith.constant 15 : index
    %c0_44 = arith.constant 0 : index
    %46 = tpu.strided_load %arg12[%c15_43, %c0_44] {strides = array<i32: 2, 1>} : memref<166x64xf32, #tpu.memory_space<vmem>>, vector<6x64xf32>
    %47 = arith.maximumf %45, %46 : vector<6x64xf32>
    %48 = arith.maximumf %44, %47 : vector<6x64xf32>
    %c0_45 = arith.constant 0 : index
    %c0_46 = arith.constant 0 : index
    %49 = vector.load %arg13[%c0_45, %c0_46] : memref<36x64xf32, #tpu.memory_space<vmem>>, vector<6x64xf32>
    tpu.vector_store %arg13[%c0_45, %c0_46], %48 {strides = array<i32>} : memref<36x64xf32, #tpu.memory_space<vmem>>, vector<6x64xf32>,
    %c28_47 = arith.constant 28 : index
    %c0_48 = arith.constant 0 : index
    %50 = tpu.strided_load %arg12[%c28_47, %c0_48] {strides = array<i32: 2, 1>} : memref<166x64xf32, #tpu.memory_space<vmem>>, vector<6x64xf32>
    %c29_49 = arith.constant 29 : index
    %c0_50 = arith.constant 0 : index
    %51 = tpu.strided_load %arg12[%c29_49, %c0_50] {strides = array<i32: 2, 1>} : memref<166x64xf32, #tpu.memory_space<vmem>>, vector<6x64xf32>
    %52 = arith.maximumf %50, %51 : vector<6x64xf32>
    %c42 = arith.constant 42 : index
    %c0_51 = arith.constant 0 : index
    %53 = tpu.strided_load %arg12[%c42, %c0_51] {strides = array<i32: 2, 1>} : memref<166x64xf32, #tpu.memory_space<vmem>>, vector<6x64xf32>
    %c43 = arith.constant 43 : index
    %c0_52 = arith.constant 0 : index
    %54 = tpu.strided_load %arg12[%c43, %c0_52] {strides = array<i32: 2, 1>} : memref<166x64xf32, #tpu.memory_space<vmem>>, vector<6x64xf32>
    %55 = arith.maximumf %53, %54 : vector<6x64xf32>
    %56 = arith.maximumf %52, %55 : vector<6x64xf32>
    %c6 = arith.constant 6 : index
    %c0_53 = arith.constant 0 : index
    %57 = vector.load %arg13[%c6, %c0_53] : memref<36x64xf32, #tpu.memory_space<vmem>>, vector<6x64xf32>
    tpu.vector_store %arg13[%c6, %c0_53], %56 {strides = array<i32>} : memref<36x64xf32, #tpu.memory_space<vmem>>, vector<6x64xf32>,
    %c56 = arith.constant 56 : index
    %c0_54 = arith.constant 0 : index
    %58 = tpu.strided_load %arg12[%c56, %c0_54] {strides = array<i32: 2, 1>} : memref<166x64xf32, #tpu.memory_space<vmem>>, vector<6x64xf32>
    %c57 = arith.constant 57 : index
    %c0_55 = arith.constant 0 : index
    %59 = tpu.strided_load %arg12[%c57, %c0_55] {strides = array<i32: 2, 1>} : memref<166x64xf32, #tpu.memory_space<vmem>>, vector<6x64xf32>
    %60 = arith.maximumf %58, %59 : vector<6x64xf32>
    %c70 = arith.constant 70 : index
    %c0_56 = arith.constant 0 : index
    %61 = tpu.strided_load %arg12[%c70, %c0_56] {strides = array<i32: 2, 1>} : memref<166x64xf32, #tpu.memory_space<vmem>>, vector<6x64xf32>
    %c71 = arith.constant 71 : index
    %c0_57 = arith.constant 0 : index
    %62 = tpu.strided_load %arg12[%c71, %c0_57] {strides = array<i32: 2, 1>} : memref<166x64xf32, #tpu.memory_space<vmem>>, vector<6x64xf32>
    %63 = arith.maximumf %61, %62 : vector<6x64xf32>
    %64 = arith.maximumf %60, %63 : vector<6x64xf32>
    %c12 = arith.constant 12 : index
    %c0_58 = arith.constant 0 : index
    %65 = vector.load %arg13[%c12, %c0_58] : memref<36x64xf32, #tpu.memory_space<vmem>>, vector<6x64xf32>
    tpu.vector_store %arg13[%c12, %c0_58], %64 {strides = array<i32>} : memref<36x64xf32, #tpu.memory_space<vmem>>, vector<6x64xf32>,
    %c84 = arith.constant 84 : index
    %c0_59 = arith.constant 0 : index
    %66 = tpu.strided_load %arg12[%c84, %c0_59] {strides = array<i32: 2, 1>} : memref<166x64xf32, #tpu.memory_space<vmem>>, vector<6x64xf32>
    %c85 = arith.constant 85 : index
    %c0_60 = arith.constant 0 : index
    %67 = tpu.strided_load %arg12[%c85, %c0_60] {strides = array<i32: 2, 1>} : memref<166x64xf32, #tpu.memory_space<vmem>>, vector<6x64xf32>
    %68 = arith.maximumf %66, %67 : vector<6x64xf32>
    %c98 = arith.constant 98 : index
    %c0_61 = arith.constant 0 : index
    %69 = tpu.strided_load %arg12[%c98, %c0_61] {strides = array<i32: 2, 1>} : memref<166x64xf32, #tpu.memory_space<vmem>>, vector<6x64xf32>
    %c99 = arith.constant 99 : index
    %c0_62 = arith.constant 0 : index
    %70 = tpu.strided_load %arg12[%c99, %c0_62] {strides = array<i32: 2, 1>} : memref<166x64xf32, #tpu.memory_space<vmem>>, vector<6x64xf32>
    %71 = arith.maximumf %69, %70 : vector<6x64xf32>
    %72 = arith.maximumf %68, %71 : vector<6x64xf32>
    %c18 = arith.constant 18 : index
    %c0_63 = arith.constant 0 : index
    %73 = vector.load %arg13[%c18, %c0_63] : memref<36x64xf32, #tpu.memory_space<vmem>>, vector<6x64xf32>
    tpu.vector_store %arg13[%c18, %c0_63], %72 {strides = array<i32>} : memref<36x64xf32, #tpu.memory_space<vmem>>, vector<6x64xf32>,
    %c112 = arith.constant 112 : index
    %c0_64 = arith.constant 0 : index
    %74 = tpu.strided_load %arg12[%c112, %c0_64] {strides = array<i32: 2, 1>} : memref<166x64xf32, #tpu.memory_space<vmem>>, vector<6x64xf32>
    %c113 = arith.constant 113 : index
    %c0_65 = arith.constant 0 : index
    %75 = tpu.strided_load %arg12[%c113, %c0_65] {strides = array<i32: 2, 1>} : memref<166x64xf32, #tpu.memory_space<vmem>>, vector<6x64xf32>
    %76 = arith.maximumf %74, %75 : vector<6x64xf32>
    %c126 = arith.constant 126 : index
    %c0_66 = arith.constant 0 : index
    %77 = tpu.strided_load %arg12[%c126, %c0_66] {strides = array<i32: 2, 1>} : memref<166x64xf32, #tpu.memory_space<vmem>>, vector<6x64xf32>
    %c127 = arith.constant 127 : index
    %c0_67 = arith.constant 0 : index
    %78 = tpu.strided_load %arg12[%c127, %c0_67] {strides = array<i32: 2, 1>} : memref<166x64xf32, #tpu.memory_space<vmem>>, vector<6x64xf32>
    %79 = arith.maximumf %77, %78 : vector<6x64xf32>
    %80 = arith.maximumf %76, %79 : vector<6x64xf32>
    %c24 = arith.constant 24 : index
    %c0_68 = arith.constant 0 : index
    %81 = vector.load %arg13[%c24, %c0_68] : memref<36x64xf32, #tpu.memory_space<vmem>>, vector<6x64xf32>
    tpu.vector_store %arg13[%c24, %c0_68], %80 {strides = array<i32>} : memref<36x64xf32, #tpu.memory_space<vmem>>, vector<6x64xf32>,
    %c140 = arith.constant 140 : index
    %c0_69 = arith.constant 0 : index
    %82 = tpu.strided_load %arg12[%c140, %c0_69] {strides = array<i32: 2, 1>} : memref<166x64xf32, #tpu.memory_space<vmem>>, vector<6x64xf32>
    %c141 = arith.constant 141 : index
    %c0_70 = arith.constant 0 : index
    %83 = tpu.strided_load %arg12[%c141, %c0_70] {strides = array<i32: 2, 1>} : memref<166x64xf32, #tpu.memory_space<vmem>>, vector<6x64xf32>
    %84 = arith.maximumf %82, %83 : vector<6x64xf32>
    %c154 = arith.constant 154 : index
    %c0_71 = arith.constant 0 : index
    %85 = tpu.strided_load %arg12[%c154, %c0_71] {strides = array<i32: 2, 1>} : memref<166x64xf32, #tpu.memory_space<vmem>>, vector<6x64xf32>
    %c155 = arith.constant 155 : index
    %c0_72 = arith.constant 0 : index
    %86 = tpu.strided_load %arg12[%c155, %c0_72] {strides = array<i32: 2, 1>} : memref<166x64xf32, #tpu.memory_space<vmem>>, vector<6x64xf32>
    %87 = arith.maximumf %85, %86 : vector<6x64xf32>
    %88 = arith.maximumf %84, %87 : vector<6x64xf32>
    %c30_73 = arith.constant 30 : index
    %c0_74 = arith.constant 0 : index
    %89 = vector.load %arg13[%c30_73, %c0_74] : memref<36x64xf32, #tpu.memory_space<vmem>>, vector<6x64xf32>
    tpu.vector_store %arg13[%c30_73, %c0_74], %88 {strides = array<i32>} : memref<36x64xf32, #tpu.memory_space<vmem>>, vector<6x64xf32>,
    %c0_75 = arith.constant 0 : index
    %c0_76 = arith.constant 0 : index
    %90 = vector.load %arg13[%c0_75, %c0_76] : memref<36x64xf32, #tpu.memory_space<vmem>>, vector<22x64xf32>
    %91 = arith.truncf %90 : vector<22x64xf32> to vector<22x64xbf16>
    %c0_77 = arith.constant 0 : index
    %c0_78 = arith.constant 0 : index
    %92 = vector.load %arg15[%c0_77, %c0_78] : memref<166x1152xbf16, #tpu.memory_space<vmem>>, vector<22x64xbf16>
    tpu.vector_store %arg15[%c0_77, %c0_78], %91 {strides = array<i32>} : memref<166x1152xbf16, #tpu.memory_space<vmem>>, vector<22x64xbf16>,
    %c1_79 = arith.constant 1 : index
    %c0_80 = arith.constant 0 : index
    %93 = vector.load %arg13[%c1_79, %c0_80] : memref<36x64xf32, #tpu.memory_space<vmem>>, vector<22x64xf32>
    %94 = arith.truncf %93 : vector<22x64xf32> to vector<22x64xbf16>
    %c0_81 = arith.constant 0 : index
    %c64_82 = arith.constant 64 : index
    %95 = vector.load %arg15[%c0_81, %c64_82] : memref<166x1152xbf16, #tpu.memory_space<vmem>>, vector<22x64xbf16>
    tpu.vector_store %arg15[%c0_81, %c64_82], %94 {strides = array<i32>} : memref<166x1152xbf16, #tpu.memory_space<vmem>>, vector<22x64xbf16>,
    %c2_83 = arith.constant 2 : index
    %c0_84 = arith.constant 0 : index
    %96 = vector.load %arg13[%c2_83, %c0_84] : memref<36x64xf32, #tpu.memory_space<vmem>>, vector<22x64xf32>
    %97 = arith.truncf %96 : vector<22x64xf32> to vector<22x64xbf16>
    %c0_85 = arith.constant 0 : index
    %c128_86 = arith.constant 128 : index
    %98 = vector.load %arg15[%c0_85, %c128_86] : memref<166x1152xbf16, #tpu.memory_space<vmem>>, vector<22x64xbf16>
    tpu.vector_store %arg15[%c0_85, %c128_86], %97 {strides = array<i32>} : memref<166x1152xbf16, #tpu.memory_space<vmem>>, vector<22x64xbf16>,
    %c6_87 = arith.constant 6 : index
    %c0_88 = arith.constant 0 : index
    %99 = vector.load %arg13[%c6_87, %c0_88] : memref<36x64xf32, #tpu.memory_space<vmem>>, vector<22x64xf32>
    %100 = arith.truncf %99 : vector<22x64xf32> to vector<22x64xbf16>
    %c0_89 = arith.constant 0 : index
    %c192_90 = arith.constant 192 : index
    %101 = vector.load %arg15[%c0_89, %c192_90] : memref<166x1152xbf16, #tpu.memory_space<vmem>>, vector<22x64xbf16>
    tpu.vector_store %arg15[%c0_89, %c192_90], %100 {strides = array<i32>} : memref<166x1152xbf16, #tpu.memory_space<vmem>>, vector<22x64xbf16>,
    %c7 = arith.constant 7 : index
    %c0_91 = arith.constant 0 : index
    %102 = vector.load %arg13[%c7, %c0_91] : memref<36x64xf32, #tpu.memory_space<vmem>>, vector<22x64xf32>
    %103 = arith.truncf %102 : vector<22x64xf32> to vector<22x64xbf16>
    %c0_92 = arith.constant 0 : index
    %c256_93 = arith.constant 256 : index
    %104 = vector.load %arg15[%c0_92, %c256_93] : memref<166x1152xbf16, #tpu.memory_space<vmem>>, vector<22x64xbf16>
    tpu.vector_store %arg15[%c0_92, %c256_93], %103 {strides = array<i32>} : memref<166x1152xbf16, #tpu.memory_space<vmem>>, vector<22x64xbf16>,
    %c8 = arith.constant 8 : index
    %c0_94 = arith.constant 0 : index
    %105 = vector.load %arg13[%c8, %c0_94] : memref<36x64xf32, #tpu.memory_space<vmem>>, vector<22x64xf32>
    %106 = arith.truncf %105 : vector<22x64xf32> to vector<22x64xbf16>
    %c0_95 = arith.constant 0 : index
    %c320_96 = arith.constant 320 : index
    %107 = vector.load %arg15[%c0_95, %c320_96] : memref<166x1152xbf16, #tpu.memory_space<vmem>>, vector<22x64xbf16>
    tpu.vector_store %arg15[%c0_95, %c320_96], %106 {strides = array<i32>} : memref<166x1152xbf16, #tpu.memory_space<vmem>>, vector<22x64xbf16>,
    %c12_97 = arith.constant 12 : index
    %c0_98 = arith.constant 0 : index
    %108 = vector.load %arg13[%c12_97, %c0_98] : memref<36x64xf32, #tpu.memory_space<vmem>>, vector<22x64xf32>
    %109 = arith.truncf %108 : vector<22x64xf32> to vector<22x64xbf16>
    %c0_99 = arith.constant 0 : index
    %c384_100 = arith.constant 384 : index
    %110 = vector.load %arg15[%c0_99, %c384_100] : memref<166x1152xbf16, #tpu.memory_space<vmem>>, vector<22x64xbf16>
    tpu.vector_store %arg15[%c0_99, %c384_100], %109 {strides = array<i32>} : memref<166x1152xbf16, #tpu.memory_space<vmem>>, vector<22x64xbf16>,
    %c13 = arith.constant 13 : index
    %c0_101 = arith.constant 0 : index
    %111 = vector.load %arg13[%c13, %c0_101] : memref<36x64xf32, #tpu.memory_space<vmem>>, vector<22x64xf32>
    %112 = arith.truncf %111 : vector<22x64xf32> to vector<22x64xbf16>
    %c0_102 = arith.constant 0 : index
    %c448_103 = arith.constant 448 : index
    %113 = vector.load %arg15[%c0_102, %c448_103] : memref<166x1152xbf16, #tpu.memory_space<vmem>>, vector<22x64xbf16>
    tpu.vector_store %arg15[%c0_102, %c448_103], %112 {strides = array<i32>} : memref<166x1152xbf16, #tpu.memory_space<vmem>>, vector<22x64xbf16>,
    %c14_104 = arith.constant 14 : index
    %c0_105 = arith.constant 0 : index
    %114 = vector.load %arg13[%c14_104, %c0_105] : memref<36x64xf32, #tpu.memory_space<vmem>>, vector<22x64xf32>
    %115 = arith.truncf %114 : vector<22x64xf32> to vector<22x64xbf16>
    %c0_106 = arith.constant 0 : index
    %c512_107 = arith.constant 512 : index
    %116 = vector.load %arg15[%c0_106, %c512_107] : memref<166x1152xbf16, #tpu.memory_space<vmem>>, vector<22x64xbf16>
    tpu.vector_store %arg15[%c0_106, %c512_107], %115 {strides = array<i32>} : memref<166x1152xbf16, #tpu.memory_space<vmem>>, vector<22x64xbf16>,
    %c0_108 = arith.constant 0 : index
    %c0_109 = arith.constant 0 : index
    %117 = vector.load %arg15[%c0_108, %c0_109] : memref<166x1152xbf16, #tpu.memory_space<vmem>>, vector<22x576xbf16>
    %c0_110 = arith.constant 0 : index
    %c0_111 = arith.constant 0 : index
    %118 = vector.load %arg6[%c0_110, %c0_111] : memref<576x128xbf16, #tpu.memory_space<vmem>>, vector<576x128xbf16>
    %cst_112 = arith.constant dense<0.000000e+00> : vector<22x128xf32>
    %119 = tpu.matmul %117, %118, %cst_112 {dimension_numbers = #tpu.dot_dimension_numbers<[1], [0], [0], [1], [0, 0, 1, 1], [], []>} : vector<22x576xbf16>, vector<576x128xbf16>, vector<22x128xf32> -> vector<22x128xf32>
    %c0_113 = arith.constant 0 : index
    %c0_114 = arith.constant 0 : index
    %120 = vector.load %arg7[%c0_113, %c0_114] : memref<1x128xf32, #tpu.memory_space<vmem>>, vector<1x128xf32>
    %121 = vector.broadcast %120 : vector<1x128xf32> to vector<22x128xf32>
    %122 = arith.addf %119, %121 : vector<22x128xf32>
    %c0_115 = arith.constant 0 : index
    %c0_116 = arith.constant 0 : index
    %123 = vector.load %arg14[%c0_115, %c0_116] : memref<22x128xf32, #tpu.memory_space<vmem>>, vector<22x128xf32>
    tpu.vector_store %arg14[%c0_115, %c0_116], %122 {strides = array<i32>} : memref<22x128xf32, #tpu.memory_space<vmem>>, vector<22x128xf32>,
    %c0_117 = arith.constant 0 : index
    %c0_118 = arith.constant 0 : index
    %124 = vector.load %arg14[%c0_117, %c0_118] : memref<22x128xf32, #tpu.memory_space<vmem>>, vector<8x128xf32>
    %125 = arith.truncf %124 : vector<8x128xf32> to vector<8x128xbf16>
    %c0_119 = arith.constant 0 : index
    %c0_120 = arith.constant 0 : index
    %126 = vector.load %arg15[%c0_119, %c0_120] : memref<166x1152xbf16, #tpu.memory_space<vmem>>, vector<8x128xbf16>
    tpu.vector_store %arg15[%c0_119, %c0_120], %125 {strides = array<i32>} : memref<166x1152xbf16, #tpu.memory_space<vmem>>, vector<8x128xbf16>,
    %c1_121 = arith.constant 1 : index
    %c0_122 = arith.constant 0 : index
    %127 = vector.load %arg14[%c1_121, %c0_122] : memref<22x128xf32, #tpu.memory_space<vmem>>, vector<8x128xf32>
    %128 = arith.truncf %127 : vector<8x128xf32> to vector<8x128xbf16>
    %c0_123 = arith.constant 0 : index
    %c128_124 = arith.constant 128 : index
    %129 = vector.load %arg15[%c0_123, %c128_124] : memref<166x1152xbf16, #tpu.memory_space<vmem>>, vector<8x128xbf16>
    tpu.vector_store %arg15[%c0_123, %c128_124], %128 {strides = array<i32>} : memref<166x1152xbf16, #tpu.memory_space<vmem>>, vector<8x128xbf16>,
    %c2_125 = arith.constant 2 : index
    %c0_126 = arith.constant 0 : index
    %130 = vector.load %arg14[%c2_125, %c0_126] : memref<22x128xf32, #tpu.memory_space<vmem>>, vector<8x128xf32>
    %131 = arith.truncf %130 : vector<8x128xf32> to vector<8x128xbf16>
    %c0_127 = arith.constant 0 : index
    %c256_128 = arith.constant 256 : index
    %132 = vector.load %arg15[%c0_127, %c256_128] : memref<166x1152xbf16, #tpu.memory_space<vmem>>, vector<8x128xbf16>
    tpu.vector_store %arg15[%c0_127, %c256_128], %131 {strides = array<i32>} : memref<166x1152xbf16, #tpu.memory_space<vmem>>, vector<8x128xbf16>,
    %c6_129 = arith.constant 6 : index
    %c0_130 = arith.constant 0 : index
    %133 = vector.load %arg14[%c6_129, %c0_130] : memref<22x128xf32, #tpu.memory_space<vmem>>, vector<8x128xf32>
    %134 = arith.truncf %133 : vector<8x128xf32> to vector<8x128xbf16>
    %c0_131 = arith.constant 0 : index
    %c384_132 = arith.constant 384 : index
    %135 = vector.load %arg15[%c0_131, %c384_132] : memref<166x1152xbf16, #tpu.memory_space<vmem>>, vector<8x128xbf16>
    tpu.vector_store %arg15[%c0_131, %c384_132], %134 {strides = array<i32>} : memref<166x1152xbf16, #tpu.memory_space<vmem>>, vector<8x128xbf16>,
    %c7_133 = arith.constant 7 : index
    %c0_134 = arith.constant 0 : index
    %136 = vector.load %arg14[%c7_133, %c0_134] : memref<22x128xf32, #tpu.memory_space<vmem>>, vector<8x128xf32>
    %137 = arith.truncf %136 : vector<8x128xf32> to vector<8x128xbf16>
    %c0_135 = arith.constant 0 : index
    %c512_136 = arith.constant 512 : index
    %138 = vector.load %arg15[%c0_135, %c512_136] : memref<166x1152xbf16, #tpu.memory_space<vmem>>, vector<8x128xbf16>
    tpu.vector_store %arg15[%c0_135, %c512_136], %137 {strides = array<i32>} : memref<166x1152xbf16, #tpu.memory_space<vmem>>, vector<8x128xbf16>,
    %c8_137 = arith.constant 8 : index
    %c0_138 = arith.constant 0 : index
    %139 = vector.load %arg14[%c8_137, %c0_138] : memref<22x128xf32, #tpu.memory_space<vmem>>, vector<8x128xf32>
    %140 = arith.truncf %139 : vector<8x128xf32> to vector<8x128xbf16>
    %c0_139 = arith.constant 0 : index
    %c640 = arith.constant 640 : index
    %141 = vector.load %arg15[%c0_139, %c640] : memref<166x1152xbf16, #tpu.memory_space<vmem>>, vector<8x128xbf16>
    tpu.vector_store %arg15[%c0_139, %c640], %140 {strides = array<i32>} : memref<166x1152xbf16, #tpu.memory_space<vmem>>, vector<8x128xbf16>,
    %c12_140 = arith.constant 12 : index
    %c0_141 = arith.constant 0 : index
    %142 = vector.load %arg14[%c12_140, %c0_141] : memref<22x128xf32, #tpu.memory_space<vmem>>, vector<8x128xf32>
    %143 = arith.truncf %142 : vector<8x128xf32> to vector<8x128xbf16>
    %c0_142 = arith.constant 0 : index
    %c768 = arith.constant 768 : index
    %144 = vector.load %arg15[%c0_142, %c768] : memref<166x1152xbf16, #tpu.memory_space<vmem>>, vector<8x128xbf16>
    tpu.vector_store %arg15[%c0_142, %c768], %143 {strides = array<i32>} : memref<166x1152xbf16, #tpu.memory_space<vmem>>, vector<8x128xbf16>,
    %c13_143 = arith.constant 13 : index
    %c0_144 = arith.constant 0 : index
    %145 = vector.load %arg14[%c13_143, %c0_144] : memref<22x128xf32, #tpu.memory_space<vmem>>, vector<8x128xf32>
    %146 = arith.truncf %145 : vector<8x128xf32> to vector<8x128xbf16>
    %c0_145 = arith.constant 0 : index
    %c896 = arith.constant 896 : index
    %147 = vector.load %arg15[%c0_145, %c896] : memref<166x1152xbf16, #tpu.memory_space<vmem>>, vector<8x128xbf16>
    tpu.vector_store %arg15[%c0_145, %c896], %146 {strides = array<i32>} : memref<166x1152xbf16, #tpu.memory_space<vmem>>, vector<8x128xbf16>,
    %c14_146 = arith.constant 14 : index
    %c0_147 = arith.constant 0 : index
    %148 = vector.load %arg14[%c14_146, %c0_147] : memref<22x128xf32, #tpu.memory_space<vmem>>, vector<8x128xf32>
    %149 = arith.truncf %148 : vector<8x128xf32> to vector<8x128xbf16>
    %c0_148 = arith.constant 0 : index
    %c1024 = arith.constant 1024 : index
    %150 = vector.load %arg15[%c0_148, %c1024] : memref<166x1152xbf16, #tpu.memory_space<vmem>>, vector<8x128xbf16>
    tpu.vector_store %arg15[%c0_148, %c1024], %149 {strides = array<i32>} : memref<166x1152xbf16, #tpu.memory_space<vmem>>, vector<8x128xbf16>,
    %c0_149 = arith.constant 0 : index
    %c0_150 = arith.constant 0 : index
    %151 = vector.load %arg15[%c0_149, %c0_150] : memref<166x1152xbf16, #tpu.memory_space<vmem>>, vector<8x1152xbf16>
    %c0_151 = arith.constant 0 : index
    %c0_152 = arith.constant 0 : index
    %152 = vector.load %arg8[%c0_151, %c0_152] : memref<1152x128xbf16, #tpu.memory_space<vmem>>, vector<1152x128xbf16>
    %cst_153 = arith.constant dense<0.000000e+00> : vector<8x128xf32>
    %153 = tpu.matmul %151, %152, %cst_153 {dimension_numbers = #tpu.dot_dimension_numbers<[1], [0], [0], [1], [0, 0, 1, 1], [], []>} : vector<8x1152xbf16>, vector<1152x128xbf16>, vector<8x128xf32> -> vector<8x128xf32>
    %c0_154 = arith.constant 0 : index
    %c0_155 = arith.constant 0 : index
    %154 = vector.load %arg9[%c0_154, %c0_155] : memref<1x128xf32, #tpu.memory_space<vmem>>, vector<1x128xf32>
    %155 = vector.broadcast %154 : vector<1x128xf32> to vector<8x128xf32>
    %156 = arith.addf %153, %155 : vector<8x128xf32>
    %cst_156 = arith.constant 0.000000e+00 : f32
    %157 = vector.broadcast %cst_156 : f32 to vector<8x128xf32>
    %158 = arith.maximumf %156, %157 : vector<8x128xf32>
    %159 = vector.extract_strided_slice %158 {offsets = [0, 0], sizes = [2, 128], strides = [1, 1]} : vector<8x128xf32> to vector<2x128xf32>
    %160 = vector.extract_strided_slice %158 {offsets = [6, 0], sizes = [2, 128], strides = [1, 1]} : vector<8x128xf32> to vector<2x128xf32>
    %161 = tpu.concatenate %159, %160 in 0 : vector<2x128xf32>, vector<2x128xf32> -> vector<4x128xf32>
    %c0_157 = arith.constant 0 : index
    %c0_158 = arith.constant 0 : index
    %c0_159 = arith.constant 0 : index
    %162 = vector.load %arg10[%c0_157, %c0_158, %c0_159] : memref<1x4x128xf32, #tpu.memory_space<vmem>>, vector<1x4x128xf32>
    %163 = vector.shape_cast %162 : vector<1x4x128xf32> to vector<4x128xf32>
    %164 = vector.shape_cast %161 : vector<4x128xf32> to vector<1x4x128xf32>
    tpu.vector_store %arg10[%c0_157, %c0_158, %c0_159], %164 {strides = array<i32>} : memref<1x4x128xf32, #tpu.memory_space<vmem>>, vector<1x4x128xf32>,
    return
  }
  func.func @transform_0(%arg0: i32) -> (i32, i32, i32) {
    %c0_i32 = arith.constant 0 : i32
    %c0_i32_0 = arith.constant 0 : i32
    %c0_i32_1 = arith.constant 0 : i32
    return %arg0, %c0_i32, %c0_i32_0 : i32, i32, i32
  }
  func.func @transform_1(%arg0: i32) -> (i32, i32) {
    %c0_i32 = arith.constant 0 : i32
    %c0_i32_0 = arith.constant 0 : i32
    %c0_i32_1 = arith.constant 0 : i32
    return %c0_i32, %c0_i32_0 : i32, i32
  }
  func.func @transform_2(%arg0: i32) -> (i32, i32) {
    %c0_i32 = arith.constant 0 : i32
    %c0_i32_0 = arith.constant 0 : i32
    %c0_i32_1 = arith.constant 0 : i32
    return %c0_i32, %c0_i32_0 : i32, i32
  }
  func.func @transform_3(%arg0: i32) -> (i32, i32) {
    %c0_i32 = arith.constant 0 : i32
    %c0_i32_0 = arith.constant 0 : i32
    %c0_i32_1 = arith.constant 0 : i32
    return %c0_i32, %c0_i32_0 : i32, i32
  }
  func.func @transform_4(%arg0: i32) -> (i32, i32) {
    %c0_i32 = arith.constant 0 : i32
    %c0_i32_0 = arith.constant 0 : i32
    %c0_i32_1 = arith.constant 0 : i32
    return %c0_i32, %c0_i32_0 : i32, i32
  }
  func.func @transform_5(%arg0: i32) -> (i32, i32) {
    %c0_i32 = arith.constant 0 : i32
    %c0_i32_0 = arith.constant 0 : i32
    %c0_i32_1 = arith.constant 0 : i32
    return %c0_i32, %c0_i32_0 : i32, i32
  }
  func.func @transform_6(%arg0: i32) -> (i32, i32) {
    %c0_i32 = arith.constant 0 : i32
    %c0_i32_0 = arith.constant 0 : i32
    %c0_i32_1 = arith.constant 0 : i32
    return %c0_i32, %c0_i32_0 : i32, i32
  }
  func.func @transform_7(%arg0: i32) -> (i32, i32) {
    %c0_i32 = arith.constant 0 : i32
    %c0_i32_0 = arith.constant 0 : i32
    %c0_i32_1 = arith.constant 0 : i32
    return %c0_i32, %c0_i32_0 : i32, i32
  }
  func.func @transform_8(%arg0: i32) -> (i32, i32) {
    %c0_i32 = arith.constant 0 : i32
    %c0_i32_0 = arith.constant 0 : i32
    %c0_i32_1 = arith.constant 0 : i32
    return %c0_i32, %c0_i32_0 : i32, i32
  }
  func.func @transform_9(%arg0: i32) -> (i32, i32, i32) {
    %c0_i32 = arith.constant 0 : i32
    %c0_i32_0 = arith.constant 0 : i32
    %c0_i32_1 = arith.constant 0 : i32
    return %arg0, %c0_i32, %c0_i32_0 : i32, i32, i32
  }
}

</mosaic_0001>

<bundles_post_ra>
// kernel: mynet_forward_nchw.1
= control target key start
LH: loop header
LB: loop body
LE: loop exit
PB: predicated region body
PF: predicated region fallthrough
CT: control target
= control target key end

     0   :  { %14 = vsyncpa [#allocation8], 0  ;;  %s7539_s0 = inlined_call_operand.vmem [shape: bf16[2,196,32], index: 0, kind: input, shape index: {}]   ;;  %s7540_s1 = inlined_call_operand.vmem [shape: bf16[32,64], index: 1, kind: input, shape index: {}]   ;;  %s7541_s2 = inlined_call_operand.vmem [shape: f32[1,64], index: 2, kind: input, shape index: {}]   ;;  %s7542_s3 = inlined_call_operand.vmem [shape: bf16[576,64], index: 3, kind: input, shape index: {}]   ;;  %s7543_s4 = inlined_call_operand.vmem [shape: f32[1,64], index: 4, kind: input, shape index: {}]   ;;  %s7544_s5 = inlined_call_operand.vmem [shape: bf16[576,128], index: 5, kind: input, shape index: {}]   ;;  %s7545_s6 = inlined_call_operand.vmem [shape: f32[1,128], index: 6, kind: input, shape index: {}]   ;;  %s7546_s7 = inlined_call_operand.vmem [shape: bf16[1152,128], index: 7, kind: input, shape index: {}]   ;;  %s7547_s8 = inlined_call_operand.vmem [shape: f32[1,128], index: 8, kind: input, shape index: {}]   ;;  %s7548_s9 = inlined_call_operand.hbm [shape: f32[2,4,128], index: 9, kind: output, shape index: {}]  }
   0x1   :  { %16 = vsyncpa [#allocation8 + $0x1], 0  ;;  %s6320_s30 = smov 0   ;;  %s6322_s10 = smov 0  }
   0x2   :  { %s6324_s11 = smov 0   ;;  %s6326_s12 = smov 0  }
   0x3 LB: > { %s6341_s13 = sadd.s32 4294967295, %s6264_s12   ;;  %s4692_s14 = sadd.s32 4294967294, %s6264_s12   ;;  %s6264_s12 = sphi %s6326_s12, %s7554_s12   ;;  %s6260_s11 = sphi %s6324_s11, %s7553_s11   ;;  %s6256_s10 = sphi %s6322_s10, %s7552_s10   ;;  %s6252_s30 = sphi %s6320_s30, %s7551_s30  }
   0x4   : > { %s6345_s15 = sadd.s32 1, %s6264_s12   ;;  %s223_s16 = sadd.s32 1, %s6260_s11 }
   0x5   : > { %s220_s17 = ssub.s32 %s6264_s12, %s6345_s15  ;;  %p233_p0 = scmp.ne.s32.totalorder %s6260_s11, %s6256_s10 }
   0x6   : > { %p221_p1 = scmp.eq.s32.totalorder %s220_s17, 0  ;;  %p234_p2 = scmp.eq.s32.totalorder %s6341_s13, 1 }
   0x7   : > { %p239_p3 = scmp.ne.s32.totalorder %s6256_s10, %s6252_s30  ;;  %p240_p4 = scmp.eq.s32.totalorder %s4692_s14, 1 }
   0x8   : > { %s6356_s18 = scalar_select %p221_p1, %s6260_s11, %s223_s16  }
   0x9   : > { %p6358_p5 = por %p234_p2, %p233_p0  ;;  %p6362_p6 = por %p240_p4, %p239_p3 }
   0xa   : > { %p4695_p7 = scmp.ge.s32.totalorder %s6264_s12, 1  ;;  %p290_p8 = scmp.lt.s32.totalorder %s6264_s12, 3 }
   0xc   : > { %p291_p9 = pnand %p4695_p7, %p290_p8 }
   0xd   : > { %v5956_v0 = vld [vmem:[%s7540_s1] sm:$0xff] (!%p291_p9)   ;;  %v6266_v1 = vmov (!%p291_p9), 0.0   ;;  %v5957_v2 = vld [vmem:[%s7540_s1 + $0x8] sm:$0xff] (!%p291_p9)   ;;  %vm6267_vm0 = vmmov (!%p291_p9), 0   ;;  %p326_p10 = scmp.lt.s32.totalorder (!%p291_p9), %s6341_s13, 1  ;;  %vm443_vm1 = vcmask (!%p291_p9), 261120  }
   0xe   : > { %294 = sbr.rel (%p291_p9) target bundleno = 1448 (0x5a8), region = 56  ;;  %5773 = vmatprep.subr.bf16.mxu0 (!%p291_p9), %v6266_v1  ;;  %5777 = vmatprep.mubr.msk.bf16.mxu0 (!%p291_p9), %vm6267_vm0, %v6266_v1  ;;  %v5971_v16 = vld [vmem:[%s7542_s3 + $0x40] sm:$0xff] (!%p291_p9)   ;;  %v5973_v18 = vld [vmem:[%s7542_s3 + $0x48] sm:$0xff] (!%p291_p9)   ;;  %v5975_v20 = vld [vmem:[%s7542_s3 + $0x50] sm:$0xff] (!%p291_p9)   ;;  %vm619_vm2 = vcmask (!%p291_p9), 523264   ;;  %vm644_vm3 = vcmask (!%p291_p9), 519168  }
   0xf   : > { %5774 = vmatpush3.bf16.msra.mxu0 (!%p291_p9), %v5956_v0  ;;  %v5972_v17 = vld [vmem:[%s7542_s3] sm:$0xff] (!%p291_p9)   ;;  %5435 = vmatprep.subr.bf16.mxu1 (!%p291_p9), %v5971_v16  ;;  %v5974_v19 = vld [vmem:[%s7542_s3 + $0x8] sm:$0xff] (!%p291_p9)   ;;  %v5976_v21 = vld [vmem:[%s7542_s3 + $0x10] sm:$0xff] (!%p291_p9)   ;;  %s6268_s14 = smov (!%p291_p9), 64   ;;  %vm772_vm4 = vcmask (!%p291_p9), 518144   ;;  %vm922_vm5 = vcmask (!%p291_p9), 1043968  }
  0x10   : > { %5775 = vmatprep.subr.bf16.mxu0 (!%p291_p9), %v6266_v1  ;;  %5436 = vmatpush3.bf16.msra.mxu1 (!%p291_p9), %v5972_v17  ;;  %v6456_v22 = vld [vmem:[%s7541_s2] ss:$0 sm:$0xff] (!%p291_p9)  ;;  %v5978_v26 = vld [vmem:[%s7542_s3 + $0x58] sm:$0xff] (!%p291_p9)   ;;  %v5983_v38 = vld [vmem:[%s7542_s3 + $0x68] sm:$0xff] (!%p291_p9)   ;;  %vm943_vm6 = vcmask (!%p291_p9), 1042944   ;;  %vm2998_vm7 = vcmask (!%p291_p9), 521216  }
  0x11   : > { %5437 = vmatprep.subr.bf16.mxu1 (!%p291_p9), %v5973_v18  ;;  %v5977_v28 = vld [vmem:[%s7542_s3 + $0xc0] sm:$0xff] (!%p291_p9)   ;;  %v5980_v30 = vld [vmem:[%s7542_s3 + $0x18] sm:$0xff] (!%p291_p9)   ;;  %v5984_v41 = vld [vmem:[%s7542_s3 + $0x28] sm:$0xff] (!%p291_p9)   ;;  %vm4616_vm8 = vcmask (!%p291_p9), 1041408  }
  0x12   : > { %v5979_v29 = vld [vmem:[%s7542_s3 + $0x80] sm:$0xff] (!%p291_p9)   ;;  %v5985_v51 = vld [vmem:[%s7542_s3 + $0x70] sm:$0xff] (!%p291_p9)   ;;  %v5986_v52 = vld [vmem:[%s7542_s3 + $0xc8] sm:$0xff] (!%p291_p9)  }
  0x13   : > { %5776 = vmatpush3.bf16.msra.mxu0 (!%p291_p9), %v5957_v2  ;;  %v5981_v33 = vld [vmem:[%s7542_s3 + $0x60] sm:$0xff] (!%p291_p9)   ;;  %v5987_v53 = vld [vmem:[%s7542_s3 + $0x30] sm:$0xff] (!%p291_p9)   ;;  %v5988_v55 = vld [vmem:[%s7542_s3 + $0x88] sm:$0xff] (!%p291_p9)  }
  0x14   : > { %5438 = vmatpush3.bf16.msra.mxu1 (!%p291_p9), %v5974_v19  ;;  %5517 = vmatprep.subr.bf16.mxu0 (!%p291_p9), %v5977_v28  ;;  %v5982_v34 = vld [vmem:[%s7542_s3 + $0x20] sm:$0xff] (!%p291_p9)   ;;  %v5989_v58 = vld [vmem:[%s7542_s3 + $0x78] sm:$0xff] (!%p291_p9)  }
  0x15   : > { %s327_s25 = scalar_select %p326_p10, %s6341_s13, 1  ;;  %5439 = vmatprep.subr.bf16.mxu1 %v5975_v20 }
  0x17   : > { %s5913_s26 = smul.u32 100, %s327_s25 }
  0x18   : > { %5440 = vmatpush3.bf16.msra.mxu1 %v5976_v21 }
  0x19   : > { %s6383_s29 = scalar_lea.vmem %s7539_s0, %s5913_s26  ;;  %5441 = vmatprep.subr.bf16.mxu1 %v5978_v26  ;;  %s323_s26 = sand.u32 1, %s6256_s10  }
  0x1a   : > { %v5958_v3 = vld [vmem:[%s6383_s29] sm:$0xff]   ;;  %v5959_v4 = vld [vmem:[%s6383_s29 + $0x8] sm:$0xff]   ;;  %v5960_v5 = vld [vmem:[%s6383_s29 + $0x10] sm:$0xff]   ;;  %s4696_s27 = sshll.u32 %s323_s26, 2  ;;  %s4620_s22 = scalar_lea.sflag [#allocation8], %s323_s26 }
  0x1b   : > { %5778 = vmatmul.mubr.msk.bf16.vlgmr.msra.gmra.mrb[0].mxu0 %vm443_vm1, %v5958_v3  ;;  %v5961_v6 = vld [vmem:[%s6383_s29 + $0x18] sm:$0xff]   ;;  %v5962_v7 = vld [vmem:[%s6383_s29 + $0x20] sm:$0xff]   ;;  %v5963_v8 = vld [vmem:[%s6383_s29 + $0x28] sm:$0xff]   ;;  %s325_s28 = scalar_lea.vmem [#allocation7], %s4696_s27 }
  0x1c   : > { %5781 = vmatprep.mubr.msk.bf16.mxu0 %vm6267_vm0, %v6266_v1  ;;  %v5964_v9 = vld [vmem:[%s6383_s29 + $0x30] sm:$0xff]   ;;  %v5965_v10 = vld [vmem:[%s6383_s29 + $0x38] sm:$0xff]   ;;  %v5966_v11 = vld [vmem:[%s6383_s29 + $0x40] sm:$0xff]   ;;  %5442 = vmatpush3.bf16.msra.mxu1 %v5980_v30 }
  0x1d   : > { %v5967_v12 = vld [vmem:[%s6383_s29 + $0x48] sm:$0xff]   ;;  %v5968_v13 = vld [vmem:[%s6383_s29 + $0x50] sm:$0xff]   ;;  %v5969_v14 = vld [vmem:[%s6383_s29 + $0x58] sm:$0xff]   ;;  %5518 = vmatpush3.bf16.msra.mxu0 %v5979_v29  ;;  %5443 = vmatprep.subr.bf16.mxu1 %v5981_v33 }
  0x1e   : > { %v5970_v15 = vld [vmem:[%s6383_s29 + $0x60] ss:$0 sps:$4 sm:$0x33]   ;;  %5519 = vmatprep.subr.bf16.mxu0 %v5986_v52  ;;  %s4633_s29 = sshll.u32 %s325_s28, 4  ;;  %s7499_s29 = int_to_ptr.vmem [resolvable:$true] %s4633_s29 }
  0x1f   : > { %s6202_s23 = scalar_lea.vmem %s7499_s29, 64 }
  0x20   : > { %5444 = vmatpush3.bf16.msra.mxu1 %v5982_v34  ;;  %p6203_p11 = scmp.ne.s32.totalorder %s7499_s29, %s6202_s23 }
  0x21   : > { %5445 = vmatprep.subr.bf16.mxu1 %v5983_v38  ;;  %5520 = vmatpush3.bf16.msra.mxu0 %v5988_v55 }
  0x22   : > { %p6204_p12 = pnand %p6203_p11, %p6358_p5 }
  0x23   : > { %5782 = vmatmul.mubr.msk.bf16.gmra.mrb[4].mxu0 %vm443_vm1, %v5959_v4 }
  0x24   : > { %5785 = vmatprep.mubr.msk.bf16.mxu0 %vm6267_vm0, %v6266_v1  ;;  %5446 = vmatpush3.bf16.msra.mxu1 %v5984_v41  ;;  %p6205_p13 = pneg %p6204_p12 }
  0x25   : > { %5447 = vmatprep.subr.bf16.mxu1 %v5985_v51 }
  0x28   : > { %5448 = vmatpush3.bf16.msra.mxu1 %v5987_v53 }
  0x29   : > { %5449 = vmatprep.subr.bf16.mxu1 %v5989_v58 }
  0x2b   : > { %5786 = vmatmul.mubr.msk.bf16.gmra.mrb[8].mxu0 %vm443_vm1, %v5960_v5 }
  0x2c   : > { %5789 = vmatprep.mubr.msk.bf16.mxu0 %vm6267_vm0, %v6266_v1 }
  0x33   : > { %5790 = vmatmul.mubr.msk.bf16.gmra.mrb[12].mxu0 %vm443_vm1, %v5961_v6  ;;  %v5990_v6 = vld [vmem:[%s7542_s3 + $0x38] sm:$0xff]  }
  0x34   : > { %5793 = vmatprep.mubr.msk.bf16.mxu0 %vm6267_vm0, %v6266_v1  ;;  %5450 = vmatpush3.bf16.msra.mxu1 %v5990_v6 }
  0x35   : > { %5829 = vmatprep.subr.bf16.mxu1 %v6266_v1 }
  0x3b   : > { %5794 = vmatmul.mubr.msk.bf16.gmra.mrb[16].mxu0 %vm443_vm1, %v5962_v7 }
  0x3c   : > { %5797 = vmatprep.mubr.msk.bf16.mxu0 %vm6267_vm0, %v6266_v1 }
  0x43   : > { %5798 = vmatmul.mubr.msk.bf16.gmra.mrb[20].mxu0 %vm443_vm1, %v5963_v8 }
  0x44   : > { %5801 = vmatprep.mubr.msk.bf16.mxu0 %vm6267_vm0, %v6266_v1 }
  0x4b   : > { %5802 = vmatmul.mubr.msk.bf16.gmra.mrb[24].mxu0 %vm443_vm1, %v5964_v9 }
  0x4c   : > { %5805 = vmatprep.mubr.msk.bf16.mxu0 %vm6267_vm0, %v6266_v1 }
  0x53   : > { %5806 = vmatmul.mubr.msk.bf16.gmra.mrb[28].mxu0 %vm443_vm1, %v5965_v10 }
  0x54   : > { %5809 = vmatprep.mubr.msk.bf16.mxu0 %vm6267_vm0, %v6266_v1 }
  0x5b   : > { %5810 = vmatmul.mubr.msk.bf16.gmra.mrb[32].mxu0 %vm443_vm1, %v5966_v11 }
  0x5c   : > { %5813 = vmatprep.mubr.msk.bf16.mxu0 %vm6267_vm0, %v6266_v1 }
  0x63   : > { %5814 = vmatmul.mubr.msk.bf16.gmra.mrb[36].mxu0 %vm443_vm1, %v5967_v12 }
  0x64   : > { %5817 = vmatprep.mubr.msk.bf16.mxu0 %vm6267_vm0, %v6266_v1 }
  0x6b   : > { %5818 = vmatmul.mubr.msk.bf16.gmra.mrb[40].mxu0 %vm443_vm1, %v5968_v13 }
  0x6c   : > { %5821 = vmatprep.mubr.msk.bf16.mxu0 %vm6267_vm0, %v6266_v1 }
  0x73   : > { %5822 = vmatmul.mubr.msk.bf16.gmra.mrb[44].mxu0 %vm443_vm1, %v5969_v14 }
  0x74   : > { %5825 = vmatprep.mubr.msk.bf16.mxu0 %vm6267_vm0, %v6266_v1 }
  0x7b   : > { %5826 = vmatmul.mubr.msk.bf16.gmra.mrb[48].mxu0 %vm443_vm1, %v5970_v15 }
  0xee   : > { %v517_v23 = vpop.f32.mrb[0].mxu0 }
  0xef   : > { %v518_v24 = vadd.f32 %v6456_v22, %v517_v23  ;;  %v5779_v25 = vpop.f32.mrb[1].mxu0 }
  0xf0   : > { %v520_v27 = vpop.f32.mrb[2].mxu0 }
  0xf1   : > { %620 = vst.msk [vmem:[#allocation2] sm:$0xff] %vm619_vm2, %v518_v24  ;;  %v521_v31 = vadd.f32 %v6456_v22, %v520_v27  ;;  %v5780_v32 = vpop.f32.mrb[3].mxu0 }
  0xf3   : > { %621 = vst.msk [vmem:[#allocation2 + $0x8] sm:$0xff] %vm619_vm2, %v521_v31 }
  0xf6   : > { %v525_v35 = vpop.f32.mrb[4].mxu0 }
  0xf7   : > { %v526_v36 = vadd.f32 %v6456_v22, %v525_v35  ;;  %v5783_v37 = vpop.f32.mrb[5].mxu0 }
  0xf8   : > { %v528_v39 = vpop.f32.mrb[6].mxu0  ;;  %v646_v40 = vld [vmem:[#allocation2] sm:$0xff] }
  0xf9   : > { %622 = vst.msk [vmem:[#allocation2 + $0x10] sm:$0xff] %vm619_vm2, %v526_v36  ;;  %v529_v42 = vadd.f32 %v6456_v22, %v528_v39  ;;  %v5784_v43 = vpop.f32.mrb[7].mxu0  ;;  %v5181_v44 = vpack.c.bf16 %v646_v40, %v646_v40 }
  0xfa   : > { %v774_v45 = vld [vmem:[#allocation2 + $0x1] sm:$0xff] }
  0xfb   : > { %v945_v46 = vld [vmem:[#allocation2 + $0x2] sm:$0xff]  ;;  %623 = vst.msk [vmem:[#allocation2 + $0x18] sm:$0xff] %vm619_vm2, %v529_v42  ;;  %v5202_v48 = vpack.c.bf16 %v774_v45, %v774_v45  ;;  %v5995_v42 = vld [vmem:[%s7542_s3 + $0xd0] sm:$0xff]  }
  0xfc   : > { %v647_v47 = vld [vmem:[#allocation2 + $0x8] sm:$0xff]  ;;  %752 = vst.msk [vmem:[#allocation6] sm:$0xf] %vm644_vm3, %v5181_v44  ;;  %v5223_v49 = vpack.c.bf16 %v945_v46, %v945_v46  ;;  %v5996_v45 = vld [vmem:[%s7542_s3 + $0x90] sm:$0xff]   ;;  %5521 = vmatprep.subr.bf16.mxu0 %v5995_v42 }
  0xfd   : > { %v5182_v50 = vpack.c.bf16 %v647_v47, %v647_v47  ;;  %859 = vrot.lane.b32.xlu0 %v5202_v48, %s6268_s14  ;;  %5522 = vmatpush3.bf16.msra.mxu0 %v5996_v45 }
  0xfe   : > { %1051 = vst.msk [vmem:[#allocation6 + $0x4] sm:$0xf] %vm644_vm3, %v5223_v49  ;;  %v533_v54 = vpop.f32.mrb[8].mxu0 }
  0xff   : > { %753 = vst.msk [vmem:[#allocation6 + $0x24] sm:$0xf] %vm644_vm3, %v5182_v50  ;;  %v534_v56 = vadd.f32 %v6456_v22, %v533_v54  ;;  %v5787_v57 = vpop.f32.mrb[9].mxu0 }
 0x100   : > { %v536_v59 = vpop.f32.mrb[10].mxu0  ;;  %v1072_v60 = vld [vmem:[#allocation2 + $0xe] sm:$0xff] }
 0x101   : > { %v775_v61 = vld [vmem:[#allocation2 + $0x9] sm:$0xff]  ;;  %624 = vst.msk [vmem:[#allocation2 + $0x20] sm:$0xff] %vm619_vm2, %v534_v56  ;;  %v537_v63 = vadd.f32 %v6456_v22, %v536_v59  ;;  %v5788_v0 = vpop.f32.mrb[11].mxu0  ;;  %v5244_v2 = vpack.c.bf16 %v1072_v60, %v1072_v60 }
 0x102   : > { %v1368_v62 = vld [vmem:[#allocation2 + $0x10] sm:$0xff]  ;;  %v5203_v3 = vpack.c.bf16 %v775_v61, %v775_v61  ;;  %v1369_v10 = vld [vmem:[#allocation2 + $0x18] sm:$0xff] }
 0x103   : > { %v6512_v4 = vpack.c.bf16 %v1368_v62, %v1368_v62  ;;  %v946_v5 = vld [vmem:[#allocation2 + $0xa] sm:$0xff]  ;;  %v1073_v8 = vld [vmem:[#allocation2 + $0x16] sm:$0xff]  ;;  %625 = vst.msk [vmem:[#allocation2 + $0x28] sm:$0xff] %vm619_vm2, %v537_v63  ;;  %1157 = vrot.lane.b32.xlu1 %v5244_v2, %s6268_s14  ;;  %v6520_v13 = vpack.c.bf16 %v1369_v10, %v1369_v10 }
 0x104   : > { %v1241_v7 = vld [vmem:[#allocation2 + $0xf] sm:$0xff]  ;;  %v5224_v11 = vpack.c.bf16 %v946_v5, %v946_v5  ;;  %861 = vrot.lane.b32.xlu0 %v5203_v3, %s6268_s14  ;;  %v1242_v15 = vld [vmem:[#allocation2 + $0x17] sm:$0xff]  ;;  %v5245_v18 = vpack.c.bf16 %v1073_v8, %v1073_v8 }
 0x105   : > { %v776_v9 = vld [vmem:[#allocation2 + $0x11] sm:$0xff]  ;;  %v5265_v12 = vpack.c.bf16 %v1241_v7, %v1241_v7  ;;  %754 = vst.msk [vmem:[#allocation6 + $0x48] sm:$0xf] %vm644_vm3, %v6512_v4  ;;  %v5266_v17 = vpack.c.bf16 %v1242_v15, %v1242_v15  ;;  %755 = vst.msk [vmem:[#allocation6 + $0x6c] sm:$0xf] %vm644_vm3, %v6520_v13 }
 0x106   : > { %v947_v14 = vld [vmem:[#allocation2 + $0x12] sm:$0xff]  ;;  %1052 = vst.msk [vmem:[#allocation6 + $0x28] sm:$0xf] %vm644_vm3, %v5224_v11  ;;  %v5204_v19 = vpack.c.bf16 %v776_v9, %v776_v9  ;;  %v541_v20 = vpop.f32.mrb[12].mxu0 }
 0x107   : > { %v5225_v16 = vpack.c.bf16 %v947_v14, %v947_v14  ;;  %1347 = vst.msk [vmem:[#allocation6 + $0x8] sm:$0xf] %vm644_vm3, %v5265_v12  ;;  %1348 = vst.msk [vmem:[#allocation6 + $0x2c] sm:$0xf] %vm644_vm3, %v5266_v17  ;;  %v542_v21 = vadd.f32 %v6456_v22, %v541_v20  ;;  %1159 = vrot.lane.b32.xlu1 %v5245_v18, %s6268_s14  ;;  %v5791_v23 = vpop.f32.mrb[13].mxu0 }
 0x108   : > { %863 = vrot.lane.b32.xlu0 %v5204_v19, %s6268_s14  ;;  %v1833_v24 = vld [vmem:[#allocation2 + $0x1e] sm:$0xff]  ;;  %v544_v25 = vpop.f32.mrb[14].mxu0 }
 0x109   : > { %1053 = vst.msk [vmem:[#allocation6 + $0x4c] sm:$0xf] %vm644_vm3, %v5225_v16  ;;  %v777_v26 = vld [vmem:[#allocation2 + $0x19] sm:$0xff]  ;;  %v5349_v27 = vpack.c.bf16 %v1833_v24, %v1833_v24  ;;  %v545_v28 = vadd.f32 %v6456_v22, %v544_v25  ;;  %v5792_v29 = vpop.f32.mrb[15].mxu0 }
 0x10a   : > { %626 = vst.msk [vmem:[#allocation2 + $0x30] sm:$0xff] %vm619_vm2, %v542_v21  ;;  %v5205_v30 = vpack.c.bf16 %v777_v26, %v777_v26  ;;  %v1370_v31 = vld [vmem:[#allocation2 + $0x20] sm:$0xff]  ;;  %v1371_v40 = vld [vmem:[#allocation2 + $0x28] sm:$0xff]  ;;  %v6003_v24 = vld [vmem:[%s7542_s3 + $0xd8] sm:$0xff]  }
 0x10b   : > { %v948_v32 = vld [vmem:[#allocation2 + $0x1a] sm:$0xff]  ;;  %v1834_v34 = vld [vmem:[#allocation2 + $0x26] sm:$0xff]  ;;  %v6536_v36 = vpack.c.bf16 %v1370_v31, %v1370_v31  ;;  %1939 = vst.msk [vmem:[#allocation6 + $0x10] sm:$0xf] %vm644_vm3, %v5349_v27  ;;  %v6545_v43 = vpack.c.bf16 %v1371_v40, %v1371_v40  ;;  %5523 = vmatprep.subr.bf16.mxu0 %v6003_v24 }
 0x10c   : > { %v1537_v33 = vld [vmem:[#allocation2 + $0x1c] sm:$0xff]  ;;  %v5226_v37 = vpack.c.bf16 %v948_v32, %v948_v32  ;;  %v5350_v39 = vpack.c.bf16 %v1834_v34, %v1834_v34  ;;  %627 = vst.msk [vmem:[#allocation2 + $0x38] sm:$0xff] %vm619_vm2, %v545_v28  ;;  %1161 = vrot.lane.b32.xlu0 %v5349_v27, %s6268_s14  ;;  %865 = vrot.lane.b32.xlu1 %v5205_v30, %s6268_s14  ;;  %v1538_v47 = vld [vmem:[#allocation2 + $0x24] sm:$0xff] }
 0x10d   : > { %v778_v35 = vld [vmem:[#allocation2 + $0x21] sm:$0xff]  ;;  %v5307_v38 = vpack.c.bf16 %v1537_v33, %v1537_v33  ;;  %756 = vst.msk [vmem:[#allocation6 + $0x90] sm:$0xf] %vm644_vm3, %v6536_v36  ;;  %v5308_v50 = vpack.c.bf16 %v1538_v47, %v1538_v47  ;;  %757 = vst.msk [vmem:[#allocation6 + $0xb4] sm:$0xf] %vm644_vm3, %v6545_v43  ;;  %v6004_v27 = vld [vmem:[%s7542_s3 + $0x98] sm:$0xff]  }
 0x10e   : > { %v949_v41 = vld [vmem:[#allocation2 + $0x22] sm:$0xff]  ;;  %1054 = vst.msk [vmem:[#allocation6 + $0x70] sm:$0xf] %vm644_vm3, %v5226_v37  ;;  %1940 = vst.msk [vmem:[#allocation6 + $0x34] sm:$0xf] %vm644_vm3, %v5350_v39  ;;  %v5206_v48 = vpack.c.bf16 %v778_v35, %v778_v35  ;;  %v549_v52 = vpop.f32.mrb[16].mxu0  ;;  %5524 = vmatpush3.bf16.msra.mxu0 %v6004_v27 }
 0x10f   : > { %v5227_v44 = vpack.c.bf16 %v949_v41, %v949_v41  ;;  %1643 = vst.msk [vmem:[#allocation6 + $0xc] sm:$0xf] %vm644_vm3, %v5307_v38  ;;  %v1243_v46 = vld [vmem:[#allocation2 + $0x1f] sm:$0xff]  ;;  %v1244_v51 = vld [vmem:[#allocation2 + $0x27] sm:$0xff]  ;;  %v550_v54 = vadd.f32 %v6456_v22, %v549_v52  ;;  %v5795_v55 = vpop.f32.mrb[17].mxu0 }
 0x110   : > { %v5267_v49 = vpack.c.bf16 %v1243_v46, %v1243_v46  ;;  %v5268_v53 = vpack.c.bf16 %v1244_v51, %v1244_v51  ;;  %1163 = vrot.lane.b32.xlu1 %v5350_v39, %s6268_s14  ;;  %867 = vrot.lane.b32.xlu0 %v5206_v48, %s6268_s14  ;;  %1644 = vst.msk [vmem:[#allocation6 + $0x30] sm:$0xf] %vm644_vm3, %v5308_v50  ;;  %v552_v57 = vpop.f32.mrb[18].mxu0 }
 0x111   : > { %1055 = vst.msk [vmem:[#allocation6 + $0x94] sm:$0xf] %vm644_vm3, %v5227_v44  ;;  %v1835_v56 = vld [vmem:[#allocation2 + $0x2e] sm:$0xff]  ;;  %v553_v60 = vadd.f32 %v6456_v22, %v552_v57  ;;  %v5796_v61 = vpop.f32.mrb[19].mxu0 }
 0x112   : > { %1349 = vst.msk [vmem:[#allocation6 + $0x50] sm:$0xf] %vm644_vm3, %v5267_v49  ;;  %v779_v58 = vld [vmem:[#allocation2 + $0x29] sm:$0xff]  ;;  %1350 = vst.msk [vmem:[#allocation6 + $0x74] sm:$0xf] %vm644_vm3, %v5268_v53  ;;  %v5351_v59 = vpack.c.bf16 %v1835_v56, %v1835_v56 }
 0x113   : > { %628 = vst.msk [vmem:[#allocation2 + $0x40] sm:$0xff] %vm619_vm2, %v550_v54  ;;  %v5207_v62 = vpack.c.bf16 %v779_v58, %v779_v58  ;;  %v1372_v63 = vld [vmem:[#allocation2 + $0x30] sm:$0xff]  ;;  %629 = vst.msk [vmem:[#allocation2 + $0x48] sm:$0xff] %vm619_vm2, %v553_v60  ;;  %v1373_v10 = vld [vmem:[#allocation2 + $0x38] sm:$0xff] }
 0x114   : > { %v950_v0 = vld [vmem:[#allocation2 + $0x2a] sm:$0xff]  ;;  %v1836_v3 = vld [vmem:[#allocation2 + $0x36] sm:$0xff]  ;;  %v6566_v6 = vpack.c.bf16 %v1372_v63, %v1372_v63  ;;  %1941 = vst.msk [vmem:[#allocation6 + $0x58] sm:$0xf] %vm644_vm3, %v5351_v59  ;;  %1165 = vrot.lane.b32.xlu0 %v5351_v59, %s6268_s14  ;;  %v6572_v14 = vpack.c.bf16 %v1373_v10, %v1373_v10 }
 0x115   : > { %v1539_v2 = vld [vmem:[#allocation2 + $0x2c] sm:$0xff]  ;;  %v5228_v7 = vpack.c.bf16 %v950_v0, %v950_v0  ;;  %v5352_v9 = vpack.c.bf16 %v1836_v3, %v1836_v3  ;;  %869 = vrot.lane.b32.xlu1 %v5207_v62, %s6268_s14  ;;  %v1540_v17 = vld [vmem:[#allocation2 + $0x34] sm:$0xff] }
 0x116   : > { %v780_v5 = vld [vmem:[#allocation2 + $0x31] sm:$0xff]  ;;  %v5309_v8 = vpack.c.bf16 %v1539_v2, %v1539_v2  ;;  %758 = vst.msk [vmem:[#allocation6 + $0xd8] sm:$0xf] %vm644_vm3, %v6566_v6  ;;  %v5310_v20 = vpack.c.bf16 %v1540_v17, %v1540_v17  ;;  %v557_v23 = vpop.f32.mrb[20].mxu0  ;;  %759 = vst.msk [vmem:[#allocation6 + $0xfc] sm:$0xf] %vm644_vm3, %v6572_v14 }
 0x117   : > { %v951_v11 = vld [vmem:[#allocation2 + $0x32] sm:$0xff]  ;;  %1056 = vst.msk [vmem:[#allocation6 + $0xb8] sm:$0xf] %vm644_vm3, %v5228_v7  ;;  %1942 = vst.msk [vmem:[#allocation6 + $0x7c] sm:$0xf] %vm644_vm3, %v5352_v9  ;;  %v5208_v19 = vpack.c.bf16 %v780_v5, %v780_v5  ;;  %v558_v25 = vadd.f32 %v6456_v22, %v557_v23  ;;  %v5799_v26 = vpop.f32.mrb[21].mxu0 }
 0x118   : > { %v1245_v12 = vld [vmem:[#allocation2 + $0x2f] sm:$0xff]  ;;  %v5229_v15 = vpack.c.bf16 %v951_v11, %v951_v11  ;;  %1645 = vst.msk [vmem:[#allocation6 + $0x54] sm:$0xf] %vm644_vm3, %v5309_v8  ;;  %v1246_v18 = vld [vmem:[#allocation2 + $0x37] sm:$0xff]  ;;  %1646 = vst.msk [vmem:[#allocation6 + $0x78] sm:$0xf] %vm644_vm3, %v5310_v20 }
 0x119   : > { %v5269_v16 = vpack.c.bf16 %v1245_v12, %v1245_v12  ;;  %v5270_v21 = vpack.c.bf16 %v1246_v18, %v1246_v18  ;;  %1167 = vrot.lane.b32.xlu1 %v5352_v9, %s6268_s14  ;;  %871 = vrot.lane.b32.xlu0 %v5208_v19, %s6268_s14  ;;  %v560_v29 = vpop.f32.mrb[22].mxu0  ;;  %630 = vst.msk [vmem:[#allocation2 + $0x50] sm:$0xff] %vm619_vm2, %v558_v25  ;;  %v6011_v23 = vld [vmem:[%s7542_s3 + $0xe0] sm:$0xff]  }
 0x11a   : > { %1057 = vst.msk [vmem:[#allocation6 + $0xdc] sm:$0xf] %vm644_vm3, %v5229_v15  ;;  %v1837_v28 = vld [vmem:[#allocation2 + $0x3e] sm:$0xff]  ;;  %v561_v32 = vadd.f32 %v6456_v22, %v560_v29  ;;  %v5800_v33 = vpop.f32.mrb[23].mxu0  ;;  %v1838_v39 = vld [vmem:[#allocation2 + $0x46] sm:$0xff]  ;;  %5525 = vmatprep.subr.bf16.mxu0 %v6011_v23 }
 0x11b   : > { %1351 = vst.msk [vmem:[#allocation6 + $0x98] sm:$0xf] %vm644_vm3, %v5269_v16  ;;  %1352 = vst.msk [vmem:[#allocation6 + $0xbc] sm:$0xf] %vm644_vm3, %v5270_v21  ;;  %v781_v30 = vld [vmem:[#allocation2 + $0x39] sm:$0xff]  ;;  %v5353_v31 = vpack.c.bf16 %v1837_v28, %v1837_v28  ;;  %v782_v40 = vld [vmem:[#allocation2 + $0x41] sm:$0xff]  ;;  %v5354_v45 = vpack.c.bf16 %v1838_v39, %v1838_v39 }
 0x11c   : > { %v5209_v34 = vpack.c.bf16 %v781_v30, %v781_v30  ;;  %v1374_v35 = vld [vmem:[#allocation2 + $0x40] sm:$0xff]  ;;  %631 = vst.msk [vmem:[#allocation2 + $0x58] sm:$0xff] %vm619_vm2, %v561_v32  ;;  %v1375_v46 = vld [vmem:[#allocation2 + $0x48] sm:$0xff]  ;;  %v5210_v54 = vpack.c.bf16 %v782_v40, %v782_v40 }
 0x11d   : > { %v952_v37 = vld [vmem:[#allocation2 + $0x3a] sm:$0xff]  ;;  %v6596_v41 = vpack.c.bf16 %v1374_v35, %v1374_v35  ;;  %1943 = vst.msk [vmem:[#allocation6 + $0xa0] sm:$0xf] %vm644_vm3, %v5353_v31  ;;  %1169 = vrot.lane.b32.xlu0 %v5353_v31, %s6268_s14  ;;  %v953_v47 = vld [vmem:[#allocation2 + $0x42] sm:$0xff]  ;;  %v6602_v49 = vpack.c.bf16 %v1375_v46, %v1375_v46  ;;  %1944 = vst.msk [vmem:[#allocation6 + $0xc4] sm:$0xf] %vm644_vm3, %v5354_v45 }
 0x11e   : > { %v1541_v38 = vld [vmem:[#allocation2 + $0x3c] sm:$0xff]  ;;  %v5230_v42 = vpack.c.bf16 %v952_v37, %v952_v37  ;;  %873 = vrot.lane.b32.xlu1 %v5209_v34, %s6268_s14  ;;  %v5231_v50 = vpack.c.bf16 %v953_v47, %v953_v47  ;;  %v1542_v52 = vld [vmem:[#allocation2 + $0x44] sm:$0xff]  ;;  %v565_v57 = vpop.f32.mrb[24].mxu0 }
 0x11f   : > { %v5311_v44 = vpack.c.bf16 %v1541_v38, %v1541_v38  ;;  %v1247_v48 = vld [vmem:[#allocation2 + $0x3f] sm:$0xff]  ;;  %760 = vst.msk [vmem:[#allocation6 + $0x120] sm:$0xf] %vm644_vm3, %v6596_v41  ;;  %v1248_v53 = vld [vmem:[#allocation2 + $0x47] sm:$0xff]  ;;  %v5312_v55 = vpack.c.bf16 %v1542_v52, %v1542_v52  ;;  %761 = vst.msk [vmem:[#allocation6 + $0x144] sm:$0xf] %vm644_vm3, %v6602_v49  ;;  %v566_v58 = vadd.f32 %v6456_v22, %v565_v57 }
 0x120   : > { %1058 = vst.msk [vmem:[#allocation6 + $0x100] sm:$0xf] %vm644_vm3, %v5230_v42  ;;  %v5271_v51 = vpack.c.bf16 %v1247_v48, %v1247_v48  ;;  %v5272_v56 = vpack.c.bf16 %v1248_v53, %v1248_v53  ;;  %1059 = vst.msk [vmem:[#allocation6 + $0x124] sm:$0xf] %vm644_vm3, %v5231_v50  ;;  %v5803_v59 = vpop.f32.mrb[25].mxu0  ;;  %v1839_v60 = vld [vmem:[#allocation2 + $0x4e] sm:$0xff] }
 0x121   : > { %1647 = vst.msk [vmem:[#allocation6 + $0x9c] sm:$0xf] %vm644_vm3, %v5311_v44  ;;  %875 = vrot.lane.b32.xlu0 %v5210_v54, %s6268_s14  ;;  %1648 = vst.msk [vmem:[#allocation6 + $0xc0] sm:$0xf] %vm644_vm3, %v5312_v55  ;;  %v568_v61 = vpop.f32.mrb[26].mxu0  ;;  %v783_v62 = vld [vmem:[#allocation2 + $0x49] sm:$0xff]  ;;  %v5355_v63 = vpack.c.bf16 %v1839_v60, %v1839_v60 }
 0x122   : > { %1353 = vst.msk [vmem:[#allocation6 + $0xe0] sm:$0xf] %vm644_vm3, %v5271_v51  ;;  %1171 = vrot.lane.b32.xlu1 %v5354_v45, %s6268_s14  ;;  %1354 = vst.msk [vmem:[#allocation6 + $0x104] sm:$0xf] %vm644_vm3, %v5272_v56  ;;  %v569_v0 = vadd.f32 %v6456_v22, %v568_v61  ;;  %v5804_v2 = vpop.f32.mrb[27].mxu0  ;;  %v5211_v3 = vpack.c.bf16 %v783_v62, %v783_v62  ;;  %v1376_v5 = vld [vmem:[#allocation2 + $0x50] sm:$0xff] }
 0x123   : > { %632 = vst.msk [vmem:[#allocation2 + $0x60] sm:$0xff] %vm619_vm2, %v566_v58  ;;  %v954_v7 = vld [vmem:[#allocation2 + $0x4a] sm:$0xff]  ;;  %v1840_v9 = vld [vmem:[#allocation2 + $0x56] sm:$0xff]  ;;  %v6620_v11 = vpack.c.bf16 %v1376_v5, %v1376_v5  ;;  %v6013_v28 = vld [vmem:[%s7542_s3 + $0xa0] sm:$0xff]  }
 0x124   : > { %v1543_v8 = vld [vmem:[#allocation2 + $0x4c] sm:$0xff]  ;;  %v5232_v12 = vpack.c.bf16 %v954_v7, %v954_v7  ;;  %1945 = vst.msk [vmem:[#allocation6 + $0xe8] sm:$0xf] %vm644_vm3, %v5355_v63  ;;  %v5356_v16 = vpack.c.bf16 %v1840_v9, %v1840_v9  ;;  %v1377_v17 = vld [vmem:[#allocation2 + $0x58] sm:$0xff]  ;;  %5526 = vmatpush3.bf16.msra.mxu0 %v6013_v28 }
 0x125   : > { %v784_v10 = vld [vmem:[#allocation2 + $0x51] sm:$0xff]  ;;  %v5313_v15 = vpack.c.bf16 %v1543_v8, %v1543_v8  ;;  %633 = vst.msk [vmem:[#allocation2 + $0x68] sm:$0xff] %vm619_vm2, %v569_v0  ;;  %1173 = vrot.lane.b32.xlu0 %v5355_v63, %s6268_s14  ;;  %v6626_v20 = vpack.c.bf16 %v1377_v17, %v1377_v17 }
 0x126   : > { %877 = vrot.lane.b32.xlu1 %v5211_v3, %s6268_s14  ;;  %v955_v18 = vld [vmem:[#allocation2 + $0x52] sm:$0xff]  ;;  %1060 = vst.msk [vmem:[#allocation6 + $0x148] sm:$0xf] %vm644_vm3, %v5232_v12  ;;  %762 = vst.msk [vmem:[#allocation6 + $0x168] sm:$0xf] %vm644_vm3, %v6620_v11  ;;  %v5212_v27 = vpack.c.bf16 %v784_v10, %v784_v10  ;;  %v573_v31 = vpop.f32.mrb[28].mxu0 }
 0x127   : > { %v1249_v19 = vld [vmem:[#allocation2 + $0x4f] sm:$0xff]  ;;  %v5233_v21 = vpack.c.bf16 %v955_v18, %v955_v18  ;;  %1649 = vst.msk [vmem:[#allocation6 + $0xe4] sm:$0xf] %vm644_vm3, %v5313_v15  ;;  %v1250_v26 = vld [vmem:[#allocation2 + $0x57] sm:$0xff]  ;;  %1946 = vst.msk [vmem:[#allocation6 + $0x10c] sm:$0xf] %vm644_vm3, %v5356_v16  ;;  %v574_v32 = vadd.f32 %v6456_v22, %v573_v31 }
 0x128   : > { %v5273_v24 = vpack.c.bf16 %v1249_v19, %v1249_v19  ;;  %v1544_v25 = vld [vmem:[#allocation2 + $0x54] sm:$0xff]  ;;  %v5274_v30 = vpack.c.bf16 %v1250_v26, %v1250_v26  ;;  %763 = vst.msk [vmem:[#allocation6 + $0x18c] sm:$0xf] %vm644_vm3, %v6626_v20  ;;  %v5807_v33 = vpop.f32.mrb[29].mxu0  ;;  %v6017_v3 = vld [vmem:[%s7542_s3 + $0xe8] sm:$0xff]  }
 0x129   : > { %v5314_v29 = vpack.c.bf16 %v1544_v25, %v1544_v25  ;;  %1061 = vst.msk [vmem:[#allocation6 + $0x16c] sm:$0xf] %vm644_vm3, %v5233_v21  ;;  %879 = vrot.lane.b32.xlu0 %v5212_v27, %s6268_s14  ;;  %v576_v35 = vpop.f32.mrb[30].mxu0  ;;  %5527 = vmatprep.subr.bf16.mxu0 %v6017_v3  ;;  %v6018_v31 = vld [vmem:[%s7542_s3 + $0xa8] sm:$0xff]  }
 0x12a   : > { %1355 = vst.msk [vmem:[#allocation6 + $0x128] sm:$0xf] %vm644_vm3, %v5273_v24  ;;  %1175 = vrot.lane.b32.xlu1 %v5356_v16, %s6268_s14  ;;  %1356 = vst.msk [vmem:[#allocation6 + $0x14c] sm:$0xf] %vm644_vm3, %v5274_v30  ;;  %v1841_v34 = vld [vmem:[#allocation2 + $0x5e] sm:$0xff]  ;;  %v577_v39 = vadd.f32 %v6456_v22, %v576_v35  ;;  %v5808_v40 = vpop.f32.mrb[31].mxu0  ;;  %5528 = vmatpush3.bf16.msra.mxu0 %v6018_v31 }
 0x12b   : > { %1650 = vst.msk [vmem:[#allocation6 + $0x108] sm:$0xf] %vm644_vm3, %v5314_v29  ;;  %v785_v37 = vld [vmem:[#allocation2 + $0x59] sm:$0xff]  ;;  %v5357_v38 = vpack.c.bf16 %v1841_v34, %v1841_v34 }
 0x12c   : > { %634 = vst.msk [vmem:[#allocation2 + $0x70] sm:$0xff] %vm619_vm2, %v574_v32  ;;  %v5213_v42 = vpack.c.bf16 %v785_v37, %v785_v37  ;;  %v1378_v44 = vld [vmem:[#allocation2 + $0x60] sm:$0xff]  ;;  %635 = vst.msk [vmem:[#allocation2 + $0x78] sm:$0xff] %vm619_vm2, %v577_v39  ;;  %v1379_v54 = vld [vmem:[#allocation2 + $0x68] sm:$0xff] }
 0x12d   : > { %v956_v45 = vld [vmem:[#allocation2 + $0x5a] sm:$0xff]  ;;  %v1842_v47 = vld [vmem:[#allocation2 + $0x66] sm:$0xff]  ;;  %v6650_v50 = vpack.c.bf16 %v1378_v44, %v1378_v44  ;;  %1947 = vst.msk [vmem:[#allocation6 + $0x130] sm:$0xf] %vm644_vm3, %v5357_v38  ;;  %1177 = vrot.lane.b32.xlu0 %v5357_v38, %s6268_s14  ;;  %v6656_v57 = vpack.c.bf16 %v1379_v54, %v1379_v54 }
 0x12e   : > { %v1545_v46 = vld [vmem:[#allocation2 + $0x5c] sm:$0xff]  ;;  %v5234_v51 = vpack.c.bf16 %v956_v45, %v956_v45  ;;  %v5358_v53 = vpack.c.bf16 %v1842_v47, %v1842_v47  ;;  %881 = vrot.lane.b32.xlu1 %v5213_v42, %s6268_s14  ;;  %v1546_v60 = vld [vmem:[#allocation2 + $0x64] sm:$0xff]  ;;  %v581_v2 = vpop.f32.mrb[32].mxu0 }
 0x12f   : > { %v786_v48 = vld [vmem:[#allocation2 + $0x61] sm:$0xff]  ;;  %v5315_v52 = vpack.c.bf16 %v1545_v46, %v1545_v46  ;;  %764 = vst.msk [vmem:[#allocation6 + $0x1b0] sm:$0xf] %vm644_vm3, %v6650_v50  ;;  %v5316_v63 = vpack.c.bf16 %v1546_v60, %v1546_v60  ;;  %765 = vst.msk [vmem:[#allocation6 + $0x1d4] sm:$0xf] %vm644_vm3, %v6656_v57  ;;  %v582_v5 = vadd.f32 %v6456_v22, %v581_v2  ;;  %v5811_v7 = vpop.f32.mrb[33].mxu0 }
 0x130   : > { %v957_v55 = vld [vmem:[#allocation2 + $0x62] sm:$0xff]  ;;  %1062 = vst.msk [vmem:[#allocation6 + $0x190] sm:$0xf] %vm644_vm3, %v5234_v51  ;;  %1948 = vst.msk [vmem:[#allocation6 + $0x154] sm:$0xf] %vm644_vm3, %v5358_v53  ;;  %v5214_v62 = vpack.c.bf16 %v786_v48, %v786_v48  ;;  %v584_v9 = vpop.f32.mrb[34].mxu0 }
 0x131   : > { %v1251_v56 = vld [vmem:[#allocation2 + $0x5f] sm:$0xff]  ;;  %v5235_v58 = vpack.c.bf16 %v957_v55, %v957_v55  ;;  %1651 = vst.msk [vmem:[#allocation6 + $0x12c] sm:$0xf] %vm644_vm3, %v5315_v52  ;;  %v1252_v61 = vld [vmem:[#allocation2 + $0x67] sm:$0xff]  ;;  %1652 = vst.msk [vmem:[#allocation6 + $0x150] sm:$0xf] %vm644_vm3, %v5316_v63  ;;  %v585_v15 = vadd.f32 %v6456_v22, %v584_v9 }
 0x132   : > { %v5275_v59 = vpack.c.bf16 %v1251_v56, %v1251_v56  ;;  %v5276_v0 = vpack.c.bf16 %v1252_v61, %v1252_v61  ;;  %1179 = vrot.lane.b32.xlu1 %v5358_v53, %s6268_s14  ;;  %883 = vrot.lane.b32.xlu0 %v5214_v62, %s6268_s14  ;;  %636 = vst.msk [vmem:[#allocation2 + $0x80] sm:$0xff] %vm619_vm2, %v582_v5  ;;  %v5812_v16 = vpop.f32.mrb[35].mxu0 }
 0x133   : > { %1063 = vst.msk [vmem:[#allocation6 + $0x1b4] sm:$0xf] %vm644_vm3, %v5235_v58  ;;  %v1843_v8 = vld [vmem:[#allocation2 + $0x6e] sm:$0xff]  ;;  %v1844_v23 = vld [vmem:[#allocation2 + $0x76] sm:$0xff] }
 0x134   : > { %1357 = vst.msk [vmem:[#allocation6 + $0x170] sm:$0xf] %vm644_vm3, %v5275_v59  ;;  %1358 = vst.msk [vmem:[#allocation6 + $0x194] sm:$0xf] %vm644_vm3, %v5276_v0  ;;  %v787_v10 = vld [vmem:[#allocation2 + $0x69] sm:$0xff]  ;;  %v5359_v12 = vpack.c.bf16 %v1843_v8, %v1843_v8  ;;  %v788_v24 = vld [vmem:[#allocation2 + $0x71] sm:$0xff]  ;;  %v5360_v28 = vpack.c.bf16 %v1844_v23, %v1844_v23 }
 0x135   : > { %v5215_v17 = vpack.c.bf16 %v787_v10, %v787_v10  ;;  %v1380_v18 = vld [vmem:[#allocation2 + $0x70] sm:$0xff]  ;;  %637 = vst.msk [vmem:[#allocation2 + $0x88] sm:$0xff] %vm619_vm2, %v585_v15  ;;  %v1381_v29 = vld [vmem:[#allocation2 + $0x78] sm:$0xff]  ;;  %v5216_v37 = vpack.c.bf16 %v788_v24, %v788_v24 }
 0x136   : > { %v958_v19 = vld [vmem:[#allocation2 + $0x6a] sm:$0xff]  ;;  %v6677_v25 = vpack.c.bf16 %v1380_v18, %v1380_v18  ;;  %1949 = vst.msk [vmem:[#allocation6 + $0x178] sm:$0xf] %vm644_vm3, %v5359_v12  ;;  %1181 = vrot.lane.b32.xlu0 %v5359_v12, %s6268_s14  ;;  %v959_v30 = vld [vmem:[#allocation2 + $0x72] sm:$0xff]  ;;  %v6686_v32 = vpack.c.bf16 %v1381_v29, %v1381_v29  ;;  %1950 = vst.msk [vmem:[#allocation6 + $0x19c] sm:$0xf] %vm644_vm3, %v5360_v28 }
 0x137   : > { %v1547_v21 = vld [vmem:[#allocation2 + $0x6c] sm:$0xff]  ;;  %v5236_v26 = vpack.c.bf16 %v958_v19, %v958_v19  ;;  %885 = vrot.lane.b32.xlu1 %v5215_v17, %s6268_s14  ;;  %v5237_v33 = vpack.c.bf16 %v959_v30, %v959_v30  ;;  %v1548_v35 = vld [vmem:[#allocation2 + $0x74] sm:$0xff]  ;;  %v589_v42 = vpop.f32.mrb[36].mxu0 }
 0x138   : > { %v5317_v27 = vpack.c.bf16 %v1547_v21, %v1547_v21  ;;  %766 = vst.msk [vmem:[#allocation6 + $0x1f8] sm:$0xf] %vm644_vm3, %v6677_v25  ;;  %v1253_v34 = vld [vmem:[#allocation2 + $0x6f] sm:$0xff]  ;;  %v5318_v39 = vpack.c.bf16 %v1548_v35, %v1548_v35  ;;  %v1254_v40 = vld [vmem:[#allocation2 + $0x77] sm:$0xff]  ;;  %767 = vst.msk [vmem:[#allocation6 + $0x21c] sm:$0xf] %vm644_vm3, %v6686_v32  ;;  %v590_v45 = vadd.f32 %v6456_v22, %v589_v42 }
 0x139   : > { %1064 = vst.msk [vmem:[#allocation6 + $0x1d8] sm:$0xf] %vm644_vm3, %v5236_v26  ;;  %v5277_v38 = vpack.c.bf16 %v1253_v34, %v1253_v34  ;;  %1065 = vst.msk [vmem:[#allocation6 + $0x1fc] sm:$0xf] %vm644_vm3, %v5237_v33  ;;  %v5278_v44 = vpack.c.bf16 %v1254_v40, %v1254_v40  ;;  %v5815_v46 = vpop.f32.mrb[37].mxu0  ;;  %v1845_v47 = vld [vmem:[#allocation2 + $0x7e] sm:$0xff] }
 0x13a   : > { %1653 = vst.msk [vmem:[#allocation6 + $0x174] sm:$0xf] %vm644_vm3, %v5317_v27  ;;  %887 = vrot.lane.b32.xlu0 %v5216_v37, %s6268_s14  ;;  %1654 = vst.msk [vmem:[#allocation6 + $0x198] sm:$0xf] %vm644_vm3, %v5318_v39  ;;  %v592_v48 = vpop.f32.mrb[38].mxu0  ;;  %v789_v51 = vld [vmem:[#allocation2 + $0x79] sm:$0xff]  ;;  %v5361_v52 = vpack.c.bf16 %v1845_v47, %v1845_v47 }
 0x13b   : > { %1183 = vrot.lane.b32.xlu1 %v5360_v28, %s6268_s14  ;;  %1359 = vst.msk [vmem:[#allocation6 + $0x1b8] sm:$0xf] %vm644_vm3, %v5277_v38  ;;  %1360 = vst.msk [vmem:[#allocation6 + $0x1dc] sm:$0xf] %vm644_vm3, %v5278_v44  ;;  %v593_v53 = vadd.f32 %v6456_v22, %v592_v48  ;;  %v5816_v54 = vpop.f32.mrb[39].mxu0  ;;  %v5217_v55 = vpack.c.bf16 %v789_v51, %v789_v51  ;;  %v1382_v56 = vld [vmem:[#allocation2 + $0x80] sm:$0xff] }
 0x13c   : > { %638 = vst.msk [vmem:[#allocation2 + $0x90] sm:$0xff] %vm619_vm2, %v590_v45  ;;  %v960_v58 = vld [vmem:[#allocation2 + $0x7a] sm:$0xff]  ;;  %v1846_v60 = vld [vmem:[#allocation2 + $0x86] sm:$0xff]  ;;  %v6704_v62 = vpack.c.bf16 %v1382_v56, %v1382_v56  ;;  %v6026_v21 = vld [vmem:[%s7542_s3 + $0xf0] sm:$0xff]  }
 0x13d   : > { %v1549_v59 = vld [vmem:[#allocation2 + $0x7c] sm:$0xff]  ;;  %v5238_v63 = vpack.c.bf16 %v960_v58, %v960_v58  ;;  %1951 = vst.msk [vmem:[#allocation6 + $0x1c0] sm:$0xf] %vm644_vm3, %v5361_v52  ;;  %v5362_v2 = vpack.c.bf16 %v1846_v60, %v1846_v60  ;;  %v1383_v3 = vld [vmem:[#allocation2 + $0x88] sm:$0xff]  ;;  %v6027_v23 = vld [vmem:[%s7542_s3 + $0xb0] sm:$0xff]   ;;  %5529 = vmatprep.subr.bf16.mxu0 %v6026_v21 }
 0x13e   : > { %v790_v61 = vld [vmem:[#allocation2 + $0x81] sm:$0xff]  ;;  %v5319_v0 = vpack.c.bf16 %v1549_v59, %v1549_v59  ;;  %639 = vst.msk [vmem:[#allocation2 + $0x98] sm:$0xff] %vm619_vm2, %v593_v53  ;;  %1185 = vrot.lane.b32.xlu0 %v5361_v52, %s6268_s14  ;;  %v6710_v8 = vpack.c.bf16 %v1383_v3, %v1383_v3  ;;  %v597_v19 = vpop.f32.mrb[40].mxu0  ;;  %5530 = vmatpush3.bf16.msra.mxu0 %v6027_v23 }
 0x13f   : > { %889 = vrot.lane.b32.xlu1 %v5217_v55, %s6268_s14  ;;  %v961_v5 = vld [vmem:[#allocation2 + $0x82] sm:$0xff]  ;;  %1066 = vst.msk [vmem:[#allocation6 + $0x220] sm:$0xf] %vm644_vm3, %v5238_v63  ;;  %768 = vst.msk [vmem:[#allocation6 + $0x240] sm:$0xf] %vm644_vm3, %v6704_v62  ;;  %v5218_v16 = vpack.c.bf16 %v790_v61, %v790_v61  ;;  %v598_v24 = vadd.f32 %v6456_v22, %v597_v19  ;;  %v5819_v26 = vpop.f32.mrb[41].mxu0 }
 0x140   : > { %v1255_v7 = vld [vmem:[#allocation2 + $0x7f] sm:$0xff]  ;;  %v5239_v9 = vpack.c.bf16 %v961_v5, %v961_v5  ;;  %1655 = vst.msk [vmem:[#allocation6 + $0x1bc] sm:$0xf] %vm644_vm3, %v5319_v0  ;;  %v1256_v15 = vld [vmem:[#allocation2 + $0x87] sm:$0xff]  ;;  %1952 = vst.msk [vmem:[#allocation6 + $0x1e4] sm:$0xf] %vm644_vm3, %v5362_v2 }
 0x141   : > { %v5279_v10 = vpack.c.bf16 %v1255_v7, %v1255_v7  ;;  %v1550_v12 = vld [vmem:[#allocation2 + $0x84] sm:$0xff]  ;;  %v5280_v18 = vpack.c.bf16 %v1256_v15, %v1256_v15  ;;  %769 = vst.msk [vmem:[#allocation6 + $0x264] sm:$0xf] %vm644_vm3, %v6710_v8  ;;  %v600_v28 = vpop.f32.mrb[42].mxu0  ;;  %v6035_v26 = vld [vmem:[%s7542_s3 + $0xb8] sm:$0xff]  }
 0x142   : > { %v5320_v17 = vpack.c.bf16 %v1550_v12, %v1550_v12  ;;  %1067 = vst.msk [vmem:[#allocation6 + $0x244] sm:$0xf] %vm644_vm3, %v5239_v9  ;;  %891 = vrot.lane.b32.xlu0 %v5218_v16, %s6268_s14  ;;  %v601_v31 = vadd.f32 %v6456_v22, %v600_v28  ;;  %v5820_v33 = vpop.f32.mrb[43].mxu0 }
 0x143   : > { %1361 = vst.msk [vmem:[#allocation6 + $0x200] sm:$0xf] %vm644_vm3, %v5279_v10  ;;  %1187 = vrot.lane.b32.xlu1 %v5362_v2, %s6268_s14  ;;  %1362 = vst.msk [vmem:[#allocation6 + $0x224] sm:$0xf] %vm644_vm3, %v5280_v18  ;;  %v1847_v27 = vld [vmem:[#allocation2 + $0x8e] sm:$0xff] }
 0x144   : > { %1656 = vst.msk [vmem:[#allocation6 + $0x1e0] sm:$0xf] %vm644_vm3, %v5320_v17  ;;  %v791_v29 = vld [vmem:[#allocation2 + $0x89] sm:$0xff]  ;;  %v5363_v30 = vpack.c.bf16 %v1847_v27, %v1847_v27 }
 0x145   : > { %640 = vst.msk [vmem:[#allocation2 + $0xa0] sm:$0xff] %vm619_vm2, %v598_v24  ;;  %v5219_v34 = vpack.c.bf16 %v791_v29, %v791_v29  ;;  %v1384_v35 = vld [vmem:[#allocation2 + $0x90] sm:$0xff]  ;;  %641 = vst.msk [vmem:[#allocation2 + $0xa8] sm:$0xff] %vm619_vm2, %v601_v31  ;;  %v1385_v47 = vld [vmem:[#allocation2 + $0x98] sm:$0xff] }
 0x146   : > { %v962_v37 = vld [vmem:[#allocation2 + $0x8a] sm:$0xff]  ;;  %v1848_v39 = vld [vmem:[#allocation2 + $0x96] sm:$0xff]  ;;  %v6734_v42 = vpack.c.bf16 %v1384_v35, %v1384_v35  ;;  %1953 = vst.msk [vmem:[#allocation6 + $0x208] sm:$0xf] %vm644_vm3, %v5363_v30  ;;  %1189 = vrot.lane.b32.xlu0 %v5363_v30, %s6268_s14  ;;  %v6740_v52 = vpack.c.bf16 %v1385_v47, %v1385_v47  ;;  %v605_v61 = vpop.f32.mrb[44].mxu0 }
 0x147   : > { %v1551_v38 = vld [vmem:[#allocation2 + $0x8c] sm:$0xff]  ;;  %v5240_v44 = vpack.c.bf16 %v962_v37, %v962_v37  ;;  %v5364_v46 = vpack.c.bf16 %v1848_v39, %v1848_v39  ;;  %893 = vrot.lane.b32.xlu1 %v5219_v34, %s6268_s14  ;;  %v1552_v55 = vld [vmem:[#allocation2 + $0x94] sm:$0xff]  ;;  %v606_v63 = vadd.f32 %v6456_v22, %v605_v61  ;;  %v5823_v0 = vpop.f32.mrb[45].mxu0  ;;  %v6193_v39 = vld [vmem:[%s7541_s2] ss:$0 sm:$0xff] }
 0x148   : > { %v792_v40 = vld [vmem:[#allocation2 + $0x91] sm:$0xff]  ;;  %v5321_v45 = vpack.c.bf16 %v1551_v38, %v1551_v38  ;;  %770 = vst.msk [vmem:[#allocation6 + $0x288] sm:$0xf] %vm644_vm3, %v6734_v42  ;;  %v5322_v59 = vpack.c.bf16 %v1552_v55, %v1552_v55  ;;  %771 = vst.msk [vmem:[#allocation6 + $0x2ac] sm:$0xf] %vm644_vm3, %v6740_v52  ;;  %v608_v3 = vpop.f32.mrb[46].mxu0 }
 0x149   : > { %v963_v48 = vld [vmem:[#allocation2 + $0x92] sm:$0xff]  ;;  %1068 = vst.msk [vmem:[#allocation6 + $0x268] sm:$0xf] %vm644_vm3, %v5240_v44  ;;  %1954 = vst.msk [vmem:[#allocation6 + $0x22c] sm:$0xf] %vm644_vm3, %v5364_v46  ;;  %v5220_v58 = vpack.c.bf16 %v792_v40, %v792_v40  ;;  %v609_v9 = vadd.f32 %v6456_v22, %v608_v3  ;;  %v5824_v10 = vpop.f32.mrb[47].mxu0 }
 0x14a   : > { %v1257_v51 = vld [vmem:[#allocation2 + $0x8f] sm:$0xff]  ;;  %v5241_v53 = vpack.c.bf16 %v963_v48, %v963_v48  ;;  %1657 = vst.msk [vmem:[#allocation6 + $0x204] sm:$0xf] %vm644_vm3, %v5321_v45  ;;  %v1258_v56 = vld [vmem:[#allocation2 + $0x97] sm:$0xff]  ;;  %1658 = vst.msk [vmem:[#allocation6 + $0x228] sm:$0xf] %vm644_vm3, %v5322_v59 }
 0x14b   : > { %v5281_v54 = vpack.c.bf16 %v1257_v51, %v1257_v51  ;;  %v5282_v60 = vpack.c.bf16 %v1258_v56, %v1258_v56  ;;  %1191 = vrot.lane.b32.xlu1 %v5364_v46, %s6268_s14  ;;  %895 = vrot.lane.b32.xlu0 %v5220_v58, %s6268_s14  ;;  %642 = vst.msk [vmem:[#allocation2 + $0xb0] sm:$0xff] %vm619_vm2, %v606_v63  ;;  %643 = vst.msk [vmem:[#allocation2 + $0xb8] sm:$0xff] %vm619_vm2, %v609_v9  ;;  %v6032_v22 = vld [vmem:[%s7542_s3 + $0xf8] sm:$0xff]   ;;  %v1665_v3 = vld [vmem:[#allocation2 + $0x25] sm:$0xff] }
 0x14c   : > { %1069 = vst.msk [vmem:[#allocation6 + $0x28c] sm:$0xf] %vm644_vm3, %v5241_v53  ;;  %v1849_v2 = vld [vmem:[#allocation2 + $0x9e] sm:$0xff]  ;;  %v1850_v16 = vld [vmem:[#allocation2 + $0xa6] sm:$0xff]  ;;  %5531 = vmatprep.subr.bf16.mxu0 %v6032_v22 }
 0x14d   : > { %1363 = vst.msk [vmem:[#allocation6 + $0x248] sm:$0xf] %vm644_vm3, %v5281_v54  ;;  %1364 = vst.msk [vmem:[#allocation6 + $0x26c] sm:$0xf] %vm644_vm3, %v5282_v60  ;;  %v793_v5 = vld [vmem:[#allocation2 + $0x99] sm:$0xff]  ;;  %v5365_v7 = vpack.c.bf16 %v1849_v2, %v1849_v2  ;;  %v5366_v18 = vpack.c.bf16 %v1850_v16, %v1850_v16  ;;  %v1554_v31 = vld [vmem:[#allocation2 + $0xa4] sm:$0xff]  ;;  %5532 = vmatpush3.bf16.msra.mxu0 %v6035_v26 }
 0x14e   : > { %v5221_v12 = vpack.c.bf16 %v793_v5, %v793_v5  ;;  %v964_v15 = vld [vmem:[#allocation2 + $0x9a] sm:$0xff]  ;;  %v965_v21 = vld [vmem:[#allocation2 + $0xa2] sm:$0x3f]  ;;  %v613_v34 = vpop.f32.mrb[48].mxu0  ;;  %v5324_v37 = vpack.c.bf16 %v1554_v31, %v1554_v31  ;;  %v1670_v22 = vld [vmem:[#allocation2 + $0x4d] sm:$0xff] }
 0x14f   : > { %v5242_v17 = vpack.c.bf16 %v964_v15, %v964_v15  ;;  %1955 = vst.msk [vmem:[#allocation6 + $0x250] sm:$0xf] %vm644_vm3, %v5365_v7  ;;  %1193 = vrot.lane.b32.xlu0 %v5365_v7, %s6268_s14  ;;  %v666_v19 = vld [vmem:[#allocation2 + $0xa0] sm:$0x3f]  ;;  %v5243_v24 = vpack.c.bf16 %v965_v21, %v965_v21  ;;  %1956 = vst.msk [vmem:[#allocation6 + $0x274] sm:$0xf] %vm644_vm3, %v5366_v18  ;;  %v614_v40 = vadd.f32 %v6193_v39, %v613_v34 }
 0x150   : > { %897 = vrot.lane.b32.xlu1 %v5221_v12, %s6268_s14  ;;  %v5201_v23 = vpack.c.bf16 %v666_v19, %v666_v19  ;;  %v1553_v27 = vld [vmem:[#allocation2 + $0x9c] sm:$0xff]  ;;  %v1260_v33 = vld [vmem:[#allocation2 + $0xa7] sm:$0xff]  ;;  %v5827_v44 = vpop.f32.mrb[49].mxu0  ;;  %1660 = vst.msk [vmem:[#allocation6 + $0x270] sm:$0xf] %vm644_vm3, %v5324_v37 }
 0x151   : > { %1070 = vst.msk [vmem:[#allocation6 + $0x2b0] sm:$0xf] %vm644_vm3, %v5242_v17  ;;  %v1259_v28 = vld [vmem:[#allocation2 + $0x9f] sm:$0xff]  ;;  %v5323_v29 = vpack.c.bf16 %v1553_v27, %v1553_v27  ;;  %v5284_v38 = vpack.c.bf16 %v1260_v33, %v1260_v33  ;;  %v616_v46 = vpop.f32.mrb[50].mxu0  ;;  %645 = vst.msk [vmem:[#allocation2 + $0xc0] sm:$0xf] %vm644_vm3, %v614_v40 }
 0x152   : > { %v5283_v30 = vpack.c.bf16 %v1259_v28, %v1259_v28  ;;  %v794_v35 = vld [vmem:[#allocation2 + $0xa1] sm:$0x3f]  ;;  %773 = vst.msk [vmem:[#allocation6 + $0x2d0] sm:$0x7] %vm772_vm4, %v5201_v23  ;;  %1071 = vst.msk [vmem:[#allocation6 + $0x2d4] sm:$0x7] %vm772_vm4, %v5243_v24 }
 0x153   : > { %1453 = vrot.lane.b32.xlu0 %v6512_v4, %s6268_s14  ;;  %1659 = vst.msk [vmem:[#allocation6 + $0x24c] sm:$0xf] %vm644_vm3, %v5323_v29  ;;  %v1851_v45 = vld [vmem:[#allocation2 + $0xae] sm:$0xff]  ;;  %1366 = vst.msk [vmem:[#allocation6 + $0x2b4] sm:$0xf] %vm644_vm3, %v5284_v38  ;;  %v5222_v48 = vpack.c.bf16 %v794_v35, %v794_v35  ;;  %v1664_v51 = vld [vmem:[#allocation2 + $0x1d] sm:$0xff] }
 0x154   : > { %1195 = vrot.lane.b32.xlu1 %v5366_v18, %s6268_s14  ;;  %1365 = vst.msk [vmem:[#allocation6 + $0x290] sm:$0xf] %vm644_vm3, %v5283_v30  ;;  %v5367_v47 = vpack.c.bf16 %v1851_v45, %v1851_v45  ;;  %v5828_v53 = vpop.f32.mrb[51].mxu0  ;;  %v1555_v4 = vld [vmem:[#allocation2 + $0xac] sm:$0xff]  ;;  %v1852_v55 = vld [vmem:[#allocation2 + $0xb6] sm:$0xff]  ;;  %v5328_v0 = vpack.c.bf16 %v1664_v51, %v1664_v51  ;;  %v5994_v40 = vld [vmem:[%s7542_s3 + $0x100] sm:$0xff]  }
 0x155   : > { %v1261_v54 = vld [vmem:[#allocation2 + $0xaf] sm:$0x3f]  ;;  %v5325_v58 = vpack.c.bf16 %v1555_v4, %v1555_v4  ;;  %v5368_v61 = vpack.c.bf16 %v1852_v55, %v1852_v55  ;;  %v1667_v16 = vld [vmem:[#allocation2 + $0x35] sm:$0xff]  ;;  %v1668_v18 = vld [vmem:[#allocation2 + $0x3d] sm:$0xff] }
 0x156   : > { %v1092_v56 = vld [vmem:[#allocation2 + $0xae] sm:$0x3f]  ;;  %v5285_v59 = vpack.c.bf16 %v1261_v54, %v1261_v54  ;;  %v1556_v60 = vld [vmem:[#allocation2 + $0xb4] sm:$0xff]  ;;  %1957 = vst.msk [vmem:[#allocation6 + $0x298] sm:$0xf] %vm644_vm3, %v5367_v47  ;;  %v5331_v17 = vpack.c.bf16 %v1667_v16, %v1667_v16  ;;  %v1669_v19 = vld [vmem:[#allocation2 + $0x45] sm:$0xff] }
 0x157   : > { %899 = vrot.lane.b32.xlu0 %v5222_v48, %s6268_s14  ;;  %v5326_v63 = vpack.c.bf16 %v1556_v60, %v1556_v60  ;;  %1661 = vst.msk [vmem:[#allocation6 + $0x294] sm:$0xf] %vm644_vm3, %v5325_v58  ;;  %1958 = vst.msk [vmem:[#allocation6 + $0x2bc] sm:$0xf] %vm644_vm3, %v5368_v61  ;;  %v5264_v2 = vpack.c.bf16 %v1092_v56, %v1092_v56  ;;  %v1666_v12 = vld [vmem:[#allocation2 + $0x2d] sm:$0xff]  ;;  %v5333_v21 = vpack.c.bf16 %v1669_v19, %v1669_v19  ;;  %v1671_v23 = vld [vmem:[#allocation2 + $0x55] sm:$0xff] }
 0x158   : > { %1455 = vrot.lane.b32.xlu1 %v6520_v13, %s6268_s14  ;;  %1367 = vst.msk [vmem:[#allocation6 + $0x2d8] sm:$0x7] %vm772_vm4, %v5285_v59  ;;  %v1853_v5 = vld [vmem:[#allocation2 + $0xbe] sm:$0x3f]  ;;  %v5329_v13 = vpack.c.bf16 %v1665_v3, %v1665_v3  ;;  %v5330_v15 = vpack.c.bf16 %v1666_v12, %v1666_v12  ;;  %v5335_v24 = vpack.c.bf16 %v1671_v23, %v1671_v23  ;;  %v1673_v28 = vld [vmem:[#allocation2 + $0x65] sm:$0xff]  ;;  %v1678_v55 = vld [vmem:[#allocation2 + $0x8d] sm:$0xff] }
 0x159   : > { %1662 = vst.msk [vmem:[#allocation6 + $0x2b8] sm:$0xf] %vm644_vm3, %v5326_v63  ;;  %v1557_v7 = vld [vmem:[#allocation2 + $0xbc] sm:$0x3f]  ;;  %v5369_v9 = vpack.c.bf16 %v1853_v5, %v1853_v5  ;;  %v5337_v30 = vpack.c.bf16 %v1673_v28, %v1673_v28  ;;  %v1677_v47 = vld [vmem:[#allocation2 + $0x85] sm:$0xff]  ;;  %v6019_v56 = vld [vmem:[%s7542_s3 + $0x110] sm:$0xff]   ;;  %v5342_v59 = vpack.c.bf16 %v1678_v55, %v1678_v55 }
 0x15a   : > { %v5327_v10 = vpack.c.bf16 %v1557_v7, %v1557_v7  ;;  %v1676_v44 = vld [vmem:[#allocation2 + $0x7d] sm:$0xff]  ;;  %v6007_v48 = vld [vmem:[%s7542_s3 + $0x108] sm:$0xff]   ;;  %v5341_v53 = vpack.c.bf16 %v1677_v47, %v1677_v47  ;;  %v1679_v60 = vld [vmem:[#allocation2 + $0x95] sm:$0xff] }
 0x15b   : > { %1749 = vrot.lane.b32.xlu0 %v5328_v0, %s6268_s14  ;;  %1959 = vst.msk [vmem:[#allocation6 + $0x2e0] sm:$0x7] %vm772_vm4, %v5369_v9  ;;  %v5340_v46 = vpack.c.bf16 %v1676_v44, %v1676_v44  ;;  %v6031_v61 = vld [vmem:[%s7542_s3 + $0x118] sm:$0xff]   ;;  %v5343_v0 = vpack.c.bf16 %v1679_v60, %v1679_v60  ;;  %v1387_v19 = vld [vmem:[#allocation2 + $0xa8] sm:$0xff]  ;;  %v1388_v23 = vld [vmem:[#allocation2 + $0xb0] sm:$0x3f] }
 0x15c   : > { %1197 = vrot.lane.b32.xlu1 %v5264_v2, %s6268_s14  ;;  %1663 = vst.msk [vmem:[#allocation6 + $0x2dc] sm:$0x7] %vm772_vm4, %v5327_v10  ;;  %v1680_v5 = vld [vmem:[#allocation2 + $0x9d] sm:$0xff]  ;;  %v1681_v10 = vld [vmem:[#allocation2 + $0xa5] sm:$0xff] }
 0x15d   : > { %v5344_v9 = vpack.c.bf16 %v1680_v5, %v1680_v5  ;;  %v5345_v16 = vpack.c.bf16 %v1681_v10, %v1681_v10 }
 0x15f   : > { %1457 = vrot.lane.b32.xlu0 %v6536_v36, %s6268_s14  ;;  %v5332_v36 = vpack.c.bf16 %v1668_v18, %v1668_v18 }
 0x160   : > { %1751 = vrot.lane.b32.xlu1 %v5329_v13, %s6268_s14  ;;  %v1386_v13 = vld [vmem:[#allocation2 + $0xa0] sm:$0xff] }
 0x163   : > { %1753 = vrot.lane.b32.xlu0 %v5330_v15, %s6268_s14  ;;  %v5304_v15 = vpack.c.bf16 %v1386_v13, %v1386_v13 }
 0x164   : > { %1459 = vrot.lane.b32.xlu1 %v6545_v43, %s6268_s14  ;;  %v5334_v43 = vpack.c.bf16 %v1670_v22, %v1670_v22 }
 0x167   : > { %1461 = vrot.lane.b32.xlu0 %v6566_v6, %s6268_s14 }
 0x168   : > { %1755 = vrot.lane.b32.xlu1 %v5331_v17, %s6268_s14 }
 0x16b   : > { %1757 = vrot.lane.b32.xlu0 %v5332_v36, %s6268_s14  ;;  %v1682_v36 = vld [vmem:[#allocation2 + $0xad] sm:$0xff] }
 0x16c   : > { %1463 = vrot.lane.b32.xlu1 %v6572_v14, %s6268_s14  ;;  %v1672_v14 = vld [vmem:[#allocation2 + $0x5d] sm:$0xff]  ;;  %v5346_v22 = vpack.c.bf16 %v1682_v36, %v1682_v36 }
 0x16d   : > { %v5336_v27 = vpack.c.bf16 %v1672_v14, %v1672_v14  ;;  %v6039_v36 = vld [vmem:[#allocation6 + $0x10] ss:$36 sps:$4 sm:$0xff]  }
 0x16f   : > { %1465 = vrot.lane.b32.xlu0 %v6596_v41, %s6268_s14  ;;  %v860_v6 = vpop.permute.xlu0 %859 }
 0x170   : > { %1759 = vrot.lane.b32.xlu1 %v5333_v21, %s6268_s14  ;;  %923 = vst.msk [vmem:[#allocation6] sm:$0xf] %vm922_vm5, %v860_v6  ;;  %v1683_v6 = vld [vmem:[#allocation2 + $0xb5] sm:$0xff] }
 0x173   : > { %1761 = vrot.lane.b32.xlu0 %v5334_v43, %s6268_s14  ;;  %v5305_v43 = vpack.c.bf16 %v1387_v19, %v1387_v19 }
 0x174   : > { %1467 = vrot.lane.b32.xlu1 %v6602_v49, %s6268_s14 }
 0x175   : > { %v1158_v41 = vpop.permute.xlu1 %1157 }
 0x176   : > { %v862_v26 = vpop.permute.xlu0 %861  ;;  %1220 = vst.msk [vmem:[#allocation6 + $0x4] sm:$0xf] %vm922_vm5, %v1158_v41  ;;  %v5306_v41 = vpack.c.bf16 %v1388_v23, %v1388_v23 }
 0x177   : > { %1469 = vrot.lane.b32.xlu0 %v6620_v11, %s6268_s14  ;;  %924 = vst.msk [vmem:[#allocation6 + $0x24] sm:$0xf] %vm922_vm5, %v862_v26  ;;  %v1674_v11 = vld [vmem:[#allocation2 + $0x6d] sm:$0xff]  ;;  %v5347_v26 = vpack.c.bf16 %v1683_v6, %v1683_v6 }
 0x178   : > { %1763 = vrot.lane.b32.xlu1 %v5335_v24, %s6268_s14  ;;  %v5338_v34 = vpack.c.bf16 %v1674_v11, %v1674_v11 }
 0x179   : > { %v1160_v49 = vpop.permute.xlu1 %1159 }
 0x17a   : > { %v864_v29 = vpop.permute.xlu0 %863  ;;  %1221 = vst.msk [vmem:[#allocation6 + $0x28] sm:$0xf] %vm922_vm5, %v1160_v49  ;;  %v1684_v49 = vld [vmem:[#allocation2 + $0xbd] sm:$0x3f] }
 0x17b   : > { %1765 = vrot.lane.b32.xlu0 %v5336_v27, %s6268_s14  ;;  %925 = vst.msk [vmem:[#allocation6 + $0x48] sm:$0xf] %vm922_vm5, %v864_v29  ;;  %v5348_v11 = vpack.c.bf16 %v1684_v49, %v1684_v49 }
 0x17c   : > { %1471 = vrot.lane.b32.xlu1 %v6626_v20, %s6268_s14  ;;  %v1675_v20 = vld [vmem:[#allocation2 + $0x75] sm:$0xff] }
 0x17d   : > { %v5339_v38 = vpack.c.bf16 %v1675_v20, %v1675_v20 }
 0x17e   : > { %v1162_v31 = vpop.permute.xlu0 %1161  ;;  %v866_v33 = vpop.permute.xlu1 %865 }
 0x17f   : > { %1473 = vrot.lane.b32.xlu0 %v6650_v50, %s6268_s14  ;;  %1222 = vst.msk [vmem:[#allocation6 + $0x4c] sm:$0xf] %vm922_vm5, %v1162_v31  ;;  %926 = vst.msk [vmem:[#allocation6 + $0x6c] sm:$0xf] %vm922_vm5, %v866_v33  ;;  %v5993_v50 = vld [vmem:[#allocation6] ss:$36 sps:$4 sm:$0xff]  }
 0x180   : > { %1767 = vrot.lane.b32.xlu1 %v5337_v30, %s6268_s14 }
 0x181   : > { %v5991_v39 = vld [vmem:[#allocation6 + $0x4] ss:$36 sps:$4 sm:$0xff]  }
 0x182   : > { %v1164_v35 = vpop.permute.xlu1 %1163  ;;  %v868_v37 = vpop.permute.xlu0 %867  ;;  %2650 = vmatprep.mubr.bf16.mxu1 %v5991_v39 }
 0x183   : > { %1769 = vrot.lane.b32.xlu0 %v5338_v34, %s6268_s14  ;;  %1223 = vst.msk [vmem:[#allocation6 + $0x70] sm:$0xf] %vm922_vm5, %v1164_v35  ;;  %927 = vst.msk [vmem:[#allocation6 + $0x90] sm:$0xf] %vm922_vm5, %v868_v37  ;;  %2651 = vmatmul.mubr.bf16.vlgmr.msra.gmra.mrb[0].mxu1 %v5993_v50 }
 0x184   : > { %1475 = vrot.lane.b32.xlu1 %v6656_v57, %s6268_s14  ;;  %5830 = vmatpush3.bf16.msra.mxu1 %v5994_v40 }
 0x185   : > { %5831 = vmatprep.subr.bf16.mxu1 %v6266_v1 }
 0x186   : > { %v1166_v57 = vpop.permute.xlu0 %1165  ;;  %v5999_v54 = vld [vmem:[#allocation6 + $0x48] ss:$36 sps:$4 sm:$0xff]  }
 0x187   : > { %1477 = vrot.lane.b32.xlu0 %v6677_v25, %s6268_s14  ;;  %v870_v45 = vpop.permute.xlu1 %869  ;;  %1224 = vst.msk [vmem:[#allocation6 + $0x94] sm:$0xf] %vm922_vm5, %v1166_v57 }
 0x188   : > { %1771 = vrot.lane.b32.xlu1 %v5339_v38, %s6268_s14  ;;  %928 = vst.msk [vmem:[#allocation6 + $0xb4] sm:$0xf] %vm922_vm5, %v870_v45  ;;  %5832 = vmatpush3.bf16.msra.mxu1 %v6007_v48 }
 0x189   : > { %5833 = vmatprep.subr.bf16.mxu1 %v6266_v1 }
 0x18a   : > { %v5997_v4 = vld [vmem:[#allocation6 + $0x4c] ss:$36 sps:$4 sm:$0xff]  }
 0x18b   : > { %1773 = vrot.lane.b32.xlu0 %v5340_v46, %s6268_s14  ;;  %v1168_v25 = vpop.permute.xlu1 %1167  ;;  %v872_v51 = vpop.permute.xlu0 %871  ;;  %2658 = vmatprep.mubr.bf16.mxu1 %v5997_v4 }
 0x18c   : > { %1479 = vrot.lane.b32.xlu1 %v6686_v32, %s6268_s14  ;;  %1225 = vst.msk [vmem:[#allocation6 + $0xb8] sm:$0xf] %vm922_vm5, %v1168_v25  ;;  %929 = vst.msk [vmem:[#allocation6 + $0xd8] sm:$0xf] %vm922_vm5, %v872_v51  ;;  %2659 = vmatmul.mubr.bf16.gmra.mrb[4].mxu1 %v5999_v54 }
 0x18d   : > { %5834 = vmatpush3.bf16.msra.mxu1 %v6019_v56 }
 0x18e   : > { %5835 = vmatprep.subr.bf16.mxu1 %v6266_v1 }
 0x18f   : > { %1481 = vrot.lane.b32.xlu0 %v6704_v62, %s6268_s14  ;;  %v1170_v32 = vpop.permute.xlu0 %1169  ;;  %v6002_v3 = vld [vmem:[#allocation6 + $0x90] ss:$36 sps:$4 sm:$0xff]  }
 0x190   : > { %1775 = vrot.lane.b32.xlu1 %v5341_v53, %s6268_s14  ;;  %v874_v58 = vpop.permute.xlu1 %873  ;;  %1226 = vst.msk [vmem:[#allocation6 + $0xdc] sm:$0xf] %vm922_vm5, %v1170_v32 }
 0x191   : > { %930 = vst.msk [vmem:[#allocation6 + $0xfc] sm:$0xf] %vm922_vm5, %v874_v58  ;;  %5836 = vmatpush3.bf16.msra.mxu1 %v6031_v61 }
 0x193   : > { %1777 = vrot.lane.b32.xlu0 %v5342_v59, %s6268_s14  ;;  %v876_v63 = vpop.permute.xlu0 %875  ;;  %v6000_v2 = vld [vmem:[#allocation6 + $0x94] ss:$36 sps:$4 sm:$0xff]  }
 0x194   : > { %1483 = vrot.lane.b32.xlu1 %v6710_v8, %s6268_s14  ;;  %v1172_v62 = vpop.permute.xlu1 %1171  ;;  %931 = vst.msk [vmem:[#allocation6 + $0x120] sm:$0xf] %vm922_vm5, %v876_v63  ;;  %2666 = vmatprep.mubr.bf16.mxu1 %v6000_v2 }
 0x195   : > { %1227 = vst.msk [vmem:[#allocation6 + $0x100] sm:$0xf] %vm922_vm5, %v1172_v62  ;;  %2667 = vmatmul.mubr.bf16.gmra.mrb[8].mxu1 %v6002_v3 }
 0x197   : > { %1485 = vrot.lane.b32.xlu0 %v6734_v42, %s6268_s14  ;;  %v1174_v8 = vpop.permute.xlu0 %1173 }
 0x198   : > { %1779 = vrot.lane.b32.xlu1 %v5343_v0, %s6268_s14  ;;  %v878_v7 = vpop.permute.xlu1 %877  ;;  %1228 = vst.msk [vmem:[#allocation6 + $0x124] sm:$0xf] %vm922_vm5, %v1174_v8  ;;  %v6008_v18 = vld [vmem:[#allocation6 + $0xd8] ss:$36 sps:$4 sm:$0xff]  }
 0x199   : > { %932 = vst.msk [vmem:[#allocation6 + $0x144] sm:$0xf] %vm922_vm5, %v878_v7 }
 0x19b   : > { %1781 = vrot.lane.b32.xlu0 %v5344_v9, %s6268_s14  ;;  %v880_v42 = vpop.permute.xlu0 %879 }
 0x19c   : > { %1487 = vrot.lane.b32.xlu1 %v6740_v52, %s6268_s14  ;;  %v1176_v12 = vpop.permute.xlu1 %1175  ;;  %v6005_v17 = vld [vmem:[#allocation6 + $0xdc] ss:$36 sps:$4 sm:$0xff]   ;;  %933 = vst.msk [vmem:[#allocation6 + $0x168] sm:$0xf] %vm922_vm5, %v880_v42 }
 0x19d   : > { %1229 = vst.msk [vmem:[#allocation6 + $0x148] sm:$0xf] %vm922_vm5, %v1176_v12  ;;  %2674 = vmatprep.mubr.bf16.mxu1 %v6005_v17 }
 0x19e   : > { %2675 = vmatmul.mubr.bf16.gmra.mrb[12].mxu1 %v6008_v18 }
 0x19f   : > { %1489 = vrot.lane.b32.xlu0 %v5304_v15, %s6268_s14  ;;  %v1178_v21 = vpop.permute.xlu0 %1177 }
 0x1a0   : > { %1783 = vrot.lane.b32.xlu1 %v5345_v16, %s6268_s14  ;;  %v882_v52 = vpop.permute.xlu1 %881  ;;  %1230 = vst.msk [vmem:[#allocation6 + $0x16c] sm:$0xf] %vm922_vm5, %v1178_v21  ;;  %v6012_v28 = vld [vmem:[#allocation6 + $0x120] ss:$36 sps:$4 sm:$0xff]  }
 0x1a1   : > { %934 = vst.msk [vmem:[#allocation6 + $0x18c] sm:$0xf] %vm922_vm5, %v882_v52 }
 0x1a3   : > { %1785 = vrot.lane.b32.xlu0 %v5346_v22, %s6268_s14 }
 0x1a4   : > { %1491 = vrot.lane.b32.xlu1 %v5305_v43, %s6268_s14  ;;  %v1180_v24 = vpop.permute.xlu1 %1179  ;;  %v884_v14 = vpop.permute.xlu0 %883  ;;  %v6009_v27 = vld [vmem:[#allocation6 + $0x124] ss:$36 sps:$4 sm:$0xff]  }
 0x1a5   : > { %1231 = vst.msk [vmem:[#allocation6 + $0x190] sm:$0xf] %vm922_vm5, %v1180_v24  ;;  %935 = vst.msk [vmem:[#allocation6 + $0x1b0] sm:$0xf] %vm922_vm5, %v884_v14  ;;  %2682 = vmatprep.mubr.bf16.mxu1 %v6009_v27  ;;  %v6042_v14 = vld [vmem:[#allocation6 + $0x58] ss:$36 sps:$4 sm:$0xff]  }
 0x1a6   : > { %2683 = vmatmul.mubr.bf16.gmra.mrb[16].mxu1 %v6012_v28 }
 0x1a7   : > { %1493 = vrot.lane.b32.xlu0 %v5306_v41, %s6268_s14 }
 0x1a8   : > { %1787 = vrot.lane.b32.xlu1 %v5347_v26, %s6268_s14  ;;  %v1182_v29 = vpop.permute.xlu0 %1181  ;;  %v6016_v20 = vld [vmem:[#allocation6 + $0x168] ss:$36 sps:$4 sm:$0xff]  }
 0x1a9   : > { %v886_v30 = vpop.permute.xlu1 %885  ;;  %1232 = vst.msk [vmem:[#allocation6 + $0x1b4] sm:$0xf] %vm922_vm5, %v1182_v29 }
 0x1aa   : > { %936 = vst.msk [vmem:[#allocation6 + $0x1d4] sm:$0xf] %vm922_vm5, %v886_v30 }
 0x1ac   : > { %1789 = vrot.lane.b32.xlu1 %v5348_v11, %s6268_s14  ;;  %v888_v33 = vpop.permute.xlu0 %887  ;;  %v6014_v34 = vld [vmem:[#allocation6 + $0x16c] ss:$36 sps:$4 sm:$0xff]  }
 0x1ad   : > { %v1184_v31 = vpop.permute.xlu1 %1183  ;;  %937 = vst.msk [vmem:[#allocation6 + $0x1f8] sm:$0xf] %vm922_vm5, %v888_v33  ;;  %2690 = vmatprep.mubr.bf16.mxu1 %v6014_v34 }
 0x1ae   : > { %1233 = vst.msk [vmem:[#allocation6 + $0x1d8] sm:$0xf] %vm922_vm5, %v1184_v31  ;;  %2691 = vmatmul.mubr.bf16.gmra.mrb[20].mxu1 %v6016_v20  ;;  %v6045_v31 = vld [vmem:[#allocation6 + $0xa0] ss:$36 sps:$4 sm:$0xff]  }
 0x1b0   : > { %v1186_v35 = vpop.permute.xlu0 %1185 }
 0x1b1   : > { %v890_v37 = vpop.permute.xlu1 %889  ;;  %1234 = vst.msk [vmem:[#allocation6 + $0x1fc] sm:$0xf] %vm922_vm5, %v1186_v35  ;;  %v6022_v40 = vld [vmem:[#allocation6 + $0x1b0] ss:$36 sps:$4 sm:$0xff]  }
 0x1b2   : > { %938 = vst.msk [vmem:[#allocation6 + $0x21c] sm:$0xf] %vm922_vm5, %v890_v37 }
 0x1b4   : > { %v892_v39 = vpop.permute.xlu0 %891 }
 0x1b5   : > { %v1188_v38 = vpop.permute.xlu1 %1187  ;;  %v6020_v50 = vld [vmem:[#allocation6 + $0x1b4] ss:$36 sps:$4 sm:$0xff]   ;;  %939 = vst.msk [vmem:[#allocation6 + $0x240] sm:$0xf] %vm922_vm5, %v892_v39 }
 0x1b6   : > { %1235 = vst.msk [vmem:[#allocation6 + $0x220] sm:$0xf] %vm922_vm5, %v1188_v38  ;;  %2698 = vmatprep.mubr.bf16.mxu1 %v6020_v50 }
 0x1b7   : > { %2699 = vmatmul.mubr.bf16.gmra.mrb[24].mxu1 %v6022_v40  ;;  %v6048_v40 = vld [vmem:[#allocation6 + $0xe8] ss:$36 sps:$4 sm:$0xff]  }
 0x1b8   : > { %v1190_v44 = vpop.permute.xlu0 %1189 }
 0x1b9   : > { %v894_v57 = vpop.permute.xlu1 %893  ;;  %1236 = vst.msk [vmem:[#allocation6 + $0x244] sm:$0xf] %vm922_vm5, %v1190_v44  ;;  %v6025_v48 = vld [vmem:[#allocation6 + $0x1f8] ss:$36 sps:$4 sm:$0xff]  }
 0x1ba   : > { %940 = vst.msk [vmem:[#allocation6 + $0x264] sm:$0xf] %vm922_vm5, %v894_v57 }
 0x1bd   : > { %v1192_v45 = vpop.permute.xlu1 %1191  ;;  %v896_v46 = vpop.permute.xlu0 %895  ;;  %v6023_v47 = vld [vmem:[#allocation6 + $0x1fc] ss:$36 sps:$4 sm:$0xff]  }
 0x1be   : > { %1237 = vst.msk [vmem:[#allocation6 + $0x268] sm:$0xf] %vm922_vm5, %v1192_v45  ;;  %941 = vst.msk [vmem:[#allocation6 + $0x288] sm:$0xf] %vm922_vm5, %v896_v46  ;;  %2706 = vmatprep.mubr.bf16.mxu1 %v6023_v47 }
 0x1bf   : > { %2707 = vmatmul.mubr.bf16.gmra.mrb[28].mxu1 %v6025_v48 }
 0x1c1   : > { %v1194_v25 = vpop.permute.xlu0 %1193  ;;  %v6030_v55 = vld [vmem:[#allocation6 + $0x240] ss:$36 sps:$4 sm:$0xff]  }
 0x1c2   : > { %v898_v51 = vpop.permute.xlu1 %897  ;;  %1238 = vst.msk [vmem:[#allocation6 + $0x28c] sm:$0xf] %vm922_vm5, %v1194_v25 }
 0x1c3   : > { %942 = vst.msk [vmem:[#allocation6 + $0x2ac] sm:$0xf] %vm922_vm5, %v898_v51 }
 0x1c5   : > { %v1454_v53 = vpop.permute.xlu0 %1453  ;;  %v6028_v54 = vld [vmem:[#allocation6 + $0x244] ss:$36 sps:$4 sm:$0xff]  }
 0x1c6   : > { %v1196_v4 = vpop.permute.xlu1 %1195  ;;  %1516 = vst.msk [vmem:[#allocation6 + $0x8] sm:$0xf] %vm922_vm5, %v1454_v53  ;;  %2714 = vmatprep.mubr.bf16.mxu1 %v6028_v54  ;;  %v6051_v53 = vld [vmem:[#allocation6 + $0x130] ss:$36 sps:$4 sm:$0xff]  }
 0x1c7   : > { %1239 = vst.msk [vmem:[#allocation6 + $0x2b0] sm:$0xf] %vm922_vm5, %v1196_v4  ;;  %2715 = vmatmul.mubr.bf16.gmra.mrb[32].mxu1 %v6030_v55 }
 0x1c9   : > { %v900_v56 = vpop.permute.xlu0 %899  ;;  %v2014_v60 = vld [vmem:[#allocation6 + $0x288] sm:$0xff] }
 0x1ca   : > { %v1456_v32 = vpop.permute.xlu1 %1455  ;;  %944 = vst.msk [vmem:[#allocation6 + $0x2d0] sm:$0x7] %vm943_vm6, %v900_v56 }
 0x1cb   : > { %1517 = vst.msk [vmem:[#allocation6 + $0x2c] sm:$0xf] %vm922_vm5, %v1456_v32 }
 0x1cd   : > { %v1750_v58 = vpop.permute.xlu0 %1749 }
 0x1ce   : > { %v1198_v59 = vpop.permute.xlu1 %1197  ;;  %v2017_v61 = vld [vmem:[#allocation6 + $0x2ac] sm:$0xff]  ;;  %1812 = vst.msk [vmem:[#allocation6 + $0xc] sm:$0xf] %vm922_vm5, %v1750_v58 }
 0x1cf   : > { %v6033_v62 = vld [vmem:[#allocation6 + $0x28c] ss:$36 sps:$4 sm:$0xff]   ;;  %1240 = vst.msk [vmem:[#allocation6 + $0x2d4] sm:$0x7] %vm943_vm6, %v1198_v59  ;;  %v4962_v63 = vcombine.low %v2014_v60, %v2017_v61  ;;  %v6054_v61 = vld [vmem:[#allocation6 + $0x178] ss:$36 sps:$4 sm:$0xff]  }
 0x1d0   : > { %2722 = vmatprep.mubr.bf16.mxu1 %v6033_v62 }
 0x1d1   : > { %v1458_v0 = vpop.permute.xlu0 %1457  ;;  %2723 = vmatmul.mubr.bf16.gmra.mrb[36].mxu1 %v4962_v63 }
 0x1d2   : > { %v1752_v2 = vpop.permute.xlu1 %1751  ;;  %1518 = vst.msk [vmem:[#allocation6 + $0x50] sm:$0xf] %vm922_vm5, %v1458_v0 }
 0x1d3   : > { %1813 = vst.msk [vmem:[#allocation6 + $0x30] sm:$0xf] %vm922_vm5, %v1752_v2 }
 0x1d5   : > { %v1754_v3 = vpop.permute.xlu0 %1753  ;;  %v1961_v12 = vld [vmem:[#allocation6 + $0x8] sm:$0xff] }
 0x1d6   : > { %v1460_v5 = vpop.permute.xlu1 %1459  ;;  %v2020_v8 = vld [vmem:[#allocation6 + $0x2d0] sm:$0x77]  ;;  %1814 = vst.msk [vmem:[#allocation6 + $0x54] sm:$0xf] %vm922_vm5, %v1754_v3 }
 0x1d7   : > { %1519 = vst.msk [vmem:[#allocation6 + $0x74] sm:$0xf] %vm922_vm5, %v1460_v5  ;;  %v4968_v7 = vcombine.high %v2020_v8, %v2020_v8  ;;  %v4967_v9 = vcombine.low %v2020_v8, %v2020_v8 }
 0x1d9   : > { %2730 = vmatprep.mubr.bf16.mxu1 %v4968_v7  ;;  %v1462_v13 = vpop.permute.xlu0 %1461 }
 0x1da   : > { %2731 = vmatmul.mubr.bf16.gmra.mrb[40].mxu1 %v4967_v9  ;;  %v1756_v10 = vpop.permute.xlu1 %1755  ;;  %v1964_v42 = vld [vmem:[#allocation6 + $0x2c] sm:$0xff]  ;;  %1520 = vst.msk [vmem:[#allocation6 + $0x98] sm:$0xf] %vm922_vm5, %v1462_v13  ;;  %v6057_v9 = vld [vmem:[#allocation6 + $0x1c0] ss:$36 sps:$4 sm:$0xff]  }
 0x1db   : > { %v6037_v15 = vld [vmem:[#allocation6 + $0xc] ss:$36 sps:$4 sm:$0xff]   ;;  %1815 = vst.msk [vmem:[#allocation6 + $0x78] sm:$0xf] %vm922_vm5, %v1756_v10  ;;  %v4919_v16 = vcombine.low %v1961_v12, %v1964_v42  ;;  %5837 = vmatprep.mubr.msk.bf16.mxu1 %vm6267_vm0, %v6266_v1 }
 0x1dc   : > { %2770 = vmatprep.mubr.bf16.mxu0 %v6037_v15 }
 0x1dd   : > { %2771 = vmatmul.mubr.bf16.vlgmr.msra.gmra.mrb[52].mxu0 %v4919_v16  ;;  %v1758_v17 = vpop.permute.xlu0 %1757  ;;  %v1967_v52 = vld [vmem:[#allocation6 + $0x50] sm:$0xff] }
 0x1de   : > { %v1464_v18 = vpop.permute.xlu1 %1463  ;;  %1816 = vst.msk [vmem:[#allocation6 + $0x9c] sm:$0xf] %vm922_vm5, %v1758_v17 }
 0x1df   : > { %1521 = vst.msk [vmem:[#allocation6 + $0xbc] sm:$0xf] %vm922_vm5, %v1464_v18 }
 0x1e1   : > { %v1466_v19 = vpop.permute.xlu0 %1465 }
 0x1e2   : > { %5838 = vmatmul.mubr.msk.bf16.vlgmr.msra.gmra.mrb[44].mxu1 %vm619_vm2, %v6039_v36  ;;  %v1760_v21 = vpop.permute.xlu1 %1759  ;;  %v1970_v22 = vld [vmem:[#allocation6 + $0x74] sm:$0xff]  ;;  %1522 = vst.msk [vmem:[#allocation6 + $0xe0] sm:$0xf] %vm922_vm5, %v1466_v19  ;;  %v6060_v36 = vld [vmem:[#allocation6 + $0x208] ss:$36 sps:$4 sm:$0xff]  }
 0x1e3   : > { %v6040_v43 = vld [vmem:[#allocation6 + $0x54] ss:$36 sps:$4 sm:$0xff]   ;;  %1817 = vst.msk [vmem:[#allocation6 + $0xc0] sm:$0xf] %vm922_vm5, %v1760_v21  ;;  %v4924_v23 = vcombine.low %v1967_v52, %v1970_v22  ;;  %5841 = vmatprep.mubr.msk.bf16.mxu1 %vm6267_vm0, %v6266_v1 }
 0x1e4   : > { %2778 = vmatprep.mubr.bf16.mxu0 %v6040_v43 }
 0x1e5   : > { %2779 = vmatmul.mubr.bf16.gmra.mrb[56].mxu0 %v4924_v23  ;;  %v1762_v6 = vpop.permute.xlu0 %1761  ;;  %v1973_v27 = vld [vmem:[#allocation6 + $0x98] sm:$0xff]  ;;  %v6064_v23 = vld [vmem:[#allocation6 + $0x250] ss:$36 sps:$4 sm:$0xff]  }
 0x1e6   : > { %v1468_v24 = vpop.permute.xlu1 %1467  ;;  %1818 = vst.msk [vmem:[#allocation6 + $0xe4] sm:$0xf] %vm922_vm5, %v1762_v6 }
 0x1e7   : > { %1523 = vst.msk [vmem:[#allocation6 + $0x104] sm:$0xf] %vm922_vm5, %v1468_v24 }
 0x1e9   : > { %v1470_v41 = vpop.permute.xlu0 %1469 }
 0x1ea   : > { %5842 = vmatmul.mubr.msk.bf16.gmra.mrb[48].mxu1 %vm619_vm2, %v6042_v14  ;;  %v1764_v26 = vpop.permute.xlu1 %1763  ;;  %v1976_v28 = vld [vmem:[#allocation6 + $0xbc] sm:$0xff]  ;;  %1524 = vst.msk [vmem:[#allocation6 + $0x128] sm:$0xf] %vm922_vm5, %v1470_v41 }
 0x1eb   : > { %v6043_v49 = vld [vmem:[#allocation6 + $0x9c] ss:$36 sps:$4 sm:$0xff]   ;;  %1819 = vst.msk [vmem:[#allocation6 + $0x108] sm:$0xf] %vm922_vm5, %v1764_v26  ;;  %v4929_v29 = vcombine.low %v1973_v27, %v1976_v28  ;;  %5845 = vmatprep.mubr.msk.bf16.mxu1 %vm6267_vm0, %v6266_v1 }
 0x1ec   : > { %2786 = vmatprep.mubr.bf16.mxu0 %v6043_v49  ;;  %v6069_v26 = vld [vmem:[#allocation6 + $0x298] ss:$36 sps:$4 sm:$0xff]   ;;  %v6071_v28 = vld [vmem:[#allocation6 + $0x2e0] ss:$0 sps:$4 sm:$0x77]  }
 0x1ed   : > { %2787 = vmatmul.mubr.bf16.gmra.mrb[60].mxu0 %v4929_v29  ;;  %v1766_v30 = vpop.permute.xlu0 %1765  ;;  %v1979_v20 = vld [vmem:[#allocation6 + $0xe0] sm:$0xff] }
 0x1ee   : > { %v1472_v11 = vpop.permute.xlu1 %1471  ;;  %1820 = vst.msk [vmem:[#allocation6 + $0x12c] sm:$0xf] %vm922_vm5, %v1766_v30 }
 0x1ef   : > { %1525 = vst.msk [vmem:[#allocation6 + $0x14c] sm:$0xf] %vm922_vm5, %v1472_v11 }
 0x1f1   : > { %v1474_v33 = vpop.permute.xlu0 %1473 }
 0x1f2   : > { %5846 = vmatmul.mubr.msk.bf16.gmra.mrb[52].mxu1 %vm619_vm2, %v6045_v31  ;;  %v1768_v34 = vpop.permute.xlu1 %1767  ;;  %v1982_v35 = vld [vmem:[#allocation6 + $0x104] sm:$0xff]  ;;  %1526 = vst.msk [vmem:[#allocation6 + $0x170] sm:$0xf] %vm922_vm5, %v1474_v33 }
 0x1f3   : > { %v6046_v37 = vld [vmem:[#allocation6 + $0xe4] ss:$36 sps:$4 sm:$0xff]   ;;  %1821 = vst.msk [vmem:[#allocation6 + $0x150] sm:$0xf] %vm922_vm5, %v1768_v34  ;;  %v4934_v38 = vcombine.low %v1979_v20, %v1982_v35  ;;  %5849 = vmatprep.mubr.msk.bf16.mxu1 %vm6267_vm0, %v6266_v1 }
 0x1f4   : > { %2794 = vmatprep.mubr.bf16.mxu0 %v6046_v37 }
 0x1f5   : > { %2795 = vmatmul.mubr.bf16.gmra.mrb[64].mxu0 %v4934_v38  ;;  %v1770_v39 = vpop.permute.xlu0 %1769  ;;  %v1985_v45 = vld [vmem:[#allocation6 + $0x128] sm:$0xff] }
 0x1f6   : > { %v1476_v50 = vpop.permute.xlu1 %1475  ;;  %1822 = vst.msk [vmem:[#allocation6 + $0x174] sm:$0xf] %vm922_vm5, %v1770_v39 }
 0x1f7   : > { %1527 = vst.msk [vmem:[#allocation6 + $0x194] sm:$0xf] %vm922_vm5, %v1476_v50 }
 0x1f9   : > { %v1478_v44 = vpop.permute.xlu0 %1477 }
 0x1fa   : > { %5850 = vmatmul.mubr.msk.bf16.gmra.mrb[56].mxu1 %vm619_vm2, %v6048_v40  ;;  %v1772_v57 = vpop.permute.xlu1 %1771  ;;  %v1988_v46 = vld [vmem:[#allocation6 + $0x14c] sm:$0xff]  ;;  %1528 = vst.msk [vmem:[#allocation6 + $0x1b8] sm:$0xf] %vm922_vm5, %v1478_v44 }
 0x1fb   : > { %v6049_v47 = vld [vmem:[#allocation6 + $0x12c] ss:$36 sps:$4 sm:$0xff]   ;;  %1823 = vst.msk [vmem:[#allocation6 + $0x198] sm:$0xf] %vm922_vm5, %v1772_v57  ;;  %v4939_v48 = vcombine.low %v1985_v45, %v1988_v46  ;;  %5853 = vmatprep.mubr.msk.bf16.mxu1 %vm6267_vm0, %v6266_v1 }
 0x1fc   : > { %2802 = vmatprep.mubr.bf16.mxu0 %v6049_v47 }
 0x1fd   : > { %2803 = vmatmul.mubr.bf16.gmra.mrb[68].mxu0 %v4939_v48  ;;  %v1774_v25 = vpop.permute.xlu0 %1773  ;;  %v1991_v55 = vld [vmem:[#allocation6 + $0x170] sm:$0xff] }
 0x1fe   : > { %v1480_v51 = vpop.permute.xlu1 %1479  ;;  %1824 = vst.msk [vmem:[#allocation6 + $0x1bc] sm:$0xf] %vm922_vm5, %v1774_v25 }
 0x1ff   : > { %1529 = vst.msk [vmem:[#allocation6 + $0x1dc] sm:$0xf] %vm922_vm5, %v1480_v51 }
 0x201   : > { %v1482_v4 = vpop.permute.xlu0 %1481 }
 0x202   : > { %5854 = vmatmul.mubr.msk.bf16.gmra.mrb[60].mxu1 %vm619_vm2, %v6051_v53  ;;  %v1776_v54 = vpop.permute.xlu1 %1775  ;;  %v1994_v56 = vld [vmem:[#allocation6 + $0x194] sm:$0xff]  ;;  %1530 = vst.msk [vmem:[#allocation6 + $0x200] sm:$0xf] %vm922_vm5, %v1482_v4 }
 0x203   : > { %v6052_v32 = vld [vmem:[#allocation6 + $0x174] ss:$36 sps:$4 sm:$0xff]   ;;  %1825 = vst.msk [vmem:[#allocation6 + $0x1e0] sm:$0xf] %vm922_vm5, %v1776_v54  ;;  %v4944_v58 = vcombine.low %v1991_v55, %v1994_v56  ;;  %5857 = vmatprep.mubr.msk.bf16.mxu1 %vm6267_vm0, %v6266_v1 }
 0x204   : > { %2810 = vmatprep.mubr.bf16.mxu0 %v6052_v32 }
 0x205   : > { %2811 = vmatmul.mubr.bf16.gmra.mrb[72].mxu0 %v4944_v58  ;;  %v1778_v59 = vpop.permute.xlu0 %1777  ;;  %v1997_v0 = vld [vmem:[#allocation6 + $0x1b8] sm:$0xff] }
 0x206   : > { %v1484_v60 = vpop.permute.xlu1 %1483  ;;  %1826 = vst.msk [vmem:[#allocation6 + $0x204] sm:$0xf] %vm922_vm5, %v1778_v59 }
 0x207   : > { %1531 = vst.msk [vmem:[#allocation6 + $0x224] sm:$0xf] %vm922_vm5, %v1484_v60 }
 0x209   : > { %v1486_v62 = vpop.permute.xlu0 %1485 }
 0x20a   : > { %5858 = vmatmul.mubr.msk.bf16.gmra.mrb[64].mxu1 %vm619_vm2, %v6054_v61  ;;  %v1780_v63 = vpop.permute.xlu1 %1779  ;;  %v2000_v2 = vld [vmem:[#allocation6 + $0x1dc] sm:$0xff]  ;;  %1532 = vst.msk [vmem:[#allocation6 + $0x248] sm:$0xf] %vm922_vm5, %v1486_v62 }
 0x20b   : > { %v6055_v3 = vld [vmem:[#allocation6 + $0x1bc] ss:$36 sps:$4 sm:$0xff]   ;;  %1827 = vst.msk [vmem:[#allocation6 + $0x228] sm:$0xf] %vm922_vm5, %v1780_v63  ;;  %v4949_v5 = vcombine.low %v1997_v0, %v2000_v2  ;;  %5861 = vmatprep.mubr.msk.bf16.mxu1 %vm6267_vm0, %v6266_v1 }
 0x20c   : > { %2818 = vmatprep.mubr.bf16.mxu0 %v6055_v3 }
 0x20d   : > { %2819 = vmatmul.mubr.bf16.gmra.mrb[76].mxu0 %v4949_v5  ;;  %v1782_v8 = vpop.permute.xlu0 %1781  ;;  %v2003_v12 = vld [vmem:[#allocation6 + $0x200] sm:$0xff] }
 0x20e   : > { %v1488_v7 = vpop.permute.xlu1 %1487  ;;  %1828 = vst.msk [vmem:[#allocation6 + $0x24c] sm:$0xf] %vm922_vm5, %v1782_v8 }
 0x20f   : > { %1533 = vst.msk [vmem:[#allocation6 + $0x26c] sm:$0xf] %vm922_vm5, %v1488_v7 }
 0x211   : > { %v1490_v13 = vpop.permute.xlu0 %1489 }
 0x212   : > { %5862 = vmatmul.mubr.msk.bf16.gmra.mrb[68].mxu1 %vm619_vm2, %v6057_v9  ;;  %v1784_v10 = vpop.permute.xlu1 %1783  ;;  %v2006_v42 = vld [vmem:[#allocation6 + $0x224] sm:$0xff]  ;;  %1534 = vst.msk [vmem:[#allocation6 + $0x290] sm:$0xf] %vm922_vm5, %v1490_v13 }
 0x213   : > { %v6058_v15 = vld [vmem:[#allocation6 + $0x204] ss:$36 sps:$4 sm:$0xff]   ;;  %1829 = vst.msk [vmem:[#allocation6 + $0x270] sm:$0xf] %vm922_vm5, %v1784_v10  ;;  %v4954_v16 = vcombine.low %v2003_v12, %v2006_v42  ;;  %5865 = vmatprep.mubr.msk.bf16.mxu1 %vm6267_vm0, %v6266_v1 }
 0x214   : > { %2826 = vmatprep.mubr.bf16.mxu0 %v6058_v15 }
 0x215   : > { %2827 = vmatmul.mubr.bf16.gmra.mrb[80].mxu0 %v4954_v16  ;;  %v1786_v17 = vpop.permute.xlu0 %1785 }
 0x216   : > { %v1492_v18 = vpop.permute.xlu1 %1491  ;;  %1830 = vst.msk [vmem:[#allocation6 + $0x294] sm:$0xf] %vm922_vm5, %v1786_v17  ;;  %v6063_v22 = vld [vmem:[#allocation6 + $0x248] ss:$36 sps:$4 sm:$0xff]  }
 0x217   : > { %1535 = vst.msk [vmem:[#allocation6 + $0x2b4] sm:$0xf] %vm922_vm5, %v1492_v18 }
 0x219   : > { %v1494_v19 = vpop.permute.xlu0 %1493 }
 0x21a   : > { %5866 = vmatmul.mubr.msk.bf16.gmra.mrb[72].mxu1 %vm619_vm2, %v6060_v36  ;;  %v1788_v21 = vpop.permute.xlu1 %1787  ;;  %v6061_v52 = vld [vmem:[#allocation6 + $0x24c] ss:$36 sps:$4 sm:$0xff]   ;;  %1536 = vst.msk [vmem:[#allocation6 + $0x2d8] sm:$0x7] %vm943_vm6, %v1494_v19 }
 0x21b   : > { %1831 = vst.msk [vmem:[#allocation6 + $0x2b8] sm:$0xf] %vm922_vm5, %v1788_v21  ;;  %5869 = vmatprep.mubr.msk.bf16.mxu1 %vm6267_vm0, %v6266_v1  ;;  %2834 = vmatprep.mubr.bf16.mxu0 %v6061_v52  ;;  %v6072_v19 = vld [vmem:[%s7544_s5 + $0x40] sm:$0xff]   ;;  %v6074_v52 = vld [vmem:[%s7544_s5 + $0x48] sm:$0xff]  }
 0x21c   : > { %v6073_v21 = vld [vmem:[%s7544_s5] sm:$0xff]   ;;  %5614 = vmatprep.subr.bf16.mxu0 %v6072_v19 }
 0x21d   : > { %2835 = vmatmul.mubr.bf16.gmra.mrb[84].mxu0 %v6063_v22 }
 0x21e   : > { %v1790_v43 = vpop.permute.xlu1 %1789  ;;  %v6067_v24 = vld [vmem:[#allocation6 + $0x290] ss:$36 sps:$4 sm:$0xff]   ;;  %5615 = vmatpush3.bf16.msra.mxu0 %v6073_v21 }
 0x21f   : > { %1832 = vst.msk [vmem:[#allocation6 + $0x2dc] sm:$0x7] %vm943_vm6, %v1790_v43  ;;  %5616 = vmatprep.subr.bf16.mxu0 %v6074_v52 }
 0x222   : > { %5870 = vmatmul.mubr.msk.bf16.gmra.mrb[76].mxu1 %vm619_vm2, %v6064_v23  ;;  %v6065_v6 = vld [vmem:[#allocation6 + $0x294] ss:$36 sps:$4 sm:$0xff]  }
 0x223   : > { %5873 = vmatprep.mubr.msk.bf16.mxu1 %vm6267_vm0, %v6266_v1  ;;  %2842 = vmatprep.mubr.bf16.mxu0 %v6065_v6  ;;  %v6076_v23 = vld [vmem:[%s7544_s5 + $0xc0] sm:$0xff]  }
 0x224   : > { %v6077_v6 = vld [vmem:[%s7544_s5 + $0x80] sm:$0xff]   ;;  %5642 = vmatprep.subr.bf16.mxu1 %v6076_v23 }
 0x225   : > { %2843 = vmatmul.mubr.bf16.gmra.mrb[88].mxu0 %v6067_v24  ;;  %5643 = vmatpush3.bf16.msra.mxu1 %v6077_v6 }
 0x226   : > { %v2021_v14 = vld [vmem:[#allocation6 + $0x2d8] sm:$0x77] }
 0x227   : > { %v4970_v41 = vcombine.high %v2021_v14, %v2021_v14  ;;  %v4969_v27 = vcombine.low %v2021_v14, %v2021_v14  ;;  %v6080_v14 = vld [vmem:[%s7544_s5 + $0xc8] sm:$0xff]  }
 0x228   : > { %5644 = vmatprep.subr.bf16.mxu1 %v6080_v14 }
 0x229   : > { %2850 = vmatprep.mubr.bf16.mxu0 %v4970_v41 }
 0x22a   : > { %5874 = vmatmul.mubr.msk.bf16.gmra.mrb[80].mxu1 %vm619_vm2, %v6069_v26  ;;  %v6075_v26 = vld [vmem:[%s7544_s5 + $0x8] sm:$0xff]  }
 0x22b   : > { %5877 = vmatprep.mubr.msk.bf16.mxu1 %vm6267_vm0, %v6266_v1  ;;  %5617 = vmatpush3.bf16.msra.mxu0 %v6075_v26 }
 0x22d   : > { %2851 = vmatmul.mubr.bf16.gmra.mrb[92].mxu0 %v4969_v27  ;;  %v6078_v27 = vld [vmem:[%s7544_s5 + $0x50] sm:$0xff]  }
 0x22e   : > { %5618 = vmatprep.subr.bf16.mxu0 %v6078_v27 }
 0x232   : > { %5878 = vmatmul.mubr.msk.bf16.gmra.mrb[84].mxu1 %vm619_vm2, %v6071_v28  ;;  %v6081_v28 = vld [vmem:[%s7544_s5 + $0x88] sm:$0xff]  }
 0x233   : > { %5645 = vmatpush3.bf16.msra.mxu1 %v6081_v28 }
 0x256   : > { %v5451_v49 = vpop.f32.mrb[0].mxu1 }
 0x257   : > { %v5452_v29 = vpop.f32.mrb[1].mxu1 }
 0x258   : > { %v6982_v30 = vadd.f32 %v5452_v29, %v5451_v49  ;;  %v5454_v11 = vpop.f32.mrb[2].mxu1  ;;  %v6084_v49 = vld [vmem:[%s7544_s5 + $0xd0] sm:$0xff]  }
 0x259   : > { %v5455_v31 = vpop.f32.mrb[3].mxu1  ;;  %5646 = vmatprep.subr.bf16.mxu1 %v6084_v49 }
 0x25a   : > { %v6984_v33 = vadd.f32 %v5455_v31, %v5454_v11  ;;  %v6079_v11 = vld [vmem:[%s7544_s5 + $0x10] sm:$0xff]  }
 0x25b   : > { %5619 = vmatpush3.bf16.msra.mxu0 %v6079_v11 }
 0x25f   : > { %v5457_v34 = vpop.f32.mrb[4].mxu1 }
 0x260   : > { %v5458_v20 = vpop.f32.mrb[5].mxu1 }
 0x261   : > { %v6986_v35 = vadd.f32 %v5458_v20, %v5457_v34  ;;  %v5460_v37 = vpop.f32.mrb[6].mxu1  ;;  %v6082_v34 = vld [vmem:[%s7544_s5 + $0x58] sm:$0xff]   ;;  %v6085_v20 = vld [vmem:[%s7544_s5 + $0x90] sm:$0xff]  }
 0x262   : > { %v5461_v38 = vpop.f32.mrb[7].mxu1  ;;  %5620 = vmatprep.subr.bf16.mxu0 %v6082_v34  ;;  %5647 = vmatpush3.bf16.msra.mxu1 %v6085_v20 }
 0x263   : > { %v6988_v39 = vadd.f32 %v5461_v38, %v5460_v37 }
 0x268   : > { %v5463_v50 = vpop.f32.mrb[8].mxu1 }
 0x269   : > { %v5464_v40 = vpop.f32.mrb[9].mxu1 }
 0x26a   : > { %v6990_v44 = vadd.f32 %v5464_v40, %v5463_v50  ;;  %v5466_v57 = vpop.f32.mrb[10].mxu1 }
 0x26b   : > { %v5467_v45 = vpop.f32.mrb[11].mxu1 }
 0x26c   : > { %v6992_v46 = vadd.f32 %v5467_v45, %v5466_v57  ;;  %v6083_v57 = vld [vmem:[%s7544_s5 + $0x18] sm:$0xff]  }
 0x26d   : > { %5621 = vmatpush3.bf16.msra.mxu0 %v6083_v57 }
 0x271   : > { %v5469_v47 = vpop.f32.mrb[12].mxu1 }
 0x272   : > { %v5470_v48 = vpop.f32.mrb[13].mxu1 }
 0x273   : > { %v6994_v25 = vadd.f32 %v5470_v48, %v5469_v47  ;;  %v5472_v51 = vpop.f32.mrb[14].mxu1  ;;  %v7067_v48 = vld [vmem:[%s7543_s4] ss:$0 sm:$0xff] }
 0x274   : > { %v5473_v53 = vpop.f32.mrb[15].mxu1 }
 0x275   : > { %v6996_v4 = vadd.f32 %v5473_v53, %v5472_v51 }
 0x279   : > { %v5475_v54 = vpop.f32.mrb[16].mxu1 }
 0x27a   : > { %v5476_v55 = vpop.f32.mrb[17].mxu1 }
 0x27b   : > { %v6998_v56 = vadd.f32 %v5476_v55, %v5475_v54  ;;  %v5478_v32 = vpop.f32.mrb[18].mxu1 }
 0x27c   : > { %v5479_v58 = vpop.f32.mrb[19].mxu1 }
 0x27d   : > { %v7000_v59 = vadd.f32 %v5479_v58, %v5478_v32  ;;  %v2653_v58 = vadd.f32 %v6982_v30, %v7067_v48  ;;  %v2661_v30 = vadd.f32 %v6986_v35, %v7067_v48 }
 0x281   : > { %v5481_v60 = vpop.f32.mrb[20].mxu1 }
 0x282   : > { %v5482_v61 = vpop.f32.mrb[21].mxu1 }
 0x283   : > { %v7002_v62 = vadd.f32 %v5482_v61, %v5481_v60  ;;  %v5484_v63 = vpop.f32.mrb[22].mxu1 }
 0x284   : > { %v5485_v0 = vpop.f32.mrb[23].mxu1 }
 0x285   : > { %v7004_v2 = vadd.f32 %v5485_v0, %v5484_v63  ;;  %v2656_v0 = vadd.f32 %v6984_v33, %v7067_v48 }
 0x28a   : > { %v5487_v3 = vpop.f32.mrb[24].mxu1 }
 0x28b   : > { %v5488_v5 = vpop.f32.mrb[25].mxu1 }
 0x28c   : > { %v7006_v8 = vadd.f32 %v5488_v5, %v5487_v3  ;;  %v5490_v7 = vpop.f32.mrb[26].mxu1 }
 0x28d   : > { %v5491_v9 = vpop.f32.mrb[27].mxu1 }
 0x28e   : > { %v7008_v13 = vadd.f32 %v5491_v9, %v5490_v7 }
 0x292   : > { %v5493_v10 = vpop.f32.mrb[28].mxu1 }
 0x293   : > { %v5494_v12 = vpop.f32.mrb[29].mxu1 }
 0x294   : > { %v7010_v42 = vadd.f32 %v5494_v12, %v5493_v10  ;;  %v5496_v15 = vpop.f32.mrb[30].mxu1 }
 0x295   : > { %v5497_v16 = vpop.f32.mrb[31].mxu1 }
 0x296   : > { %v7012_v17 = vadd.f32 %v5497_v16, %v5496_v15 }
 0x29a   : > { %v5499_v18 = vpop.f32.mrb[32].mxu1 }
 0x29b   : > { %v5500_v36 = vpop.f32.mrb[33].mxu1 }
 0x29c   : > { %v7023_v22 = vadd.f32 %v5500_v36, %v5499_v18  ;;  %v5502_v43 = vpop.f32.mrb[34].mxu1 }
 0x29d   : > { %v5503_v24 = vpop.f32.mrb[35].mxu1 }
 0x29e   : > { %v7034_v41 = vadd.f32 %v5503_v24, %v5502_v43  ;;  %v2664_v43 = vadd.f32 %v6988_v39, %v7067_v48 }
 0x2a4   : > { %v5505_v29 = vpop.f32.mrb[36].mxu1 }
 0x2a5   : > { %v5506_v31 = vpop.f32.mrb[37].mxu1 }
 0x2a6   : > { %v7057_v37 = vadd.f32 %v5506_v31, %v5505_v29  ;;  %v5508_v38 = vpop.f32.mrb[38].mxu1  ;;  %v2669_v31 = vadd.f32 %v6990_v44, %v7067_v48 }
 0x2a7   : > { %v5509_v50 = vpop.f32.mrb[39].mxu1 }
 0x2a8   : > { %v7059_v40 = vadd.f32 %v5509_v50, %v5508_v38  ;;  %v2672_v38 = vadd.f32 %v6992_v46, %v7067_v48  ;;  %v2677_v46 = vadd.f32 %v6994_v25, %v7067_v48 }
 0x2ad   : > { %v5511_v45 = vpop.f32.mrb[40].mxu1 }
 0x2ae   : > { %v5512_v47 = vpop.f32.mrb[41].mxu1 }
 0x2af   : > { %v7069_v51 = vadd.f32 %v5512_v47, %v5511_v45  ;;  %v5514_v53 = vpop.f32.mrb[42].mxu1 }
 0x2b0   : > { %v5515_v54 = vpop.f32.mrb[43].mxu1  ;;  %v5533_v55 = vpop.f32.mrb[52].mxu0 }
 0x2b1   : > { %v5534_v32 = vpop.f32.mrb[53].mxu0 }
 0x2b2   : > { %v5535_v60 = vadd.f32 %v5534_v32, %v5533_v55  ;;  %v5536_v61 = vpop.f32.mrb[54].mxu0 }
 0x2b3   : > { %v5537_v63 = vpop.f32.mrb[55].mxu0 }
 0x2b4   : > { %v5538_v3 = vadd.f32 %v5537_v63, %v5536_v61  ;;  %v2773_v5 = vadd.f32 %v5535_v60, %v2653_v58 }
 0x2b5   : > { %v2892_v7 = vpop.f32.mrb[44].mxu1 }
 0x2b6   : > { %v2893_v9 = vadd.f32 %v2892_v7, %v2773_v5  ;;  %v5839_v10 = vpop.f32.mrb[45].mxu1  ;;  %v2776_v12 = vadd.f32 %v5538_v3, %v2656_v0 }
 0x2b7   : > { %v2895_v15 = vpop.f32.mrb[46].mxu1 }
 0x2b8   : > { %2978 = vst.msk [vmem:[#allocation3] sm:$0xff] %vm619_vm2, %v2893_v9  ;;  %v2896_v16 = vadd.f32 %v2895_v15, %v2776_v12  ;;  %v5840_v18 = vpop.f32.mrb[47].mxu1  ;;  %v5539_v36 = vpop.f32.mrb[56].mxu0 }
 0x2b9   : > { %v5540_v19 = vpop.f32.mrb[57].mxu0 }
 0x2ba   : > { %2979 = vst.msk [vmem:[#allocation3 + $0x8] sm:$0xff] %vm619_vm2, %v2896_v16  ;;  %v5541_v21 = vadd.f32 %v5540_v19, %v5539_v36  ;;  %v5542_v33 = vpop.f32.mrb[58].mxu0  ;;  %v2680_v16 = vadd.f32 %v6996_v4, %v7067_v48 }
 0x2bb   : > { %v5543_v52 = vpop.f32.mrb[59].mxu0 }
 0x2bc   : > { %v5544_v23 = vadd.f32 %v5543_v52, %v5542_v33  ;;  %v2781_v6 = vadd.f32 %v5541_v21, %v2661_v30 }
 0x2bd   : > { %v2900_v24 = vpop.f32.mrb[48].mxu1 }
 0x2be   : > { %v2901_v14 = vadd.f32 %v2900_v24, %v2781_v6  ;;  %v5843_v26 = vpop.f32.mrb[49].mxu1  ;;  %v2784_v27 = vadd.f32 %v5544_v23, %v2664_v43  ;;  %v2685_v24 = vadd.f32 %v6998_v56, %v7067_v48 }
 0x2bf   : > { %v2903_v28 = vpop.f32.mrb[50].mxu1 }
 0x2c0   : > { %2980 = vst.msk [vmem:[#allocation3 + $0x10] sm:$0xff] %vm619_vm2, %v2901_v14  ;;  %v2904_v49 = vadd.f32 %v2903_v28, %v2784_v27  ;;  %v5844_v29 = vpop.f32.mrb[51].mxu1  ;;  %v5545_v35 = vpop.f32.mrb[60].mxu0  ;;  %v2688_v27 = vadd.f32 %v7000_v59, %v7067_v48  ;;  %v6086_v59 = vld [vmem:[%s7544_s5 + $0x60] sm:$0xff]  }
 0x2c1   : > { %v5546_v11 = vpop.f32.mrb[61].mxu0  ;;  %v3000_v47 = vld [vmem:[#allocation3] ss:$2 sm:$0x3f]  ;;  %5622 = vmatprep.subr.bf16.mxu0 %v6086_v59 }
 0x2c2   : > { %2981 = vst.msk [vmem:[#allocation3 + $0x18] sm:$0xff] %vm619_vm2, %v2904_v49  ;;  %v5547_v34 = vadd.f32 %v5546_v11, %v5545_v35  ;;  %v5548_v39 = vpop.f32.mrb[62].mxu0  ;;  %v3002_v54 = vld [vmem:[#allocation3 + $0x1] ss:$2 sm:$0x3f] }
 0x2c3   : > { %v5549_v20 = vpop.f32.mrb[63].mxu0  ;;  %v3003_v3 = vmax.f32 %v3000_v47, %v3002_v54 }
 0x2c4   : > { %v5550_v50 = vadd.f32 %v5549_v20, %v5548_v39  ;;  %v2789_v57 = vadd.f32 %v5547_v34, %v2669_v31 }
 0x2c5   : > { %v2908_v45 = vpop.f32.mrb[52].mxu1 }
 0x2c6   : > { %v5847_v53 = vpop.f32.mrb[53].mxu1  ;;  %v2909_v55 = vadd.f32 %v2908_v45, %v2789_v57  ;;  %v2792_v32 = vadd.f32 %v5550_v50, %v2672_v38 }
 0x2c7   : > { %v2911_v58 = vpop.f32.mrb[54].mxu1 }
 0x2c8   : > { %v5848_v60 = vpop.f32.mrb[55].mxu1  ;;  %v5551_v61 = vpop.f32.mrb[64].mxu0  ;;  %2982 = vst.msk [vmem:[#allocation3 + $0x20] sm:$0xff] %vm619_vm2, %v2909_v55  ;;  %v2912_v44 = vadd.f32 %v2911_v58, %v2792_v32  ;;  %v6087_v55 = vld [vmem:[%s7544_s5 + $0x20] sm:$0xff]   ;;  %v6088_v32 = vld [vmem:[%s7544_s5 + $0xd8] sm:$0xff]   ;;  %v2693_v58 = vadd.f32 %v7002_v62, %v7067_v48 }
 0x2c9   : > { %v3005_v63 = vld [vmem:[#allocation3 + $0xe] ss:$2 sm:$0x3f]  ;;  %v3007_v0 = vld [vmem:[#allocation3 + $0xf] ss:$2 sm:$0x3f]  ;;  %5648 = vmatprep.subr.bf16.mxu1 %v6088_v32  ;;  %5623 = vmatpush3.bf16.msra.mxu0 %v6087_v55 }
 0x2ca   : > { %v3008_v5 = vmax.f32 %v3005_v63, %v3007_v0  ;;  %v5552_v7 = vpop.f32.mrb[65].mxu0  ;;  %2983 = vst.msk [vmem:[#allocation3 + $0x28] sm:$0xff] %vm619_vm2, %v2912_v44  ;;  %v6089_v0 = vld [vmem:[%s7544_s5 + $0x98] sm:$0xff]   ;;  %v6090_v44 = vld [vmem:[%s7544_s5 + $0x68] sm:$0xff]   ;;  %v6092_v62 = vld [vmem:[%s7544_s5 + $0xe0] sm:$0xff]  }
 0x2cb   : > { %v5553_v9 = vadd.f32 %v5552_v7, %v5551_v61  ;;  %v5554_v10 = vpop.f32.mrb[66].mxu0  ;;  %5649 = vmatpush3.bf16.msra.mxu1 %v6089_v0  ;;  %5624 = vmatprep.subr.bf16.mxu0 %v6090_v44  ;;  %v6094_v44 = vld [vmem:[%s7544_s5 + $0x70] sm:$0xff]  }
 0x2cc   : > { %v3009_v12 = vmax.f32 %v3003_v3, %v3008_v5  ;;  %v5555_v15 = vpop.f32.mrb[67].mxu0  ;;  %v2696_v5 = vadd.f32 %v7004_v2, %v7067_v48  ;;  %5650 = vmatprep.subr.bf16.mxu1 %v6092_v62 }
 0x2cd   : > { %v5556_v18 = vadd.f32 %v5555_v15, %v5554_v10  ;;  %v2797_v36 = vadd.f32 %v5553_v9, %v2677_v46  ;;  %v2916_v19 = vpop.f32.mrb[56].mxu1  ;;  %v6091_v10 = vld [vmem:[%s7544_s5 + $0x28] sm:$0xff]  }
 0x2ce   : > { %v5851_v30 = vpop.f32.mrb[57].mxu1  ;;  %3010 = vst.msk [vmem:[#allocation4] sm:$0x3f] %vm2998_vm7, %v3009_v12  ;;  %v6093_v12 = vld [vmem:[%s7544_s5 + $0xa0] sm:$0xff]   ;;  %5625 = vmatpush3.bf16.msra.mxu0 %v6091_v10 }
 0x2cf   : > { %v2917_v21 = vadd.f32 %v2916_v19, %v2797_v36  ;;  %v2800_v33 = vadd.f32 %v5556_v18, %v2680_v16  ;;  %v2919_v52 = vpop.f32.mrb[58].mxu1  ;;  %v3012_v28 = vld [vmem:[#allocation3 + $0x1c] ss:$2 sm:$0x3f]  ;;  %5651 = vmatpush3.bf16.msra.mxu1 %v6093_v12  ;;  %5626 = vmatprep.subr.bf16.mxu0 %v6094_v44 }
 0x2d0   : > { %v5852_v43 = vpop.f32.mrb[59].mxu1  ;;  %v5557_v23 = vpop.f32.mrb[68].mxu0  ;;  %v3014_v11 = vld [vmem:[#allocation3 + $0x1d] ss:$2 sm:$0x3f] }
 0x2d1   : > { %2984 = vst.msk [vmem:[#allocation3 + $0x30] sm:$0xff] %vm619_vm2, %v2917_v21  ;;  %v2920_v25 = vadd.f32 %v2919_v52, %v2800_v33  ;;  %v5558_v6 = vpop.f32.mrb[69].mxu0  ;;  %v3015_v56 = vmax.f32 %v3012_v28, %v3014_v11  ;;  %v2701_v33 = vadd.f32 %v7006_v8, %v7067_v48  ;;  %v2704_v43 = vadd.f32 %v7008_v13, %v7067_v48 }
 0x2d2   : > { %v5559_v4 = vadd.f32 %v5558_v6, %v5557_v23  ;;  %v5560_v14 = vpop.f32.mrb[70].mxu0 }
 0x2d3   : > { %2985 = vst.msk [vmem:[#allocation3 + $0x38] sm:$0xff] %vm619_vm2, %v2920_v25  ;;  %v5561_v26 = vpop.f32.mrb[71].mxu0 }
 0x2d4   : > { %v5562_v49 = vadd.f32 %v5561_v26, %v5560_v14  ;;  %v2805_v29 = vadd.f32 %v5559_v4, %v2685_v24 }
 0x2d5   : > { %v2924_v35 = vpop.f32.mrb[60].mxu1 }
 0x2d6   : > { %v5855_v31 = vpop.f32.mrb[61].mxu1  ;;  %v2925_v34 = vadd.f32 %v2924_v35, %v2805_v29  ;;  %v2808_v39 = vadd.f32 %v5562_v49, %v2688_v27 }
 0x2d7   : > { %v2927_v20 = vpop.f32.mrb[62].mxu1 }
 0x2d8   : > { %v3017_v38 = vld [vmem:[#allocation3 + $0x2a] ss:$2 sm:$0x3f]  ;;  %v3019_v50 = vld [vmem:[#allocation3 + $0x2b] ss:$2 sm:$0x3f]  ;;  %v2928_v45 = vadd.f32 %v2927_v20, %v2808_v39 }
 0x2d9   : > { %v3020_v57 = vmax.f32 %v3017_v38, %v3019_v50  ;;  %2986 = vst.msk [vmem:[#allocation3 + $0x40] sm:$0xff] %vm619_vm2, %v2925_v34  ;;  %v5856_v47 = vpop.f32.mrb[63].mxu1  ;;  %v5563_v53 = vpop.f32.mrb[72].mxu0 }
 0x2da   : > { %v5564_v54 = vpop.f32.mrb[73].mxu0  ;;  %2987 = vst.msk [vmem:[#allocation3 + $0x48] sm:$0xff] %vm619_vm2, %v2928_v45 }
 0x2db   : > { %v3021_v60 = vmax.f32 %v3015_v56, %v3020_v57  ;;  %v5565_v61 = vadd.f32 %v5564_v54, %v5563_v53  ;;  %v5566_v63 = vpop.f32.mrb[74].mxu0  ;;  %v2709_v54 = vadd.f32 %v7010_v42, %v7067_v48  ;;  %v6095_v42 = vld [vmem:[%s7544_s5 + $0x30] sm:$0xff]  }
 0x2dc   : > { %v5567_v3 = vpop.f32.mrb[75].mxu0  ;;  %5627 = vmatpush3.bf16.msra.mxu0 %v6095_v42 }
 0x2dd   : > { %v5568_v7 = vadd.f32 %v5567_v3, %v5566_v63  ;;  %v2813_v46 = vadd.f32 %v5565_v61, %v2693_v58  ;;  %v2932_v9 = vpop.f32.mrb[64].mxu1  ;;  %3022 = vst.msk [vmem:[#allocation4 + $0x6] sm:$0x3f] %vm2998_vm7, %v3021_v60  ;;  %v2712_v60 = vadd.f32 %v7012_v17, %v7067_v48  ;;  %v6096_v3 = vld [vmem:[%s7544_s5 + $0xe8] sm:$0xff]  }
 0x2de   : > { %v5859_v15 = vpop.f32.mrb[65].mxu1  ;;  %v6097_v17 = vld [vmem:[%s7544_s5 + $0xa8] sm:$0xff]   ;;  %5652 = vmatprep.subr.bf16.mxu1 %v6096_v3 }
 0x2df   : > { %v2933_v16 = vadd.f32 %v2932_v9, %v2813_v46  ;;  %v2816_v2 = vadd.f32 %v5568_v7, %v2696_v5  ;;  %v2935_v18 = vpop.f32.mrb[66].mxu1  ;;  %5653 = vmatpush3.bf16.msra.mxu1 %v6097_v17 }
 0x2e0   : > { %v5860_v19 = vpop.f32.mrb[67].mxu1  ;;  %v5569_v30 = vpop.f32.mrb[76].mxu0  ;;  %v3024_v14 = vld [vmem:[#allocation3 + $0x38] ss:$2 sm:$0x3f] }
 0x2e1   : > { %2988 = vst.msk [vmem:[#allocation3 + $0x50] sm:$0xff] %vm619_vm2, %v2933_v16  ;;  %v2936_v36 = vadd.f32 %v2935_v18, %v2816_v2  ;;  %v5570_v21 = vpop.f32.mrb[77].mxu0  ;;  %v3026_v35 = vld [vmem:[#allocation3 + $0x39] ss:$2 sm:$0x3f]  ;;  %v2717_v16 = vadd.f32 %v7023_v22, %v7067_v48 }
 0x2e2   : > { %v5571_v52 = vadd.f32 %v5570_v21, %v5569_v30  ;;  %v5572_v25 = vpop.f32.mrb[78].mxu0  ;;  %v3027_v38 = vmax.f32 %v3024_v14, %v3026_v35 }
 0x2e3   : > { %2989 = vst.msk [vmem:[#allocation3 + $0x58] sm:$0xff] %vm619_vm2, %v2936_v36  ;;  %v5573_v23 = vpop.f32.mrb[79].mxu0 }
 0x2e4   : > { %v3090_v6 = vld [vmem:[#allocation4 + $0x1] sm:$0xff]  ;;  %v5574_v26 = vadd.f32 %v5573_v23, %v5572_v25  ;;  %v2821_v27 = vadd.f32 %v5571_v52, %v2701_v33  ;;  %v2720_v52 = vadd.f32 %v7034_v41, %v7067_v48 }
 0x2e5   : > { %v3071_v24 = vld [vmem:[#allocation4] sm:$0xff]  ;;  %v2940_v28 = vpop.f32.mrb[68].mxu1  ;;  %v5373_v49 = vpack.c.bf16 %v3090_v6, %v3090_v6 }
 0x2e6   : > { %v3115_v4 = vld [vmem:[#allocation4 + $0x2] sm:$0xff]  ;;  %v5370_v29 = vpack.c.bf16 %v3071_v24, %v3071_v24  ;;  %v5863_v11 = vpop.f32.mrb[69].mxu1  ;;  %v2941_v31 = vadd.f32 %v2940_v28, %v2821_v27  ;;  %v2824_v34 = vadd.f32 %v5574_v26, %v2704_v43 }
 0x2e7   : > { %v5376_v8 = vpack.c.bf16 %v3115_v4, %v3115_v4  ;;  %v2943_v39 = vpop.f32.mrb[70].mxu1  ;;  %3103 = vrot.lane.b32.xlu0 %v5373_v49, %s6268_s14 }
 0x2e8   : > { %3087 = vst.msk [vmem:[#allocation6] sm:$0xf] %vm644_vm3, %v5370_v29  ;;  %v3029_v13 = vld [vmem:[#allocation3 + $0x46] ss:$2 sm:$0x3f]  ;;  %v2944_v56 = vadd.f32 %v2943_v39, %v2824_v34  ;;  %v5864_v57 = vpop.f32.mrb[71].mxu1 }
 0x2e9   : > { %v3031_v20 = vld [vmem:[#allocation3 + $0x47] ss:$2 sm:$0x3f]  ;;  %3131 = vst.msk [vmem:[#allocation6 + $0x4] sm:$0xf] %vm644_vm3, %v5376_v8  ;;  %v5575_v45 = vpop.f32.mrb[80].mxu0 }
 0x2ea   : > { %v3032_v50 = vmax.f32 %v3029_v13, %v3031_v20  ;;  %2990 = vst.msk [vmem:[#allocation3 + $0x60] sm:$0xff] %vm619_vm2, %v2941_v31  ;;  %2991 = vst.msk [vmem:[#allocation3 + $0x68] sm:$0xff] %vm619_vm2, %v2944_v56  ;;  %v5576_v53 = vpop.f32.mrb[81].mxu0  ;;  %v3036_v62 = vld [vmem:[#allocation3 + $0x54] ss:$2 sm:$0x3f] }
 0x2eb   : > { %v5577_v59 = vadd.f32 %v5576_v53, %v5575_v45  ;;  %v5578_v55 = vpop.f32.mrb[82].mxu0  ;;  %v3038_v7 = vld [vmem:[#allocation3 + $0x55] ss:$2 sm:$0x3f]  ;;  %v6101_v45 = vld [vmem:[%s7544_s5 + $0xb0] sm:$0xff]  }
 0x2ec   : > { %v3033_v47 = vmax.f32 %v3027_v38, %v3032_v50  ;;  %v5579_v32 = vpop.f32.mrb[83].mxu0  ;;  %v3039_v30 = vmax.f32 %v3036_v62, %v3038_v7  ;;  %v6098_v20 = vld [vmem:[%s7544_s5 + $0x78] sm:$0xff]   ;;  %v6100_v50 = vld [vmem:[%s7544_s5 + $0xf0] sm:$0xff]  }
 0x2ed   : > { %v2948_v58 = vpop.f32.mrb[72].mxu1  ;;  %v5580_v61 = vadd.f32 %v5579_v32, %v5578_v55  ;;  %v2829_v63 = vadd.f32 %v5577_v59, %v2709_v54  ;;  %v6099_v38 = vld [vmem:[%s7544_s5 + $0x38] sm:$0xff]   ;;  %5628 = vmatprep.subr.bf16.mxu0 %v6098_v20  ;;  %5654 = vmatprep.subr.bf16.mxu1 %v6100_v50  ;;  %v2728_v32 = vadd.f32 %v7059_v40, %v7067_v48 }
 0x2ee   : > { %3034 = vst.msk [vmem:[#allocation4 + $0xc] sm:$0x3f] %vm2998_vm7, %v3033_v47  ;;  %v5867_v0 = vpop.f32.mrb[73].mxu1  ;;  %v2725_v47 = vadd.f32 %v7057_v37, %v7067_v48  ;;  %5629 = vmatpush3.bf16.msra.mxu0 %v6099_v38  ;;  %5655 = vmatpush3.bf16.msra.mxu1 %v6101_v45 }
 0x2ef   : > { %v2951_v5 = vpop.f32.mrb[74].mxu1  ;;  %v2949_v46 = vadd.f32 %v2948_v58, %v2829_v63  ;;  %v2832_v9 = vadd.f32 %v5580_v61, %v2712_v60 }
 0x2f0   : > { %v5868_v10 = vpop.f32.mrb[75].mxu1  ;;  %v5581_v12 = vpop.f32.mrb[84].mxu0 }
 0x2f1   : > { %v5582_v15 = vpop.f32.mrb[85].mxu0  ;;  %v3041_v2 = vld [vmem:[#allocation3 + $0x62] ss:$2 sm:$0x3f]  ;;  %2992 = vst.msk [vmem:[#allocation3 + $0x70] sm:$0xff] %vm619_vm2, %v2949_v46  ;;  %v2952_v36 = vadd.f32 %v2951_v5, %v2832_v9 }
 0x2f2   : > { %v3043_v18 = vld [vmem:[#allocation3 + $0x63] ss:$2 sm:$0x3f]  ;;  %v5583_v19 = vadd.f32 %v5582_v15, %v5581_v12  ;;  %v5584_v33 = vpop.f32.mrb[86].mxu0 }
 0x2f3   : > { %v3044_v21 = vmax.f32 %v3041_v2, %v3043_v18  ;;  %2993 = vst.msk [vmem:[#allocation3 + $0x78] sm:$0xff] %vm619_vm2, %v2952_v36  ;;  %v5585_v25 = vpop.f32.mrb[87].mxu0 }
 0x2f4   : > { %v2837_v43 = vadd.f32 %v5583_v19, %v2717_v16  ;;  %v5586_v4 = vadd.f32 %v5585_v25, %v5584_v33  ;;  %v2733_v33 = vadd.f32 %v7069_v51, %v7067_v48  ;;  %v7204_v51 = vld [vmem:[%s7544_s5 + $0x100] sm:$0xff]  }
 0x2f5   : > { %v3091_v23 = vld [vmem:[#allocation4 + $0x9] sm:$0xff]  ;;  %v3045_v22 = vmax.f32 %v3039_v30, %v3044_v21  ;;  %v2956_v14 = vpop.f32.mrb[76].mxu1  ;;  %5881 = vmatprep.subr.bf16.mxu0 %v7204_v51 }
 0x2f6   : > { %v3134_v6 = vld [vmem:[#allocation4 + $0x6] sm:$0xff]  ;;  %v5374_v26 = vpack.c.bf16 %v3091_v23, %v3091_v23  ;;  %v2957_v29 = vadd.f32 %v2956_v14, %v2837_v43  ;;  %v5871_v35 = vpop.f32.mrb[77].mxu1  ;;  %v2840_v41 = vadd.f32 %v5586_v4, %v2720_v52 }
 0x2f7   : > { %v3178_v24 = vld [vmem:[#allocation4 + $0x8] sm:$0xff]  ;;  %v5379_v27 = vpack.c.bf16 %v3134_v6, %v3134_v6  ;;  %3046 = vst.msk [vmem:[#allocation4 + $0x12] sm:$0x3f] %vm2998_vm7, %v3045_v22  ;;  %v2959_v34 = vpop.f32.mrb[78].mxu1 }
 0x2f8   : > { %v3159_v28 = vld [vmem:[#allocation4 + $0x7] sm:$0xff]  ;;  %v5385_v11 = vpack.c.bf16 %v3178_v24, %v3178_v24  ;;  %3105 = vrot.lane.b32.xlu1 %v5374_v26, %s6268_s14  ;;  %2994 = vst.msk [vmem:[#allocation3 + $0x80] sm:$0xff] %vm619_vm2, %v2957_v29  ;;  %v5872_v39 = vpop.f32.mrb[79].mxu1  ;;  %v5587_v13 = vpop.f32.mrb[88].mxu0  ;;  %v2960_v56 = vadd.f32 %v2959_v34, %v2840_v41 }
 0x2f9   : > { %v3116_v49 = vld [vmem:[#allocation4 + $0xa] sm:$0xff]  ;;  %v5382_v8 = vpack.c.bf16 %v3159_v28, %v3159_v28  ;;  %3147 = vrot.lane.b32.xlu0 %v5379_v27, %s6268_s14  ;;  %v5588_v57 = vpop.f32.mrb[89].mxu0 }
 0x2fa   : > { %v5377_v31 = vpack.c.bf16 %v3116_v49, %v3116_v49  ;;  %3088 = vst.msk [vmem:[#allocation6 + $0x24] sm:$0xf] %vm644_vm3, %v5385_v11  ;;  %v5589_v53 = vadd.f32 %v5588_v57, %v5587_v13  ;;  %v5590_v54 = vpop.f32.mrb[90].mxu0  ;;  %v3048_v61 = vld [vmem:[#allocation3 + $0x70] ss:$2 sm:$0x3f] }
 0x2fb   : > { %3175 = vst.msk [vmem:[#allocation6 + $0x8] sm:$0xf] %vm644_vm3, %v5382_v8  ;;  %v5591_v59 = vpop.f32.mrb[91].mxu0  ;;  %v3050_v63 = vld [vmem:[#allocation3 + $0x71] ss:$2 sm:$0x3f] }
 0x2fc   : > { %3132 = vst.msk [vmem:[#allocation6 + $0x28] sm:$0xf] %vm644_vm3, %v5377_v31  ;;  %v2845_v55 = vadd.f32 %v5589_v53, %v2725_v47  ;;  %v5592_v58 = vadd.f32 %v5591_v59, %v5590_v54  ;;  %v3051_v23 = vmax.f32 %v3048_v61, %v3050_v63  ;;  %v6106_v26 = vld [vmem:[%s7544_s5 + $0xf8] sm:$0xff]  }
 0x2fd   : > { %2995 = vst.msk [vmem:[#allocation3 + $0x88] sm:$0xff] %vm619_vm2, %v2960_v56  ;;  %3191 = vrot.lane.b32.xlu0 %v5385_v11, %s6268_s14  ;;  %v2964_v60 = vpop.f32.mrb[80].mxu1  ;;  %5656 = vmatprep.subr.bf16.mxu1 %v6106_v26  ;;  %v6107_v11 = vld [vmem:[%s7544_s5 + $0xb8] sm:$0xff]   ;;  %v6123_v26 = vld [vmem:[%s7546_s7 + $0x80] sm:$0xff]  }
 0x2fe   : > { %v2965_v37 = vadd.f32 %v2964_v60, %v2845_v55  ;;  %v5875_v0 = vpop.f32.mrb[81].mxu1  ;;  %v3135_v44 = vld [vmem:[#allocation4 + $0xe] sm:$0xff]  ;;  %v2848_v3 = vadd.f32 %v5592_v58, %v2728_v32  ;;  %5657 = vmatpush3.bf16.msra.mxu1 %v6107_v11  ;;  %v6129_v11 = vld [vmem:[%s7546_s7 + $0xd0] sm:$0xff]  }
 0x2ff   : > { %v3092_v42 = vld [vmem:[#allocation4 + $0x11] sm:$0x3f]  ;;  %v2967_v62 = vpop.f32.mrb[82].mxu1  ;;  %v5380_v5 = vpack.c.bf16 %v3135_v44, %v3135_v44 }
 0x300   : > { %v5375_v17 = vpack.c.bf16 %v3092_v42, %v3092_v42  ;;  %v3179_v7 = vld [vmem:[#allocation4 + $0x10] sm:$0xff]  ;;  %2996 = vst.msk [vmem:[#allocation3 + $0x90] sm:$0xff] %vm619_vm2, %v2965_v37  ;;  %v5876_v10 = vpop.f32.mrb[83].mxu1  ;;  %v5593_v12 = vpop.f32.mrb[92].mxu0  ;;  %v2968_v36 = vadd.f32 %v2967_v62, %v2848_v3 }
 0x301   : > { %v3073_v46 = vld [vmem:[#allocation4 + $0x10] sm:$0x3f]  ;;  %3149 = vrot.lane.b32.xlu1 %v5380_v5, %s6268_s14  ;;  %v5594_v19 = vpop.f32.mrb[93].mxu0  ;;  %3263 = vst.msk [vmem:[#allocation6 + $0x10] sm:$0xf] %vm644_vm3, %v5380_v5  ;;  %v5386_v22 = vpack.c.bf16 %v3179_v7, %v3179_v7 }
 0x302   : > { %v3160_v9 = vld [vmem:[#allocation4 + $0xf] sm:$0xff]  ;;  %v5372_v15 = vpack.c.bf16 %v3073_v46, %v3073_v46  ;;  %3107 = vrot.lane.b32.xlu0 %v5375_v17, %s6268_s14  ;;  %v5595_v43 = vadd.f32 %v5594_v19, %v5593_v12  ;;  %2997 = vst.msk [vmem:[#allocation3 + $0x98] sm:$0xff] %vm619_vm2, %v2968_v36  ;;  %v5596_v24 = vpop.f32.mrb[94].mxu0 }
 0x303   : > { %v3222_v40 = vld [vmem:[#allocation4 + $0xd] sm:$0xff]  ;;  %v5383_v16 = vpack.c.bf16 %v3160_v9, %v3160_v9  ;;  %v5597_v14 = vpop.f32.mrb[95].mxu0 }
 0x304   : > { %v3203_v2 = vld [vmem:[#allocation4 + $0xc] sm:$0xff]  ;;  %v3053_v52 = vld [vmem:[#allocation3 + $0x7e] ss:$2 sm:$0x3f]  ;;  %3089 = vst.msk [vmem:[#allocation6 + $0x48] sm:$0x7] %vm772_vm4, %v5372_v15  ;;  %v5391_v4 = vpack.c.bf16 %v3222_v40, %v3222_v40  ;;  %v2853_v48 = vadd.f32 %v5595_v43, %v2733_v33 }
 0x305   : > { %v3117_v18 = vld [vmem:[#allocation4 + $0x12] sm:$0x3f]  ;;  %v5388_v30 = vpack.c.bf16 %v3203_v2, %v3203_v2  ;;  %3176 = vst.msk [vmem:[#allocation6 + $0x2c] sm:$0xf] %vm644_vm3, %v5383_v16  ;;  %v2972_v28 = vpop.f32.mrb[84].mxu1  ;;  %3193 = vrot.lane.b32.xlu1 %v5386_v22, %s6268_s14  ;;  %v6108_v15 = vld [vmem:[%s7544_s5 + $0x108] sm:$0xff]  }
 0x306   : > { %v5378_v21 = vpack.c.bf16 %v3117_v18, %v3117_v18  ;;  %v3055_v25 = vld [vmem:[#allocation3 + $0x7f] ss:$2 sm:$0x3f]  ;;  %3235 = vrot.lane.b32.xlu0 %v5391_v4, %s6268_s14  ;;  %v2973_v49 = vadd.f32 %v2972_v28, %v2853_v48  ;;  %v5879_v29 = vpop.f32.mrb[85].mxu1  ;;  %v6116_v36 = vld [vmem:[%s7544_s5 + $0x118] sm:$0xff]  }
 0x307   : > { %v3056_v6 = vmax.f32 %v3053_v52, %v3055_v25  ;;  %3219 = vst.msk [vmem:[#allocation6 + $0xc] sm:$0xf] %vm644_vm3, %v5388_v30  ;;  %v2975_v35 = vpop.f32.mrb[86].mxu1  ;;  %v3060_v31 = vld [vmem:[#allocation3 + $0x8c] ss:$2 sm:$0x3f] }
 0x308   : > { %3133 = vst.msk [vmem:[#allocation6 + $0x4c] sm:$0x7] %vm772_vm4, %v5378_v21  ;;  %v5880_v8 = vpop.f32.mrb[87].mxu1  ;;  %v3062_v41 = vld [vmem:[#allocation3 + $0x8d] ss:$2 sm:$0x3f] }
 0x309   : > { %v3057_v27 = vmax.f32 %v3051_v23, %v3056_v6  ;;  %2999 = vst.msk [vmem:[#allocation3 + $0xa0] sm:$0x3f] %vm2998_vm7, %v2973_v49  ;;  %v3063_v56 = vmax.f32 %v3060_v31, %v3062_v41  ;;  %v6110_v16 = vld [vmem:[%s7544_s5 + $0x110] sm:$0xff]   ;;  %v6120_v14 = vld [vmem:[%s7546_s7 + $0x40] sm:$0xff]   ;;  %v6125_v28 = vld [vmem:[%s7546_s7 + $0xc8] sm:$0xff]  }
 0x30a   : > { %v6121_v48 = vld [vmem:[%s7546_s7 + $0xc0] sm:$0xff]   ;;  %5676 = vmatprep.subr.bf16.mxu1 %v6120_v14  ;;  %v6126_v49 = vld [vmem:[%s7546_s7 + $0x8] sm:$0xff]   ;;  %v6128_v35 = vld [vmem:[%s7546_s7 + $0x50] sm:$0xff]  }
 0x30b   : > { %3058 = vst.msk [vmem:[#allocation4 + $0x18] sm:$0x3f] %vm2998_vm7, %v3057_v27  ;;  %v6124_v27 = vld [vmem:[%s7546_s7 + $0x48] sm:$0xff]   ;;  %v6130_v8 = vld [vmem:[%s7546_s7 + $0x10] sm:$0xff]   ;;  %v6132_v41 = vld [vmem:[%s7546_s7 + $0x58] sm:$0xff]  }
 0x30c   : > { %v6127_v29 = vld [vmem:[%s7546_s7 + $0x88] sm:$0xff]   ;;  %v6131_v31 = vld [vmem:[%s7546_s7 + $0x90] sm:$0xff]  }
 0x310   : > { %v3065_v13 = vld [vmem:[#allocation3 + $0x9a] ss:$2 sm:$0x3f]  ;;  %v3067_v20 = vld [vmem:[#allocation3 + $0x9b] ss:$2 sm:$0x3f] }
 0x311   : > { %v3068_v57 = vmax.f32 %v3065_v13, %v3067_v20  ;;  %v6135_v13 = vld [vmem:[%s7546_s7 + $0x98] sm:$0xff]   ;;  %v6136_v20 = vld [vmem:[%s7546_s7 + $0x60] sm:$0xff]  }
 0x312   : > { %v3136_v34 = vld [vmem:[#allocation4 + $0x16] sm:$0x3f] }
 0x313   : > { %v3180_v39 = vld [vmem:[#allocation4 + $0x18] sm:$0x3f]  ;;  %v5381_v38 = vpack.c.bf16 %v3136_v34, %v3136_v34  ;;  %v3069_v32 = vmax.f32 %v3063_v56, %v3068_v57  ;;  %v6133_v34 = vld [vmem:[%s7546_s7 + $0xd8] sm:$0xff]   ;;  %v6139_v56 = vld [vmem:[%s7546_s7 + $0xa0] sm:$0xff]  }
 0x314   : > { %v5387_v50 = vpack.c.bf16 %v3180_v39, %v3180_v39  ;;  %v3223_v45 = vld [vmem:[#allocation4 + $0x15] sm:$0xff]  ;;  %v6134_v39 = vld [vmem:[%s7546_s7 + $0x18] sm:$0xff]  }
 0x315   : > { %v3161_v47 = vld [vmem:[#allocation4 + $0x17] sm:$0x3f]  ;;  %3151 = vrot.lane.b32.xlu1 %v5381_v38, %s6268_s14  ;;  %v5392_v60 = vpack.c.bf16 %v3223_v45, %v3223_v45  ;;  %3070 = vst.msk [vmem:[#allocation4 + $0x1e] sm:$0x3f] %vm2998_vm7, %v3069_v32  ;;  %v6147_v32 = vld [vmem:[%s7546_s7 + $0xb0] sm:$0xff]  }
 0x316   : > { %v3204_v53 = vld [vmem:[#allocation4 + $0x14] sm:$0xff]  ;;  %3195 = vrot.lane.b32.xlu0 %v5387_v50, %s6268_s14  ;;  %v5384_v54 = vpack.c.bf16 %v3161_v47, %v3161_v47 }
 0x317   : > { %v5389_v59 = vpack.c.bf16 %v3204_v53, %v3204_v53  ;;  %v3248_v55 = vld [vmem:[#allocation4 + $0x16] sm:$0xff] }
 0x318   : > { %v5395_v58 = vpack.c.bf16 %v3248_v55, %v3248_v55  ;;  %3177 = vst.msk [vmem:[#allocation6 + $0x50] sm:$0x7] %vm772_vm4, %v5384_v54  ;;  %v6137_v38 = vld [vmem:[%s7546_s7 + $0xe0] sm:$0xff]   ;;  %v6140_v57 = vld [vmem:[%s7546_s7 + $0x68] sm:$0xff]   ;;  %v6144_v54 = vld [vmem:[%s7546_s7 + $0x70] sm:$0xff]  }
 0x319   : > { %3220 = vst.msk [vmem:[#allocation6 + $0x30] sm:$0xf] %vm644_vm3, %v5389_v59  ;;  %3237 = vrot.lane.b32.xlu1 %v5392_v60, %s6268_s14  ;;  %v6138_v50 = vld [vmem:[%s7546_s7 + $0x20] sm:$0xff]   ;;  %v6141_v45 = vld [vmem:[%s7546_s7 + $0xe8] sm:$0xff]   ;;  %v6145_v59 = vld [vmem:[%s7546_s7 + $0xf0] sm:$0xff]  }
 0x31a   : > { %3264 = vst.msk [vmem:[#allocation6 + $0x34] sm:$0xf] %vm644_vm3, %v5395_v58  ;;  %v6142_v47 = vld [vmem:[%s7546_s7 + $0x28] sm:$0xff]   ;;  %v6146_v55 = vld [vmem:[%s7546_s7 + $0x30] sm:$0xff]   ;;  %v6148_v58 = vld [vmem:[%s7546_s7 + $0x78] sm:$0xff]  }
 0x31b   : > { %v6143_v53 = vld [vmem:[%s7546_s7 + $0xa8] sm:$0xff]   ;;  %v6149_v60 = vld [vmem:[%s7546_s7 + $0xf8] sm:$0xff]  }
 0x31c   : > { %v3224_v61 = vld [vmem:[#allocation4 + $0x1d] sm:$0x3f] }
 0x31d   : > { %v5393_v63 = vpack.c.bf16 %v3224_v61, %v3224_v61  ;;  %v3205_v37 = vld [vmem:[#allocation4 + $0x1c] sm:$0x3f]  ;;  %v6150_v61 = vld [vmem:[%s7546_s7 + $0x38] sm:$0xff]  }
 0x31e   : > { %v3249_v0 = vld [vmem:[#allocation4 + $0x1e] sm:$0x3f]  ;;  %v5390_v44 = vpack.c.bf16 %v3205_v37, %v3205_v37  ;;  %v6152_v37 = vld [vmem:[%s7546_s7 + $0x140] sm:$0xff]  }
 0x31f   : > { %v5396_v42 = vpack.c.bf16 %v3249_v0, %v3249_v0  ;;  %3239 = vrot.lane.b32.xlu1 %v5393_v63, %s6268_s14  ;;  %v6151_v63 = vld [vmem:[%s7546_s7 + $0xb8] sm:$0xff]   ;;  %v6153_v0 = vld [vmem:[%s7546_s7 + $0x1c0] sm:$0xff]   ;;  %s5178_s14 = sshll.u32 %s6341_s13, 6  ;;  %s6269_s13 = smov [#allocation7]  }
 0x320   : > { %3221 = vst.msk [vmem:[#allocation6 + $0x54] sm:$0x7] %vm772_vm4, %v5390_v44  ;;  %s7497_s21 = scalar_lea.hbm %s7548_s9, %s5178_s14  ;;  %s6206_s24 = sshll.u32 %s6269_s13, 4  ;;  %s6207_s24 = int_to_ptr.vmem [resolvable:$false] %s6206_s24 }
 0x321   : > { %3265 = vst.msk [vmem:[#allocation6 + $0x58] sm:$0x7] %vm772_vm4, %v5396_v42  ;;  %v6112_v52 = vld [vmem:[#allocation6 + $0x10] ss:$36 sps:$4 sm:$0xff]   ;;  %s6208_s25 = scalar_lea.vmem %s6207_s24, 128  ;;  %p6209_p0 = scmp.lt.s32.totalorder %s7499_s29, %s6207_s24 }
 0x322   : > { %p6210_p1 = scmp.lt.s32.totalorder %s6208_s25, %s6202_s23 }
 0x324   : > { %p6211_p2 = por %p6210_p1, %p6209_p0 }
 0x326   : > { %p6212_p3 = pnand %p6211_p2, %p6205_p13 }
 0x328   : > { %v6117_v6 = vld [vmem:[#allocation6 + $0x58] ss:$0 sps:$4 sm:$0x77]  }
 0x359   : > { %v3104_v3 = vpop.permute.xlu0 %3103 }
 0x35a   : > { %3112 = vst.msk [vmem:[#allocation6] sm:$0xf] %vm922_vm5, %v3104_v3 }
 0x36a   : > { %v3106_v62 = vpop.permute.xlu1 %3105 }
 0x36b   : > { %v3148_v5 = vpop.permute.xlu0 %3147  ;;  %3113 = vst.msk [vmem:[#allocation6 + $0x24] sm:$0xf] %vm922_vm5, %v3106_v62 }
 0x36c   : > { %3156 = vst.msk [vmem:[#allocation6 + $0x4] sm:$0xf] %vm922_vm5, %v3148_v5 }
 0x36f   : > { %v3192_v17 = vpop.permute.xlu0 %3191 }
 0x370   : > { %3200 = vst.msk [vmem:[#allocation6 + $0x8] sm:$0xf] %vm922_vm5, %v3192_v17 }
 0x372   : > { %v6102_v12 = vld [vmem:[#allocation6] ss:$36 sps:$4 sm:$0xff]  }
 0x373   : > { %v3150_v7 = vpop.permute.xlu1 %3149 }
 0x374   : > { %v3108_v46 = vpop.permute.xlu0 %3107  ;;  %3157 = vst.msk [vmem:[#allocation6 + $0x28] sm:$0xf] %vm922_vm5, %v3150_v7 }
 0x375   : > { %3114 = vst.msk [vmem:[#allocation6 + $0x48] sm:$0x7] %vm943_vm6, %v3108_v46 }
 0x377   : > { %v3194_v9 = vpop.permute.xlu1 %3193 }
 0x378   : > { %v3236_v10 = vpop.permute.xlu0 %3235  ;;  %3201 = vst.msk [vmem:[#allocation6 + $0x2c] sm:$0xf] %vm922_vm5, %v3194_v9  ;;  %v5046_v9 = vld [vmem:[%s7545_s6] ss:$0 sm:$0xff] }
 0x379   : > { %3244 = vst.msk [vmem:[#allocation6 + $0xc] sm:$0xf] %vm922_vm5, %v3236_v10 }
 0x37b   : > { %v6104_v40 = vld [vmem:[#allocation6 + $0x4] ss:$36 sps:$4 sm:$0xff]  }
 0x37c   : > { %3650 = vmatprep.mubr.bf16.mxu0 %v6104_v40 }
 0x37d   : > { %3651 = vmatmul.mubr.bf16.vlgmr.msra.gmra.mrb[96].mxu0 %v6102_v12 }
 0x37e   : > { %5882 = vmatpush3.bf16.msra.mxu0 %v7204_v51  ;;  %v6122_v51 = vld [vmem:[%s7546_s7] sm:$0xff]  }
 0x37f   : > { %5883 = vmatprep.subr.bf16.mxu0 %v6108_v15  ;;  %v6113_v25 = vld [vmem:[#allocation6 + $0x8] ss:$36 sps:$4 sm:$0xff]  }
 0x382   : > { %5884 = vmatpush3.bf16.msra.mxu0 %v6108_v15 }
 0x383   : > { %5885 = vmatprep.subr.bf16.mxu0 %v6110_v16 }
 0x386   : > { %5886 = vmatpush3.bf16.msra.mxu0 %v6110_v16 }
 0x387   : > { %v3152_v2 = vpop.permute.xlu1 %3151  ;;  %5887 = vmatprep.subr.bf16.mxu0 %v6116_v36 }
 0x388   : > { %v3196_v18 = vpop.permute.xlu0 %3195  ;;  %3158 = vst.msk [vmem:[#allocation6 + $0x4c] sm:$0x7] %vm943_vm6, %v3152_v2 }
 0x389   : > { %3202 = vst.msk [vmem:[#allocation6 + $0x50] sm:$0x7] %vm943_vm6, %v3196_v18 }
 0x38a   : > { %5888 = vmatpush3.bf16.msra.mxu0 %v6116_v36 }
 0x38b   : > { %v3238_v19 = vpop.permute.xlu1 %3237  ;;  %5698 = vmatprep.subr.bf16.mxu0 %v6121_v48 }
 0x38c   : > { %3245 = vst.msk [vmem:[#allocation6 + $0x30] sm:$0xf] %vm922_vm5, %v3238_v19 }
 0x38f   : > { %v3272_v30 = vld [vmem:[#allocation6 + $0x48] sm:$0x77] }
 0x390   : > { %v5053_v21 = vcombine.high %v3272_v30, %v3272_v30  ;;  %v5052_v33 = vcombine.low %v3272_v30, %v3272_v30 }
 0x391   : > { %v3240_v23 = vpop.permute.xlu1 %3239 }
 0x392   : > { %3658 = vmatprep.mubr.bf16.mxu0 %v5053_v21  ;;  %3246 = vst.msk [vmem:[#allocation6 + $0x54] sm:$0x7] %vm943_vm6, %v3240_v23 }
 0x393   : > { %3659 = vmatmul.mubr.bf16.gmra.mrb[100].mxu0 %v5052_v33  ;;  %v6115_v43 = vld [vmem:[#allocation6 + $0xc] ss:$36 sps:$4 sm:$0xff]  }
 0x394   : > { %5889 = vmatprep.mubr.msk.bf16.mxu0 %vm619_vm2, %v6112_v52  ;;  %3698 = vmatprep.mubr.bf16.mxu1 %v6115_v43 }
 0x395   : > { %3699 = vmatmul.mubr.bf16.vlgmr.msra.gmra.mrb[88].mxu1 %v6113_v25 }
 0x396   : > { %5677 = vmatpush3.bf16.msra.mxu1 %v6122_v51 }
 0x397   : > { %5678 = vmatprep.subr.bf16.mxu1 %v6124_v27 }
 0x399   : > { %v3273_v24 = vld [vmem:[#allocation6 + $0x50] sm:$0x77] }
 0x39a   : > { %v5055_v22 = vcombine.high %v3273_v24, %v3273_v24  ;;  %v5054_v4 = vcombine.low %v3273_v24, %v3273_v24  ;;  %5679 = vmatpush3.bf16.msra.mxu1 %v6126_v49 }
 0x39b   : > { %5890 = vmatmul.mubr.msk.bf16.vlgmr.msra.gmra.mrb[104].mxu0 %vm619_vm2, %v6117_v6  ;;  %5680 = vmatprep.subr.bf16.mxu1 %v6128_v35 }
 0x39c   : > { %3706 = vmatprep.mubr.bf16.mxu1 %v5055_v22  ;;  %5699 = vmatpush3.bf16.msra.mxu0 %v6123_v26 }
 0x39d   : > { %3707 = vmatmul.mubr.bf16.gmra.mrb[92].mxu1 %v5054_v4  ;;  %5700 = vmatprep.subr.bf16.mxu0 %v6125_v28 }
 0x39e   : > { %5681 = vmatpush3.bf16.msra.mxu1 %v6130_v8 }
 0x39f   : > { %5682 = vmatprep.subr.bf16.mxu1 %v6132_v41 }
 0x3a0   : > { %5701 = vmatpush3.bf16.msra.mxu0 %v6127_v29 }
 0x3a1   : > { %5702 = vmatprep.subr.bf16.mxu0 %v6129_v11 }
 0x3a2   : > { %5683 = vmatpush3.bf16.msra.mxu1 %v6134_v39 }
 0x3a3   : > { %5684 = vmatprep.subr.bf16.mxu1 %v6136_v20 }
 0x3a4   : > { %5703 = vmatpush3.bf16.msra.mxu0 %v6131_v31 }
 0x3a5   : > { %5704 = vmatprep.subr.bf16.mxu0 %v6133_v34 }
 0x3a6   : > { %5685 = vmatpush3.bf16.msra.mxu1 %v6138_v50  ;;  %v6154_v50 = vld [vmem:[%s7546_s7 + $0x100] sm:$0xff]  }
 0x3a7   : > { %5686 = vmatprep.subr.bf16.mxu1 %v6140_v57  ;;  %v6156_v57 = vld [vmem:[%s7546_s7 + $0x148] sm:$0xff]  }
 0x3a8   : > { %5705 = vmatpush3.bf16.msra.mxu0 %v6135_v13 }
 0x3a9   : > { %5706 = vmatprep.subr.bf16.mxu0 %v6137_v38 }
 0x3aa   : > { %5687 = vmatpush3.bf16.msra.mxu1 %v6142_v47 }
 0x3ab   : > { %5688 = vmatprep.subr.bf16.mxu1 %v6144_v54  ;;  %v6159_v54 = vld [vmem:[%s7546_s7 + $0x188] sm:$0xff]  }
 0x3ac   : > { %5707 = vmatpush3.bf16.msra.mxu0 %v6139_v56  ;;  %v6155_v56 = vld [vmem:[%s7546_s7 + $0x180] sm:$0xff]  }
 0x3ad   : > { %5708 = vmatprep.subr.bf16.mxu0 %v6141_v45  ;;  %v6157_v45 = vld [vmem:[%s7546_s7 + $0x1c8] sm:$0xff]  }
 0x3ae   : > { %5689 = vmatpush3.bf16.msra.mxu1 %v6146_v55 }
 0x3af   : > { %5690 = vmatprep.subr.bf16.mxu1 %v6148_v58 }
 0x3b0   : > { %5709 = vmatpush3.bf16.msra.mxu0 %v6143_v53  ;;  %v6158_v53 = vld [vmem:[%s7546_s7 + $0x108] sm:$0xff]  }
 0x3b1   : > { %5710 = vmatprep.subr.bf16.mxu0 %v6145_v59 }
 0x3b2   : > { %5691 = vmatpush3.bf16.msra.mxu1 %v6150_v61  ;;  %v6161_v61 = vld [vmem:[%s7546_s7 + $0x1d0] sm:$0xff]  }
 0x3b3   : > { %5720 = vmatprep.subr.bf16.mxu1 %v6152_v37  ;;  %v6162_v37 = vld [vmem:[%s7546_s7 + $0x110] sm:$0xff]  }
 0x3b4   : > { %5711 = vmatpush3.bf16.msra.mxu0 %v6147_v32 }
 0x3b5   : > { %5712 = vmatprep.subr.bf16.mxu0 %v6149_v60  ;;  %v6160_v60 = vld [vmem:[%s7546_s7 + $0x150] sm:$0xff]  }
 0x3b8   : > { %5713 = vmatpush3.bf16.msra.mxu0 %v6151_v63 }
 0x3b9   : > { %5742 = vmatprep.subr.bf16.mxu0 %v6153_v0  ;;  %v6163_v0 = vld [vmem:[%s7546_s7 + $0x190] sm:$0xff]  }
 0x450   : > { %v5630_v44 = vpop.f32.mrb[96].mxu0 }
 0x451   : > { %v5631_v42 = vpop.f32.mrb[97].mxu0 }
 0x452   : > { %v5632_v3 = vadd.f32 %v5631_v42, %v5630_v44  ;;  %v5633_v62 = vpop.f32.mrb[98].mxu0  ;;  %v6164_v44 = vld [vmem:[%s7546_s7 + $0x158] sm:$0xff]  }
 0x453   : > { %v5634_v5 = vpop.f32.mrb[99].mxu0  ;;  %v6165_v42 = vld [vmem:[%s7546_s7 + $0x1d8] sm:$0xff]  }
 0x454   : > { %v5635_v17 = vadd.f32 %v5634_v5, %v5633_v62  ;;  %v3653_v2 = vadd.f32 %v5632_v3, %v5046_v9  ;;  %v6166_v3 = vld [vmem:[%s7546_s7 + $0x118] sm:$0xff]   ;;  %v6168_v5 = vld [vmem:[%s7546_s7 + $0x160] sm:$0xff]  }
 0x455   : > { %v6167_v62 = vld [vmem:[%s7546_s7 + $0x198] sm:$0xff]  }
 0x456   : > { %v3656_v30 = vadd.f32 %v5635_v17, %v5046_v9  ;;  %v6169_v17 = vld [vmem:[%s7546_s7 + $0x1e0] sm:$0xff]  }
 0x466   : > { %v5636_v7 = vpop.f32.mrb[100].mxu0 }
 0x467   : > { %v5637_v46 = vpop.f32.mrb[101].mxu0 }
 0x468   : > { %v5638_v10 = vadd.f32 %v5637_v46, %v5636_v7  ;;  %v5639_v12 = vpop.f32.mrb[102].mxu0  ;;  %v5658_v15 = vpop.f32.mrb[88].mxu1  ;;  %v6170_v7 = vld [vmem:[%s7546_s7 + $0x120] sm:$0xff]  }
 0x469   : > { %v5640_v40 = vpop.f32.mrb[103].mxu0  ;;  %v5659_v16 = vpop.f32.mrb[89].mxu1  ;;  %v6171_v46 = vld [vmem:[%s7546_s7 + $0x1a0] sm:$0xff]   ;;  %v6174_v12 = vld [vmem:[%s7546_s7 + $0x128] sm:$0xff]  }
 0x46a   : > { %v5660_v18 = vadd.f32 %v5659_v16, %v5658_v15  ;;  %v5661_v36 = vpop.f32.mrb[90].mxu1  ;;  %v3661_v48 = vadd.f32 %v5638_v10, %v5046_v9  ;;  %v6172_v9 = vld [vmem:[%s7546_s7 + $0x168] sm:$0xff]   ;;  %v6176_v15 = vld [vmem:[%s7546_s7 + $0x170] sm:$0xff]  }
 0x46b   : > { %v5662_v19 = vpop.f32.mrb[91].mxu1  ;;  %v6173_v10 = vld [vmem:[%s7546_s7 + $0x1e8] sm:$0xff]   ;;  %v6177_v16 = vld [vmem:[%s7546_s7 + $0x1f0] sm:$0xff]  }
 0x46c   : > { %v5663_v21 = vadd.f32 %v5662_v19, %v5661_v36  ;;  %v3701_v33 = vadd.f32 %v5660_v18, %v3653_v2  ;;  %v6175_v40 = vld [vmem:[%s7546_s7 + $0x1a8] sm:$0xff]   ;;  %v6178_v2 = vld [vmem:[%s7546_s7 + $0x130] sm:$0xff]   ;;  %v6180_v36 = vld [vmem:[%s7546_s7 + $0x178] sm:$0xff]  }
 0x46d   : > { %v6179_v18 = vld [vmem:[%s7546_s7 + $0x1b0] sm:$0xff]   ;;  %v6181_v19 = vld [vmem:[%s7546_s7 + $0x1f8] sm:$0xff]  }
 0x46e   : > { %v5891_v52 = vpop.f32.mrb[104].mxu0  ;;  %v3704_v43 = vadd.f32 %v5663_v21, %v3656_v30  ;;  %v6182_v30 = vld [vmem:[%s7546_s7 + $0x138] sm:$0xff]  }
 0x46f   : > { %v3748_v25 = vpop.f32.mrb[105].mxu0  ;;  %v6183_v21 = vld [vmem:[%s7546_s7 + $0x1b8] sm:$0xff]  }
 0x470   : > { %v3749_v23 = vadd.f32 %v3748_v25, %v3701_v33  ;;  %v5892_v6 = vpop.f32.mrb[106].mxu0  ;;  %v5664_v4 = vpop.f32.mrb[92].mxu1  ;;  %v6184_v33 = vld [vmem:[%s7546_s7 + $0x200] sm:$0xff]  }
 0x471   : > { %v3751_v24 = vpop.f32.mrb[107].mxu0  ;;  %v5665_v14 = vpop.f32.mrb[93].mxu1  ;;  %v6187_v6 = vld [vmem:[%s7546_s7 + $0x218] sm:$0xff]  }
 0x472   : > { %3762 = vst [vmem:[#allocation5] sm:$0xff] %v3749_v23  ;;  %v3752_v22 = vadd.f32 %v3751_v24, %v3704_v43  ;;  %v5666_v51 = vadd.f32 %v5665_v14, %v5664_v4  ;;  %v5667_v26 = vpop.f32.mrb[94].mxu1  ;;  %v6194_v39 = vpack.c.bf16 %v3749_v23, %v3749_v23  ;;  %v6185_v43 = vld [vmem:[%s7546_s7 + $0x208] sm:$0xff]   ;;  %v6188_v24 = vld [vmem:[%s7546_s7 + $0x220] sm:$0xff]   ;;  %v6190_v4 = vld [vmem:[%s7546_s7 + $0x230] sm:$0xff]  }
 0x473   : > { %v5668_v27 = vpop.f32.mrb[95].mxu1  ;;  %v6191_v14 = vld [vmem:[%s7546_s7 + $0x238] sm:$0xff]  }
 0x474   : > { %3763 = vst [vmem:[#allocation5 + $0x8] sm:$0xff] %v3752_v22  ;;  %v3709_v28 = vadd.f32 %v5666_v51, %v3661_v48  ;;  %v6198_v47 = vpack.c.bf16 %v3752_v22, %v3752_v22  ;;  %v5095_v27 = vld [vmem:[%s7547_s8] ss:$0 sm:$0xff] }
 0x476   : > { %v3757_v49 = vadd.f32 %v5891_v52, %v3709_v28 }
 0x478   : > { %3764 = vst [vmem:[#allocation5 + $0x10] sm:$0x3f] %v3757_v49 }
 0x47b   : > { %v3768_v29 = vld [vmem:[#allocation5 + $0x1] sm:$0xff] }
 0x47c   : > { %v3771_v35 = vld [vmem:[#allocation5 + $0x2] sm:$0xff]  ;;  %v5400_v8 = vpack.c.bf16 %v3768_v29, %v3749_v23  ;;  %v6195_v13 = vpack.c.bf16 %v3768_v29, %v3768_v29  ;;  %v6186_v23 = vld [vmem:[%s7546_s7 + $0x210] sm:$0xff]  }
 0x47d   : > { %v3774_v11 = vld [vmem:[#allocation5 + $0x6] sm:$0xff]  ;;  %v6196_v20 = vpack.c.bf16 %v3771_v35, %v3771_v35 }
 0x47e   : > { %v5405_v31 = vpack.c.bf16 %v3774_v11, %v3771_v35  ;;  %v7356_v41 = vld [vmem:[#allocation5 + $0x7] sm:$0xff]  ;;  %5401 = vst [vmem:[#allocation6] sm:$0xff] %v5400_v8   ;;  %v6197_v38 = vpack.c.bf16 %v3774_v11, %v3774_v11  ;;  %4444 = vmatprep.mubr.bf16.mxu1 %v6195_v13 }
 0x47f   : > { %v5410_v34 = vpack.c.bf16 %v3752_v22, %v7356_v41  ;;  %4445 = vmatmul.mubr.bf16.vlgmr.msra.gmra.mrb[96].mxu1 %v6194_v39  ;;  %v7377_v59 = vld [vmem:[#allocation5 + $0xc] sm:$0xff]  ;;  %v6200_v52 = vpack.c.bf16 %v7356_v41, %v7356_v41 }
 0x480   : > { %5417 = vst [vmem:[#allocation6 + $0x8] sm:$0xff] %v5405_v31   ;;  %4484 = vmatprep.mubr.bf16.mxu0 %v6197_v38  ;;  %v3786_v55 = vld [vmem:[#allocation5 + $0xd] sm:$0xff]  ;;  %5721 = vmatpush3.bf16.msra.mxu1 %v6154_v50  ;;  %v6201_v25 = vpack.c.bf16 %v7377_v59, %v7377_v59 }
 0x481   : > { %5418 = vst [vmem:[#allocation6 + $0x10] sm:$0xff] %v5410_v34   ;;  %4485 = vmatmul.mubr.bf16.vlgmr.msra.gmra.mrb[108].mxu0 %v6196_v20  ;;  %v3789_v32 = vld [vmem:[#allocation5 + $0xe] sm:$0xff]  ;;  %4524 = vmatprep.mubr.bf16.mxu1 %v6198_v47  ;;  %v6199_v63 = vpack.c.bf16 %v3786_v55, %v3786_v55 }
 0x482   : > { %5743 = vmatpush3.bf16.msra.mxu0 %v6155_v56  ;;  %v3790_v58 = vpack.c.bf16 %v3789_v32, %v3789_v32  ;;  %5722 = vmatprep.subr.bf16.mxu1 %v6156_v57  ;;  %v6189_v22 = vld [vmem:[%s7546_s7 + $0x228] sm:$0xff]  }
 0x483   : > { %5744 = vmatprep.subr.bf16.mxu0 %v6157_v45  ;;  %4564 = vmatprep.mubr.bf16.mxu0 %v6199_v63 }
 0x484   : > { %3791 = vst [vmem:[#allocation6 + $0x20] sm:$0xf] %v3790_v58  ;;  %5723 = vmatpush3.bf16.msra.mxu1 %v6158_v53 }
 0x485   : > { %5724 = vmatprep.subr.bf16.mxu1 %v6160_v60 }
 0x486   : > { %5745 = vmatpush3.bf16.msra.mxu0 %v6159_v54 }
 0x487   : > { %5746 = vmatprep.subr.bf16.mxu0 %v6161_v61 }
 0x488   : > { %5725 = vmatpush3.bf16.msra.mxu1 %v6162_v37 }
 0x489   : > { %5726 = vmatprep.subr.bf16.mxu1 %v6164_v44 }
 0x48a   : > { %5747 = vmatpush3.bf16.msra.mxu0 %v6163_v0 }
 0x48b   : > { %5748 = vmatprep.subr.bf16.mxu0 %v6165_v42  ;;  %v6192_v48 = vld [vmem:[#allocation6 + $0x20] ss:$0 sps:$4 sm:$0xff]  }
 0x48c   : > { %5727 = vmatpush3.bf16.msra.mxu1 %v6166_v3 }
 0x48d   : > { %5728 = vmatprep.subr.bf16.mxu1 %v6168_v5 }
 0x48e   : > { %5749 = vmatpush3.bf16.msra.mxu0 %v6167_v62 }
 0x48f   : > { %5750 = vmatprep.subr.bf16.mxu0 %v6169_v17 }
 0x490   : > { %5729 = vmatpush3.bf16.msra.mxu1 %v6170_v7 }
 0x491   : > { %5730 = vmatprep.subr.bf16.mxu1 %v6172_v9 }
 0x492   : > { %5751 = vmatpush3.bf16.msra.mxu0 %v6171_v46 }
 0x493   : > { %5752 = vmatprep.subr.bf16.mxu0 %v6173_v10 }
 0x494   : > { %5731 = vmatpush3.bf16.msra.mxu1 %v6174_v12 }
 0x495   : > { %5732 = vmatprep.subr.bf16.mxu1 %v6176_v15 }
 0x496   : > { %5753 = vmatpush3.bf16.msra.mxu0 %v6175_v40 }
 0x497   : > { %5754 = vmatprep.subr.bf16.mxu0 %v6177_v16 }
 0x498   : > { %5733 = vmatpush3.bf16.msra.mxu1 %v6178_v2 }
 0x499   : > { %5734 = vmatprep.subr.bf16.mxu1 %v6180_v36 }
 0x49a   : > { %5755 = vmatpush3.bf16.msra.mxu0 %v6179_v18 }
 0x49b   : > { %5756 = vmatprep.subr.bf16.mxu0 %v6181_v19 }
 0x49c   : > { %5735 = vmatpush3.bf16.msra.mxu1 %v6182_v30 }
 0x49d   : > { %5893 = vmatprep.subr.bf16.mxu1 %v6266_v1 }
 0x49e   : > { %5757 = vmatpush3.bf16.msra.mxu0 %v6183_v21 }
 0x49f   : > { %4525 = vmatmul.mubr.bf16.vlgmr.msra.gmra.mrb[100].mxu1 %v6200_v52 }
 0x4a0   : > { %5894 = vmatpush3.bf16.msra.mxu1 %v6184_v33  ;;  %5909 = vmatprep.mubr.msk.bf16.mxu1 %vm6267_vm0, %v6266_v1 }
 0x4a1   : > { %4565 = vmatmul.mubr.bf16.vlgmr.msra.gmra.mrb[112].mxu0 %v6201_v25  ;;  %5895 = vmatprep.subr.bf16.mxu1 %v6266_v1 }
 0x4a4   : > { %5896 = vmatpush3.bf16.msra.mxu1 %v6185_v43 }
 0x4a5   : > { %5897 = vmatprep.subr.bf16.mxu1 %v6266_v1 }
 0x4a8   : > { %5898 = vmatpush3.bf16.msra.mxu1 %v6186_v23 }
 0x4a9   : > { %5899 = vmatprep.subr.bf16.mxu1 %v6266_v1 }
 0x4ac   : > { %5900 = vmatpush3.bf16.msra.mxu1 %v6187_v6 }
 0x4ad   : > { %5901 = vmatprep.subr.bf16.mxu1 %v6266_v1 }
 0x4b0   : > { %5902 = vmatpush3.bf16.msra.mxu1 %v6188_v24 }
 0x4b1   : > { %5903 = vmatprep.subr.bf16.mxu1 %v6266_v1 }
 0x4b4   : > { %5904 = vmatpush3.bf16.msra.mxu1 %v6189_v22 }
 0x4b5   : > { %5905 = vmatprep.subr.bf16.mxu1 %v6266_v1 }
 0x4b8   : > { %5906 = vmatpush3.bf16.msra.mxu1 %v6190_v4 }
 0x4b9   : > { %5907 = vmatprep.subr.bf16.mxu1 %v6266_v1 }
 0x4bc   : > { %5908 = vmatpush3.bf16.msra.mxu1 %v6191_v14 }
 0x4bf   : > { %5910 = vmatmul.mubr.bf16.vlgmr.msra.gmra.mrb[104].mxu1 %v6192_v48 }
 0x552   : > { %v5692_v51 = vpop.f32.mrb[96].mxu1 }
 0x553   : > { %v5693_v28 = vpop.f32.mrb[97].mxu1 }
 0x554   : > { %v5714_v26 = vpop.f32.mrb[108].mxu0  ;;  %v5694_v29 = vadd.f32 %v5693_v28, %v5692_v51  ;;  %v5695_v11 = vpop.f32.mrb[98].mxu1 }
 0x555   : > { %v5715_v49 = vpop.f32.mrb[109].mxu0  ;;  %v5696_v31 = vpop.f32.mrb[99].mxu1 }
 0x556   : > { %v5716_v35 = vadd.f32 %v5715_v49, %v5714_v26  ;;  %v5717_v8 = vpop.f32.mrb[110].mxu0  ;;  %v4447_v34 = vadd.f32 %v5694_v29, %v5095_v27 }
 0x557   : > { %v5718_v41 = vpop.f32.mrb[111].mxu0 }
 0x558   : > { %v4487_v1 = vadd.f32 %v5716_v35, %v4447_v34 }
 0x572   : > { %v5736_v39 = vpop.f32.mrb[100].mxu1 }
 0x573   : > { %v5737_v20 = vpop.f32.mrb[101].mxu1 }
 0x574   : > { %v5758_v13 = vpop.f32.mrb[112].mxu0  ;;  %v5738_v50 = vadd.f32 %v5737_v20, %v5736_v39  ;;  %v5739_v57 = vpop.f32.mrb[102].mxu1 }
 0x575   : > { %v5759_v38 = vpop.f32.mrb[113].mxu0  ;;  %v5740_v47 = vpop.f32.mrb[103].mxu1 }
 0x576   : > { %v5760_v56 = vadd.f32 %v5759_v38, %v5758_v13  ;;  %v5761_v45 = vpop.f32.mrb[114].mxu0  ;;  %v4527_v54 = vadd.f32 %v5738_v50, %v4487_v1 }
 0x577   : > { %v5762_v53 = vpop.f32.mrb[115].mxu0 }
 0x578   : > { %v4567_v59 = vadd.f32 %v5760_v56, %v4527_v54 }
 0x592   : > { %v4606_v55 = vpop.f32.mrb[104].mxu1 }
 0x593   : > { %v4607_v32 = vadd.f32 %v4606_v55, %v4567_v59  ;;  %v5911_v58 = vpop.f32.mrb[105].mxu1 }
 0x594   : > { %v4609_v60 = vpop.f32.mrb[106].mxu1 }
 0x595   : > { %v4612_v61 = vmax.f32 %v4607_v32, 0.0  ;;  %v5912_v63 = vpop.f32.mrb[107].mxu1 }
 0x597   : > { %v4614_v37 = vrot.slane %v4612_v61, 4 }
 0x599   : > { %v4617_v0 = vsel %vm4616_vm8, %v4612_v61, %v4614_v37 }
 0x59a   : > { %4618 = vst [vmem:[%s325_s28] sm:$0xf] %v4617_v0 }
 0x59b   : > { %6215 = shalt.err (!%p6212_p3)
}
 0x59c   : > { %s6216_s26 = scalar_lea.hbm %s7497_s21, 64  ;;  %s6220_s28 = scalar_lea.hbm %s7548_s9, 128 }
 0x59d   : > { %p6217_p4 = scmp.ne.s32.totalorder %s7497_s21, %s6216_s26  ;;  %p6221_p9 = scmp.lt.u32.totalorder %s7497_s21, %s7548_s9 }
 0x59e   : > { %p6222_p10 = scmp.lt.u32.totalorder %s6220_s28, %s6216_s26  ;;  %p6224_p12 = scmp.lt.u32.totalorder %s6216_s26, %s7497_s21 }
 0x59f   : > { %p6218_p7 = pnand %p6217_p4, %p6358_p5 }
 0x5a0   : > { %p6223_p11 = por %p6222_p10, %p6221_p9 }
 0x5a1   : > { %p6219_p8 = pneg %p6218_p7 }
 0x5a2   : > { %p6225_p13 = por %p6224_p12, %p6223_p11 }
 0x5a4   : > { %p6226_p0 = pnand %p6225_p13, %p6219_p8 }
 0x5a6   : > { %6229 = shalt.err (!%p6226_p0)
}
 0x5a7   : > { %5914 = dma.vmem_to_hbm [thread:$0]  (%p6358_p5), %s7499_s29, 64, %s7497_s21, %s4620_s22  }
 0x5a8 PF: > { %p5920_p1 = scmp.ge.s32.totalorder %s6264_s12, 2  ;;  %s4645_s23 = sand.u32 1, %s6252_s30  }
 0x5a9   : > { %s4646_s13 = scalar_lea.sflag [#allocation8], %s4645_s23 }
 0x5aa   : > { %p5917_p2 = pnand %p5920_p1, %p6362_p6 }
 0x5ac   : > { %6247 = dma.done.wait (!%p5917_p2), %s4646_s13, 64  }
 0x5ad   : > { %6249 = vsyncadd (!%p5917_p2), %s4646_s13, 4294967232  ;;  %p19_p3 = scmp.ge.s32.totalorder %s6345_s15, 4   ;;  %s7551_s30 = smov %s6256_s10 }
 0x5ae   : > { %s7552_s10 = smov %s6260_s11  ;;  %s7553_s11 = smov %s6356_s18 }
 0x5af   : > { %s7554_s12 = smov %s6345_s15  ;;  %21 = sbr.rel (!%p19_p3) target bundleno = 3 (0x3), region = 114 }
 0x5b6   :  { %4651 = vsyncpa [#allocation8], 1 }
 0x5b7   :  { %4653 = vsyncpa [#allocation8 + $0x1], 1 }

</bundles_post_ra>
